<compile_context>
chip_gen: v6e
topology: v6e:2x2x1
jax: 0.10.0
libtpu: 0.0.40
codegen_flags: <defaults>
</compile_context>

<pallas_src>
import jax
import jax.numpy as jnp
from jax import lax
from jax.experimental import pallas as pl
from jax.experimental.pallas import tpu as pltpu

NEG_SLOPE = 0.01  # torch.nn.LeakyReLU default negative_slope


def _leaky(v):
    return jnp.where(v >= 0, v, NEG_SLOPE * v)


def _left_pad(pad):
    # Left W-padding of the residual scratch, rounded up so the interior store
    # starts on a sublane-aligned (multiple-of-8) offset.
    return ((pad + 7) // 8) * 8


def _vunet_rnb_kernel(x_ref, a_ref, wnin_ref, bnin_ref, wconv_ref, bconv_ref,
                      out_ref, rpad_ref):
    # x_ref : (H, W, C)      a_ref : (H, W, A)        (batch squeezed away)
    # wnin  : (A, C)         bnin  : (1, C)           (gamma/beta pre-folded)
    # wconv : (K, K*2C, C)   bconv : (1, C)           (gamma/beta pre-folded)
    # rpad  : VMEM scratch (H + 2*pad, W + 2*wl, 2C) = zero halo + residual.
    H, W, C = x_ref.shape
    A = a_ref.shape[-1]
    K = wconv_ref.shape[0]
    pad = K // 2
    wl = _left_pad(pad)
    C2 = 2 * C
    HW = H * W

    # --- Zero only the halo border rows/cols of the scratch.  Done every grid
    # step (cheap: 2*pad rows + 2*pad cols), so correctness never depends on
    # which core / previous program_id touched the scratch (megacore-safe).
    zrow = jnp.zeros((pad, rpad_ref.shape[1], C2), jnp.float32)
    rpad_ref[pl.ds(0, pad), :, :] = zrow
    rpad_ref[pl.ds(pad + H, pad), :, :] = zrow
    zcol = jnp.zeros((H, pad, C2), jnp.float32)
    rpad_ref[pl.ds(pad, H), pl.ds(wl - pad, pad), :] = zcol
    rpad_ref[pl.ds(pad, H), pl.ds(wl + W, pad), :] = zcol

    # --- Stage 1: LeakyReLU(a) -> 1x1 conv as ONE whole-image matmul, then
    # concat with LeakyReLU(x).  LeakyReLU(concat) == concat(LeakyReLU parts),
    # dropout(p=0) is the identity.  Single aligned store into the scratch.
    a_flat = _leaky(a_ref[...].astype(jnp.float32).reshape(HW, A))
    nin = jnp.dot(a_flat, wnin_ref[...], preferred_element_type=jnp.float32)
    nin = nin + bnin_ref[...]
    x_flat = x_ref[...].astype(jnp.float32).reshape(HW, C)
    r = jnp.concatenate([_leaky(x_flat), _leaky(nin)], axis=-1)      # (HW, 2C)
    rpad_ref[pl.ds(pad, H), pl.ds(wl, W), :] = r.reshape(H, W, C2)

    # --- Stage 2: KxK SAME conv as K whole-slab matmuls; the K dx-taps are
    # folded into the contraction dimension (K*2C) for better MXU utilization.
    acc = jnp.zeros((HW, C), jnp.float32)
    for dy in range(K):
        patch = jnp.concatenate(
            [rpad_ref[pl.ds(dy, H), pl.ds(wl - pad + dx, W), :]
             for dx in range(K)],
            axis=-1)                                                 # (H, W, K*2C)
        acc = acc + jnp.dot(patch.reshape(HW, K * C2), wconv_ref[dy],
                            preferred_element_type=jnp.float32)
    acc = acc + bconv_ref[...]

    # --- Skip connection + single full-slab output store.
    out_ref[...] = (x_flat + acc).reshape(H, W, C).astype(out_ref.dtype)


@jax.jit
def vunet_rnb(x, a, w_nin_hwio, b_nin, gamma_nin, beta_nin,
              w_conv_hwio, b_conv, gamma_conv, beta_conv):
    """Fused VunetRNB forward.

    x: (N, H, W, C), a: (N, H, W, A), w_nin_hwio: (1, 1, A, C),
    w_conv_hwio: (K, K, 2C, C), b/gamma/beta: (C,). Returns (N, H, W, C).
    """
    N, H, W, C = x.shape
    A = a.shape[-1]
    K = w_conv_hwio.shape[0]
    pad = K // 2
    wl = _left_pad(pad)

    # Fold NormConv2d's learned affine into the conv parameters:
    #   gamma * (W*x + b) + beta == (gamma*W)*x + (gamma*b + beta)
    w_nin_f = (w_nin_hwio * gamma_nin)[0, 0]                          # (A, C)
    b_nin_f = (gamma_nin * b_nin + beta_nin).reshape(1, C)
    w_conv_f = (w_conv_hwio * gamma_conv).reshape(K, K * 2 * C, C)    # dx folded
    b_conv_f = (gamma_conv * b_conv + beta_conv).reshape(1, C)

    params = (w_nin_f, b_nin_f, w_conv_f, b_conv_f)
    param_specs = [
        pl.BlockSpec(p.shape, lambda n, nd=p.ndim: (0,) * nd) for p in params
    ]

    return pl.pallas_call(
        _vunet_rnb_kernel,
        out_shape=jax.ShapeDtypeStruct((N, H, W, C), x.dtype),
        grid=(N,),
        in_specs=[
            pl.BlockSpec((None, H, W, C), lambda n: (n, 0, 0, 0)),
            pl.BlockSpec((None, H, W, A), lambda n: (n, 0, 0, 0)),
            *param_specs,
        ],
        out_specs=pl.BlockSpec((None, H, W, C), lambda n: (n, 0, 0, 0)),
        scratch_shapes=[
            pltpu.VMEM((H + 2 * pad, W + 2 * wl, 2 * C), jnp.float32),
        ],
        compiler_params=pltpu.CompilerParams(
            dimension_semantics=("parallel",)),
    )(x, a, *params)


def _reference_nhwc(x, a, w_nin_hwio, b_nin, g_nin, beta_nin,
                    w_conv_hwio, b_conv, g_conv, beta_conv):
    """Pure-JAX reference mirroring the PyTorch module (NHWC/HWIO)."""
    dn = ("NHWC", "HWIO", "NHWC")
    a1 = _leaky(a)
    nin = lax.conv_general_dilated(a1, w_nin_hwio, (1, 1), "VALID",
                                   dimension_numbers=dn) + b_nin
    nin = g_nin * nin + beta_nin
    r = jnp.concatenate([x, nin], axis=-1)
    r = _leaky(r)
    c = lax.conv_general_dilated(r, w_conv_hwio, (1, 1), "SAME",
                                 dimension_numbers=dn) + b_conv
    c = g_conv * c + beta_conv
    return x + c


if __name__ == "__main__":
    # Small deterministic config: channels=8, a_channels=4, kernel_size=3.
    N, H, W = 2, 16, 16
    C, A, K = 8, 4, 3

    ks = jax.random.split(jax.random.PRNGKey(0), 12)
    x = jax.random.normal(ks[0], (N, H, W, C), jnp.float32)
    a = jax.random.normal(ks[1], (N, H, W, A), jnp.float32)

    # --- NormConv2d "nin" (1x1, A -> C): weight_norm over non-output dims ---
    v_nin = 0.3 * jax.random.normal(ks[2], (1, 1, A, C), jnp.float32)      # HWIO
    g_nin_wn = 1.0 + 0.1 * jax.random.normal(ks[3], (C,), jnp.float32)
    w_nin_hwio = g_nin_wn * v_nin / jnp.sqrt(
        jnp.sum(v_nin ** 2, axis=(0, 1, 2), keepdims=True))
    b_nin = 0.1 * jax.random.normal(ks[4], (C,), jnp.float32)
    gamma_nin = 1.0 + 0.1 * jax.random.normal(ks[5], (C,), jnp.float32)
    beta_nin = 0.1 * jax.random.normal(ks[6], (C,), jnp.float32)

    # --- NormConv2d "conv" (3x3, 2C -> C, padding=1): weight_norm ---
    v_conv = 0.2 * jax.random.normal(ks[7], (K, K, 2 * C, C), jnp.float32)  # HWIO
    g_conv_wn = 1.0 + 0.1 * jax.random.normal(ks[8], (C,), jnp.float32)
    w_conv_hwio = g_conv_wn * v_conv / jnp.sqrt(
        jnp.sum(v_conv ** 2, axis=(0, 1, 2), keepdims=True))
    b_conv = 0.1 * jax.random.normal(ks[9], (C,), jnp.float32)
    gamma_conv = 1.0 + 0.1 * jax.random.normal(ks[10], (C,), jnp.float32)
    beta_conv = 0.1 * jax.random.normal(ks[11], (C,), jnp.float32)

    out = vunet_rnb(x, a, w_nin_hwio, b_nin, gamma_nin, beta_nin,
                    w_conv_hwio, b_conv, gamma_conv, beta_conv)
    out = jax.block_until_ready(out)

    ref = _reference_nhwc(x, a, w_nin_hwio, b_nin, gamma_nin, beta_nin,
                          w_conv_hwio, b_conv, gamma_conv, beta_conv)

    if not jnp.allclose(out, ref, atol=1e-3, rtol=1e-3):
        raise AssertionError(
            f"mismatch: max abs diff = {float(jnp.max(jnp.abs(out - ref)))}")
    print("KERNEL_OK")
</pallas_src>

<mosaic_0001>
module attributes {stable_mosaic.version = 11 : i64} {
  func.func @_vunet_rnb_kernel(%arg0: i32, %arg1: memref<1x16x16x8xf32, #tpu.memory_space<vmem>>, %arg2: memref<1x16x16x4xf32, #tpu.memory_space<vmem>>, %arg3: memref<4x8xf32, #tpu.memory_space<vmem>>, %arg4: memref<1x8xf32, #tpu.memory_space<vmem>>, %arg5: memref<3x48x8xf32, #tpu.memory_space<vmem>>, %arg6: memref<1x8xf32, #tpu.memory_space<vmem>>, %arg7: memref<1x16x16x8xf32, #tpu.memory_space<vmem>>, %arg8: memref<18x32x16xf32, #tpu.memory_space<vmem>>) attributes {dimension_semantics = [#tpu.dimension_semantics<parallel>], iteration_bounds = array<i64: 2>, scalar_prefetch = 0 : i64, scratch_operands = 1 : i64, tpu.core_type = #tpu.core_type<tc>, window_params = [{transform_indices = @transform_0, window_bounds = array<i64: 1, 16, 16, 8>}, {transform_indices = @transform_1, window_bounds = array<i64: 1, 16, 16, 4>}, {pipeline_mode = #tpu.pipeline_mode<synchronous>, transform_indices = @transform_2, window_bounds = array<i64: 4, 8>}, {pipeline_mode = #tpu.pipeline_mode<synchronous>, transform_indices = @transform_3, window_bounds = array<i64: 1, 8>}, {pipeline_mode = #tpu.pipeline_mode<synchronous>, transform_indices = @transform_4, window_bounds = array<i64: 3, 48, 8>}, {pipeline_mode = #tpu.pipeline_mode<synchronous>, transform_indices = @transform_5, window_bounds = array<i64: 1, 8>}, {transform_indices = @transform_6, window_bounds = array<i64: 1, 16, 16, 8>}]} {
    %cst = arith.constant 0.000000e+00 : f32
    %0 = vector.broadcast %cst : f32 to vector<1x32x16xf32>
    %c0 = arith.constant 0 : index
    %c0_0 = arith.constant 0 : index
    %c0_1 = arith.constant 0 : index
    %1 = vector.load %arg8[%c0, %c0_0, %c0_1] : memref<18x32x16xf32, #tpu.memory_space<vmem>>, vector<1x32x16xf32>
    tpu.vector_store %arg8[%c0, %c0_0, %c0_1], %0 {strides = array<i32>} : memref<18x32x16xf32, #tpu.memory_space<vmem>>, vector<1x32x16xf32>,
    %c17 = arith.constant 17 : index
    %c0_2 = arith.constant 0 : index
    %c0_3 = arith.constant 0 : index
    %2 = vector.load %arg8[%c17, %c0_2, %c0_3] : memref<18x32x16xf32, #tpu.memory_space<vmem>>, vector<1x32x16xf32>
    tpu.vector_store %arg8[%c17, %c0_2, %c0_3], %0 {strides = array<i32>} : memref<18x32x16xf32, #tpu.memory_space<vmem>>, vector<1x32x16xf32>,
    %cst_4 = arith.constant 0.000000e+00 : f32
    %3 = vector.broadcast %cst_4 : f32 to vector<16x1x16xf32>
    %c1 = arith.constant 1 : index
    %c7 = arith.constant 7 : index
    %c0_5 = arith.constant 0 : index
    %4 = vector.load %arg8[%c1, %c7, %c0_5] : memref<18x32x16xf32, #tpu.memory_space<vmem>>, vector<16x1x16xf32>
    tpu.vector_store %arg8[%c1, %c7, %c0_5], %3 {strides = array<i32>} : memref<18x32x16xf32, #tpu.memory_space<vmem>>, vector<16x1x16xf32>,
    %c1_6 = arith.constant 1 : index
    %c24 = arith.constant 24 : index
    %c0_7 = arith.constant 0 : index
    %5 = vector.load %arg8[%c1_6, %c24, %c0_7] : memref<18x32x16xf32, #tpu.memory_space<vmem>>, vector<16x1x16xf32>
    tpu.vector_store %arg8[%c1_6, %c24, %c0_7], %3 {strides = array<i32>} : memref<18x32x16xf32, #tpu.memory_space<vmem>>, vector<16x1x16xf32>,
    %c0_8 = arith.constant 0 : index
    %c0_9 = arith.constant 0 : index
    %c0_10 = arith.constant 0 : index
    %c0_11 = arith.constant 0 : index
    %6 = vector.load %arg2[%c0_8, %c0_9, %c0_10, %c0_11] : memref<1x16x16x4xf32, #tpu.memory_space<vmem>>, vector<1x16x16x4xf32>
    %7 = vector.shape_cast %6 : vector<1x16x16x4xf32> to vector<16x16x4xf32>
    %8 = vector.shape_cast %7 : vector<16x16x4xf32> to vector<256x4xf32>
    %cst_12 = arith.constant 0.000000e+00 : f32
    %9 = vector.broadcast %cst_12 : f32 to vector<256x4xf32>
    %10 = arith.cmpf oge, %8, %9 : vector<256x4xf32>
    %cst_13 = arith.constant 0.00999999977 : f32
    %11 = vector.broadcast %cst_13 : f32 to vector<256x4xf32>
    %12 = arith.mulf %11, %8 : vector<256x4xf32>
    %13 = arith.select %10, %8, %12 : vector<256x4xi1>, vector<256x4xf32>
    %c0_14 = arith.constant 0 : index
    %c0_15 = arith.constant 0 : index
    %14 = vector.load %arg3[%c0_14, %c0_15] : memref<4x8xf32, #tpu.memory_space<vmem>>, vector<4x8xf32>
    %cst_16 = arith.constant dense<0.000000e+00> : vector<256x8xf32>
    %15 = tpu.matmul %13, %14, %cst_16 {dimension_numbers = #tpu.dot_dimension_numbers<[1], [0], [0], [1], [0, 0, 1, 1], [], []>} : vector<256x4xf32>, vector<4x8xf32>, vector<256x8xf32> -> vector<256x8xf32>
    %c0_17 = arith.constant 0 : index
    %c0_18 = arith.constant 0 : index
    %16 = vector.load %arg4[%c0_17, %c0_18] : memref<1x8xf32, #tpu.memory_space<vmem>>, vector<1x8xf32>
    %17 = vector.broadcast %16 : vector<1x8xf32> to vector<256x8xf32>
    %18 = arith.addf %15, %17 : vector<256x8xf32>
    %c0_19 = arith.constant 0 : index
    %c0_20 = arith.constant 0 : index
    %c0_21 = arith.constant 0 : index
    %c0_22 = arith.constant 0 : index
    %19 = vector.load %arg1[%c0_19, %c0_20, %c0_21, %c0_22] : memref<1x16x16x8xf32, #tpu.memory_space<vmem>>, vector<1x16x16x8xf32>
    %20 = vector.shape_cast %19 : vector<1x16x16x8xf32> to vector<16x16x8xf32>
    %21 = vector.shape_cast %20 : vector<16x16x8xf32> to vector<256x8xf32>
    %cst_23 = arith.constant 0.000000e+00 : f32
    %22 = vector.broadcast %cst_23 : f32 to vector<256x8xf32>
    %23 = arith.cmpf oge, %21, %22 : vector<256x8xf32>
    %cst_24 = arith.constant 0.00999999977 : f32
    %24 = vector.broadcast %cst_24 : f32 to vector<256x8xf32>
    %25 = arith.mulf %24, %21 : vector<256x8xf32>
    %26 = arith.select %23, %21, %25 : vector<256x8xi1>, vector<256x8xf32>
    %cst_25 = arith.constant 0.000000e+00 : f32
    %27 = vector.broadcast %cst_25 : f32 to vector<256x8xf32>
    %28 = arith.cmpf oge, %18, %27 : vector<256x8xf32>
    %cst_26 = arith.constant 0.00999999977 : f32
    %29 = vector.broadcast %cst_26 : f32 to vector<256x8xf32>
    %30 = arith.mulf %29, %18 : vector<256x8xf32>
    %31 = arith.select %28, %18, %30 : vector<256x8xi1>, vector<256x8xf32>
    %32 = tpu.concatenate %26, %31 in 1 : vector<256x8xf32>, vector<256x8xf32> -> vector<256x16xf32>
    %33 = vector.shape_cast %32 : vector<256x16xf32> to vector<16x16x16xf32>
    %c1_27 = arith.constant 1 : index
    %c8 = arith.constant 8 : index
    %c0_28 = arith.constant 0 : index
    %34 = vector.load %arg8[%c1_27, %c8, %c0_28] : memref<18x32x16xf32, #tpu.memory_space<vmem>>, vector<16x16x16xf32>
    tpu.vector_store %arg8[%c1_27, %c8, %c0_28], %33 {strides = array<i32>} : memref<18x32x16xf32, #tpu.memory_space<vmem>>, vector<16x16x16xf32>,
    %cst_29 = arith.constant 0.000000e+00 : f32
    %35 = vector.broadcast %cst_29 : f32 to vector<256x8xf32>
    %c0_30 = arith.constant 0 : index
    %c7_31 = arith.constant 7 : index
    %c0_32 = arith.constant 0 : index
    %36 = vector.load %arg8[%c0_30, %c7_31, %c0_32] : memref<18x32x16xf32, #tpu.memory_space<vmem>>, vector<16x16x16xf32>
    %c0_33 = arith.constant 0 : index
    %c8_34 = arith.constant 8 : index
    %c0_35 = arith.constant 0 : index
    %37 = vector.load %arg8[%c0_33, %c8_34, %c0_35] : memref<18x32x16xf32, #tpu.memory_space<vmem>>, vector<16x16x16xf32>
    %c0_36 = arith.constant 0 : index
    %c9 = arith.constant 9 : index
    %c0_37 = arith.constant 0 : index
    %38 = vector.load %arg8[%c0_36, %c9, %c0_37] : memref<18x32x16xf32, #tpu.memory_space<vmem>>, vector<16x16x16xf32>
    %39 = tpu.concatenate %36, %37, %38 in 2 : vector<16x16x16xf32>, vector<16x16x16xf32>, vector<16x16x16xf32> -> vector<16x16x48xf32>
    %40 = vector.shape_cast %39 : vector<16x16x48xf32> to vector<256x48xf32>
    %c0_38 = arith.constant 0 : index
    %c0_39 = arith.constant 0 : index
    %c0_40 = arith.constant 0 : index
    %41 = vector.load %arg5[%c0_38, %c0_39, %c0_40] : memref<3x48x8xf32, #tpu.memory_space<vmem>>, vector<1x48x8xf32>
    %42 = vector.shape_cast %41 : vector<1x48x8xf32> to vector<48x8xf32>
    %cst_41 = arith.constant dense<0.000000e+00> : vector<256x8xf32>
    %43 = tpu.matmul %40, %42, %cst_41 {dimension_numbers = #tpu.dot_dimension_numbers<[1], [0], [0], [1], [0, 0, 1, 1], [], []>} : vector<256x48xf32>, vector<48x8xf32>, vector<256x8xf32> -> vector<256x8xf32>
    %44 = arith.addf %35, %43 : vector<256x8xf32>
    %c1_42 = arith.constant 1 : index
    %c7_43 = arith.constant 7 : index
    %c0_44 = arith.constant 0 : index
    %45 = vector.load %arg8[%c1_42, %c7_43, %c0_44] : memref<18x32x16xf32, #tpu.memory_space<vmem>>, vector<16x16x16xf32>
    %c1_45 = arith.constant 1 : index
    %c8_46 = arith.constant 8 : index
    %c0_47 = arith.constant 0 : index
    %46 = vector.load %arg8[%c1_45, %c8_46, %c0_47] : memref<18x32x16xf32, #tpu.memory_space<vmem>>, vector<16x16x16xf32>
    %c1_48 = arith.constant 1 : index
    %c9_49 = arith.constant 9 : index
    %c0_50 = arith.constant 0 : index
    %47 = vector.load %arg8[%c1_48, %c9_49, %c0_50] : memref<18x32x16xf32, #tpu.memory_space<vmem>>, vector<16x16x16xf32>
    %48 = tpu.concatenate %45, %46, %47 in 2 : vector<16x16x16xf32>, vector<16x16x16xf32>, vector<16x16x16xf32> -> vector<16x16x48xf32>
    %49 = vector.shape_cast %48 : vector<16x16x48xf32> to vector<256x48xf32>
    %c1_51 = arith.constant 1 : index
    %c0_52 = arith.constant 0 : index
    %c0_53 = arith.constant 0 : index
    %50 = vector.load %arg5[%c1_51, %c0_52, %c0_53] : memref<3x48x8xf32, #tpu.memory_space<vmem>>, vector<1x48x8xf32>
    %51 = vector.shape_cast %50 : vector<1x48x8xf32> to vector<48x8xf32>
    %cst_54 = arith.constant dense<0.000000e+00> : vector<256x8xf32>
    %52 = tpu.matmul %49, %51, %cst_54 {dimension_numbers = #tpu.dot_dimension_numbers<[1], [0], [0], [1], [0, 0, 1, 1], [], []>} : vector<256x48xf32>, vector<48x8xf32>, vector<256x8xf32> -> vector<256x8xf32>
    %53 = arith.addf %44, %52 : vector<256x8xf32>
    %c2 = arith.constant 2 : index
    %c7_55 = arith.constant 7 : index
    %c0_56 = arith.constant 0 : index
    %54 = vector.load %arg8[%c2, %c7_55, %c0_56] : memref<18x32x16xf32, #tpu.memory_space<vmem>>, vector<16x16x16xf32>
    %c2_57 = arith.constant 2 : index
    %c8_58 = arith.constant 8 : index
    %c0_59 = arith.constant 0 : index
    %55 = vector.load %arg8[%c2_57, %c8_58, %c0_59] : memref<18x32x16xf32, #tpu.memory_space<vmem>>, vector<16x16x16xf32>
    %c2_60 = arith.constant 2 : index
    %c9_61 = arith.constant 9 : index
    %c0_62 = arith.constant 0 : index
    %56 = vector.load %arg8[%c2_60, %c9_61, %c0_62] : memref<18x32x16xf32, #tpu.memory_space<vmem>>, vector<16x16x16xf32>
    %57 = tpu.concatenate %54, %55, %56 in 2 : vector<16x16x16xf32>, vector<16x16x16xf32>, vector<16x16x16xf32> -> vector<16x16x48xf32>
    %58 = vector.shape_cast %57 : vector<16x16x48xf32> to vector<256x48xf32>
    %c2_63 = arith.constant 2 : index
    %c0_64 = arith.constant 0 : index
    %c0_65 = arith.constant 0 : index
    %59 = vector.load %arg5[%c2_63, %c0_64, %c0_65] : memref<3x48x8xf32, #tpu.memory_space<vmem>>, vector<1x48x8xf32>
    %60 = vector.shape_cast %59 : vector<1x48x8xf32> to vector<48x8xf32>
    %cst_66 = arith.constant dense<0.000000e+00> : vector<256x8xf32>
    %61 = tpu.matmul %58, %60, %cst_66 {dimension_numbers = #tpu.dot_dimension_numbers<[1], [0], [0], [1], [0, 0, 1, 1], [], []>} : vector<256x48xf32>, vector<48x8xf32>, vector<256x8xf32> -> vector<256x8xf32>
    %62 = arith.addf %53, %61 : vector<256x8xf32>
    %c0_67 = arith.constant 0 : index
    %c0_68 = arith.constant 0 : index
    %63 = vector.load %arg6[%c0_67, %c0_68] : memref<1x8xf32, #tpu.memory_space<vmem>>, vector<1x8xf32>
    %64 = vector.broadcast %63 : vector<1x8xf32> to vector<256x8xf32>
    %65 = arith.addf %62, %64 : vector<256x8xf32>
    %66 = arith.addf %21, %65 : vector<256x8xf32>
    %67 = vector.shape_cast %66 : vector<256x8xf32> to vector<16x16x8xf32>
    %c0_69 = arith.constant 0 : index
    %c0_70 = arith.constant 0 : index
    %c0_71 = arith.constant 0 : index
    %c0_72 = arith.constant 0 : index
    %68 = vector.load %arg7[%c0_69, %c0_70, %c0_71, %c0_72] : memref<1x16x16x8xf32, #tpu.memory_space<vmem>>, vector<1x16x16x8xf32>
    %69 = vector.shape_cast %68 : vector<1x16x16x8xf32> to vector<16x16x8xf32>
    %70 = vector.shape_cast %67 : vector<16x16x8xf32> to vector<1x16x16x8xf32>
    tpu.vector_store %arg7[%c0_69, %c0_70, %c0_71, %c0_72], %70 {strides = array<i32>} : memref<1x16x16x8xf32, #tpu.memory_space<vmem>>, vector<1x16x16x8xf32>,
    return
  }
  func.func @transform_0(%arg0: i32) -> (i32, i32, i32, i32) {
    %c0_i32 = arith.constant 0 : i32
    %c0_i32_0 = arith.constant 0 : i32
    %c0_i32_1 = arith.constant 0 : i32
    %c0_i32_2 = arith.constant 0 : i32
    return %arg0, %c0_i32, %c0_i32_0, %c0_i32_1 : i32, i32, i32, i32
  }
  func.func @transform_1(%arg0: i32) -> (i32, i32, i32, i32) {
    %c0_i32 = arith.constant 0 : i32
    %c0_i32_0 = arith.constant 0 : i32
    %c0_i32_1 = arith.constant 0 : i32
    %c0_i32_2 = arith.constant 0 : i32
    return %arg0, %c0_i32, %c0_i32_0, %c0_i32_1 : i32, i32, i32, i32
  }
  func.func @transform_2(%arg0: i32) -> (i32, i32) {
    %c0_i32 = arith.constant 0 : i32
    %c0_i32_0 = arith.constant 0 : i32
    %c0_i32_1 = arith.constant 0 : i32
    return %c0_i32, %c0_i32_0 : i32, i32
  }
  func.func @transform_3(%arg0: i32) -> (i32, i32) {
    %c0_i32 = arith.constant 0 : i32
    %c0_i32_0 = arith.constant 0 : i32
    %c0_i32_1 = arith.constant 0 : i32
    return %c0_i32, %c0_i32_0 : i32, i32
  }
  func.func @transform_4(%arg0: i32) -> (i32, i32, i32) {
    %c0_i32 = arith.constant 0 : i32
    %c0_i32_0 = arith.constant 0 : i32
    %c0_i32_1 = arith.constant 0 : i32
    %c0_i32_2 = arith.constant 0 : i32
    return %c0_i32, %c0_i32_0, %c0_i32_1 : i32, i32, i32
  }
  func.func @transform_5(%arg0: i32) -> (i32, i32) {
    %c0_i32 = arith.constant 0 : i32
    %c0_i32_0 = arith.constant 0 : i32
    %c0_i32_1 = arith.constant 0 : i32
    return %c0_i32, %c0_i32_0 : i32, i32
  }
  func.func @transform_6(%arg0: i32) -> (i32, i32, i32, i32) {
    %c0_i32 = arith.constant 0 : i32
    %c0_i32_0 = arith.constant 0 : i32
    %c0_i32_1 = arith.constant 0 : i32
    %c0_i32_2 = arith.constant 0 : i32
    return %arg0, %c0_i32, %c0_i32_0, %c0_i32_1 : i32, i32, i32, i32
  }
}

</mosaic_0001>

<bundles_post_ra>
// kernel: vunet_rnb.1
= control target key start
LH: loop header
LB: loop body
LE: loop exit
PB: predicated region body
PF: predicated region fallthrough
CT: control target
= control target key end

     0   :  { %s4271_s21 = smov 0   ;;  %s5738_s0 = inlined_call_operand.vmem [shape: f32[2,16,16,8], index: 0, kind: input, shape index: {}]   ;;  %s5739_s1 = inlined_call_operand.vmem [shape: f32[2,16,16,4], index: 1, kind: input, shape index: {}]   ;;  %s5740_s2 = inlined_call_operand.vmem [shape: f32[4,8], index: 2, kind: input, shape index: {}]   ;;  %s5741_s3 = inlined_call_operand.vmem [shape: f32[1,8], index: 3, kind: input, shape index: {}]   ;;  %s5742_s4 = inlined_call_operand.vmem [shape: f32[3,48,8], index: 4, kind: input, shape index: {}]   ;;  %s5743_s5 = inlined_call_operand.vmem [shape: f32[1,8], index: 5, kind: input, shape index: {}]   ;;  %s5744_s6 = inlined_call_operand.vmem [shape: f32[2,16,16,8], index: 6, kind: output, shape index: {}]  }
   0x1 LB: > { %s3631_s22 = sadd.s32 4294967295, %s4230_s21   ;;  %p3635_p0 = scmp.ge.s32.totalorder %s4230_s21, 1  ;;  %s4230_s21 = sphi %s4271_s21, %s16_s21  }
   0x2   : > { %p222_p1 = scmp.lt.s32.totalorder %s4230_s21, 3 }
   0x4   : > { %p223_p2 = pnand %p3635_p0, %p222_p1 }
   0x6   : > { %226 = sbr.rel (%p223_p2) target bundleno = 1041 (0x411), region = 44 }
   0xb   : > { %v444_v0 = vld [vmem:[%s5740_s2] sm:$0xf]  ;;  %vm549_vm0 = vcmask 1043456   ;;  %p257_p3 = scmp.lt.s32.totalorder %s3631_s22, 1  ;;  %vm272_vm1 = vcmask 130048   ;;  %v4232_v1 = vmov 0.0  }
   0xc   : > { %3937 = vmatprep.subr.msk.mxu0 %vm549_vm0, %v444_v0  ;;  %274 = vst.msk [vmem:[#allocation2 + $0x8] sm:$0xff] %vm272_vm1, %v4232_v1  ;;  %273 = vst.msk [vmem:[#allocation2] sm:$0xff] %vm272_vm1, %v4232_v1  ;;  %vm452_vm2 = vcmask 31744   ;;  %s4233_s29 = smov 16   ;;  %s4234_s30 = smov 32  }
   0xd   : > { %3938 = vmatpush3.msk.msra.mxu0 %vm549_vm0, %v444_v0  ;;  %s5754_s22 = smov (!%p257_p3, %s3631_s22), 1  ;;  %275 = vst.msk [vmem:[#allocation2 + $0x10] sm:$0xff] %vm272_vm1, %v4232_v1  ;;  %276 = vst.msk [vmem:[#allocation2 + $0x18] sm:$0xff] %vm272_vm1, %v4232_v1 }
   0xe   : > { %278 = vst.msk [vmem:[#allocation2 + $0x220] sm:$0xff] %vm272_vm1, %v4232_v1  ;;  %279 = vst.msk [vmem:[#allocation2 + $0x228] sm:$0xff] %vm272_vm1, %v4232_v1  ;;  %s4298_s25 = sshll.u32 %s5754_s22, 8  ;;  %s4235_s22 = smov 8  }
   0xf   : > { %280 = vst.msk [vmem:[#allocation2 + $0x230] sm:$0xff] %vm272_vm1, %v4232_v1  ;;  %281 = vst.msk [vmem:[#allocation2 + $0x238] sm:$0xff] %vm272_vm1, %v4232_v1  ;;  %s4304_s28 = scalar_lea.vmem %s5739_s1, %s4298_s25  ;;  %s4535_s26 = scalar_lea.vmem %s5738_s0, %s4298_s25 }
  0x10   : > { %v316_v2 = vld [vmem:[%s4304_s28] sm:$0xff]  ;;  %v317_v3 = vld [vmem:[%s4304_s28 + $0x8] sm:$0xff]  ;;  %v318_v4 = vld [vmem:[%s4304_s28 + $0x10] sm:$0xff]  ;;  %s5534_s12 = scalar_lea.vmem %s5744_s6, %s4298_s25 }
  0x11   : > { %vm348_vm3 = vcmp.ge.f32.partialorder %v316_v2, 0.0  ;;  %v380_v5 = vmul.f32 0.01, %v316_v2  ;;  %vm349_vm4 = vcmp.ge.f32.partialorder %v317_v3, 0.0  ;;  %v381_v6 = vmul.f32 0.01, %v317_v3 }
  0x12   : > { %vm350_vm5 = vcmp.ge.f32.partialorder %v318_v4, 0.0  ;;  %v382_v7 = vmul.f32 0.01, %v318_v4  ;;  %v319_v8 = vld [vmem:[%s4304_s28 + $0x18] sm:$0xff]  ;;  %v320_v9 = vld [vmem:[%s4304_s28 + $0x20] sm:$0xff]  ;;  %v321_v13 = vld [vmem:[%s4304_s28 + $0x28] sm:$0xff] }
  0x13   : > { %v412_v10 = vsel %vm348_vm3, %v316_v2, %v380_v5  ;;  %v413_v11 = vsel %vm349_vm4, %v317_v3, %v381_v6  ;;  %vm351_vm6 = vcmp.ge.f32.partialorder %v319_v8, 0.0  ;;  %v383_v12 = vmul.f32 0.01, %v319_v8  ;;  %v322_v16 = vld [vmem:[%s4304_s28 + $0x30] sm:$0xff]  ;;  %v323_v21 = vld [vmem:[%s4304_s28 + $0x38] sm:$0xff]  ;;  %v324_v22 = vld [vmem:[%s4304_s28 + $0x40] sm:$0xff] }
  0x14   : > { %3939 = vmatprep.mubr.msk.f32.mxu0 %vm452_vm2, %v412_v10  ;;  %v414_v14 = vsel %vm350_vm5, %v318_v4, %v382_v7  ;;  %vm352_vm7 = vcmp.ge.f32.partialorder %v320_v9, 0.0  ;;  %v384_v15 = vmul.f32 0.01, %v320_v9  ;;  %v385_v18 = vmul.f32 0.01, %v321_v13  ;;  %v325_v27 = vld [vmem:[%s4304_s28 + $0x48] sm:$0xff] }
  0x15   : > { %3940 = vmatmul.mubr.msk.f32.vlgmr.msra.gmra.mxu0 %vm452_vm2, %v413_v11  ;;  %v415_v17 = vsel %vm351_vm6, %v319_v8, %v383_v12  ;;  %vm353_vm8 = vcmp.ge.f32.partialorder %v321_v13, 0.0  ;;  %v386_v20 = vmul.f32 0.01, %v322_v16  ;;  %vm354_vm9 = vcmp.ge.f32.partialorder %v322_v16, 0.0  ;;  %v326_v28 = vld [vmem:[%s4304_s28 + $0x50] sm:$0xff]  ;;  %v327_v33 = vld [vmem:[%s4304_s28 + $0x58] sm:$0xff] }
  0x16   : > { %3942 = vmatprep.mubr.msk.f32.mxu0 %vm452_vm2, %v414_v14  ;;  %v416_v19 = vsel %vm352_vm7, %v320_v9, %v384_v15  ;;  %v417_v23 = vsel %vm353_vm8, %v321_v13, %v385_v18  ;;  %v387_v24 = vmul.f32 0.01, %v323_v21  ;;  %vm355_vm10 = vcmp.ge.f32.partialorder %v323_v21, 0.0  ;;  %v328_v34 = vld [vmem:[%s4304_s28 + $0x60] sm:$0xff]  ;;  %v1227_v35 = vld [vmem:[#allocation2 + $0x8] sm:$0xff]  ;;  %v1228_v39 = vld [vmem:[#allocation2 + $0x10] sm:$0xff] }
  0x17   : > { %v418_v25 = vsel %vm354_vm9, %v322_v16, %v386_v20  ;;  %v388_v26 = vmul.f32 0.01, %v324_v22  ;;  %vm356_vm11 = vcmp.ge.f32.partialorder %v324_v22, 0.0  ;;  %v389_v30 = vmul.f32 0.01, %v325_v27  ;;  %v1259_v36 = vld [vmem:[#allocation2 + $0x9] sm:$0xff]  ;;  %1323 = vrot.lane.b32.xlu0 %v1227_v35, %s4233_s29 }
  0x18   : > { %v419_v29 = vsel %vm355_vm10, %v323_v21, %v387_v24  ;;  %vm357_vm12 = vcmp.ge.f32.partialorder %v325_v27, 0.0  ;;  %v390_v32 = vmul.f32 0.01, %v326_v28  ;;  %vm358_vm13 = vcmp.ge.f32.partialorder %v326_v28, 0.0  ;;  %1451 = vrot.lane.b32.xlu1 %v1259_v36, %s4234_s30  ;;  %v329_v42 = vld [vmem:[%s4304_s28 + $0x68] sm:$0xff]  ;;  %v330_v43 = vld [vmem:[%s4304_s28 + $0x70] sm:$0xff] }
  0x19   : > { %3943 = vmatmul.mubr.msk.f32.gmra.mxu0 %vm452_vm2, %v415_v17  ;;  %v420_v31 = vsel %vm356_vm11, %v324_v22, %v388_v26  ;;  %v421_v37 = vsel %vm357_vm12, %v325_v27, %v389_v30  ;;  %v391_v38 = vmul.f32 0.01, %v327_v33  ;;  %vm359_vm14 = vcmp.ge.f32.partialorder %v327_v33, 0.0  ;;  %v1260_v46 = vld [vmem:[#allocation2 + $0x11] sm:$0xff]  ;;  %v332_v50 = vld [vmem:[%s4304_s28 + $0x80] sm:$0xff]  ;;  %v333_v55 = vld [vmem:[%s4304_s28 + $0x88] sm:$0xff] }
  0x1a   : > { %3945 = vmatprep.mubr.msk.f32.mxu0 %vm452_vm2, %v416_v19  ;;  %v422_v40 = vsel %vm358_vm13, %v326_v28, %v390_v32  ;;  %v392_v41 = vmul.f32 0.01, %v328_v34  ;;  %vm360_vm15 = vcmp.ge.f32.partialorder %v328_v34, 0.0  ;;  %v393_v45 = vmul.f32 0.01, %v329_v42  ;;  %v331_v49 = vld [vmem:[%s4304_s28 + $0x78] sm:$0xff] }
  0x1b   : > { %1325 = vrot.lane.b32.xlu0 %v1228_v39, %s4233_s29  ;;  %v423_v44 = vsel %vm359_vm14, %v327_v33, %v391_v38  ;;  %vm361_vm0 = vcmp.ge.f32.partialorder %v329_v42, 0.0  ;;  %v394_v48 = vmul.f32 0.01, %v330_v43  ;;  %vm362_vm3 = vcmp.ge.f32.partialorder %v330_v43, 0.0  ;;  %v334_v56 = vld [vmem:[%s4304_s28 + $0x90] sm:$0xff]  ;;  %v335_v61 = vld [vmem:[%s4304_s28 + $0x98] sm:$0xff] }
  0x1c   : > { %v424_v47 = vsel %vm360_vm15, %v328_v34, %v392_v41  ;;  %v425_v51 = vsel %vm361_vm0, %v329_v42, %v393_v45  ;;  %v395_v52 = vmul.f32 0.01, %v331_v49  ;;  %vm363_vm4 = vcmp.ge.f32.partialorder %v331_v49, 0.0  ;;  %v336_v62 = vld [vmem:[%s4304_s28 + $0xa0] sm:$0xff]  ;;  %v337_v4 = vld [vmem:[%s4304_s28 + $0xa8] sm:$0xff]  ;;  %v338_v5 = vld [vmem:[%s4304_s28 + $0xb0] sm:$0xff] }
  0x1d   : > { %3946 = vmatmul.mubr.msk.f32.gmra.mxu0 %vm452_vm2, %v417_v23  ;;  %v426_v53 = vsel %vm362_vm3, %v330_v43, %v394_v48  ;;  %v396_v54 = vmul.f32 0.01, %v332_v50  ;;  %vm364_vm5 = vcmp.ge.f32.partialorder %v332_v50, 0.0  ;;  %v397_v58 = vmul.f32 0.01, %v333_v55  ;;  %v339_v10 = vld [vmem:[%s4304_s28 + $0xb8] sm:$0xff] }
  0x1e   : > { %3948 = vmatprep.mubr.msk.f32.mxu0 %vm452_vm2, %v418_v25  ;;  %v427_v57 = vsel %vm363_vm4, %v331_v49, %v395_v52  ;;  %vm365_vm6 = vcmp.ge.f32.partialorder %v333_v55, 0.0  ;;  %v398_v60 = vmul.f32 0.01, %v334_v56  ;;  %vm366_vm7 = vcmp.ge.f32.partialorder %v334_v56, 0.0  ;;  %v340_v11 = vld [vmem:[%s4304_s28 + $0xc0] sm:$0xff]  ;;  %v341_v16 = vld [vmem:[%s4304_s28 + $0xc8] sm:$0xff] }
  0x1f   : > { %1453 = vrot.lane.b32.xlu0 %v1260_v46, %s4234_s30  ;;  %v428_v59 = vsel %vm364_vm5, %v332_v50, %v396_v54  ;;  %v429_v63 = vsel %vm365_vm6, %v333_v55, %v397_v58  ;;  %v399_v0 = vmul.f32 0.01, %v335_v61  ;;  %vm367_vm8 = vcmp.ge.f32.partialorder %v335_v61, 0.0  ;;  %v342_v17 = vld [vmem:[%s4304_s28 + $0xd0] sm:$0xff]  ;;  %v343_v22 = vld [vmem:[%s4304_s28 + $0xd8] sm:$0xff]  ;;  %v344_v23 = vld [vmem:[%s4304_s28 + $0xe0] sm:$0xff] }
  0x20   : > { %v430_v2 = vsel %vm366_vm7, %v334_v56, %v398_v60  ;;  %v400_v3 = vmul.f32 0.01, %v336_v62  ;;  %vm368_vm9 = vcmp.ge.f32.partialorder %v336_v62, 0.0  ;;  %v401_v7 = vmul.f32 0.01, %v337_v4  ;;  %v345_v28 = vld [vmem:[%s4304_s28 + $0xe8] sm:$0xff] }
  0x21   : > { %3949 = vmatmul.mubr.msk.f32.gmra.mxu0 %vm452_vm2, %v419_v29  ;;  %v431_v6 = vsel %vm367_vm8, %v335_v61, %v399_v0  ;;  %vm369_vm10 = vcmp.ge.f32.partialorder %v337_v4, 0.0  ;;  %v402_v9 = vmul.f32 0.01, %v338_v5  ;;  %vm370_vm11 = vcmp.ge.f32.partialorder %v338_v5, 0.0  ;;  %v346_v29 = vld [vmem:[%s4304_s28 + $0xf0] sm:$0xff]  ;;  %v347_v34 = vld [vmem:[%s4304_s28 + $0xf8] sm:$0xff] }
  0x22   : > { %3951 = vmatprep.mubr.msk.f32.mxu0 %vm452_vm2, %v420_v31  ;;  %v432_v8 = vsel %vm368_vm9, %v336_v62, %v400_v3  ;;  %v433_v12 = vsel %vm369_vm10, %v337_v4, %v401_v7  ;;  %v403_v13 = vmul.f32 0.01, %v339_v10  ;;  %vm371_vm12 = vcmp.ge.f32.partialorder %v339_v10, 0.0  ;;  %v1617_v39 = vld [vmem:[%s5742_s4 + $0x28] sm:$0xff]  ;;  %v1615_v41 = vld [vmem:[%s5742_s4 + $0x18] sm:$0xff]  ;;  %v1614_v42 = vld [vmem:[%s5742_s4 + $0x10] sm:$0xff] }
  0x23   : > { %v434_v14 = vsel %vm370_vm11, %v338_v5, %v402_v9  ;;  %v404_v15 = vmul.f32 0.01, %v340_v11  ;;  %vm372_vm13 = vcmp.ge.f32.partialorder %v340_v11, 0.0  ;;  %v405_v19 = vmul.f32 0.01, %v341_v16  ;;  %4047 = vmatprep.subr.mxu0 %v1617_v39  ;;  %v1613_v43 = vld [vmem:[%s5742_s4 + $0x8] sm:$0xff] }
  0x24   : > { %v435_v18 = vsel %vm371_vm12, %v339_v10, %v403_v13  ;;  %vm373_vm14 = vcmp.ge.f32.partialorder %v341_v16, 0.0  ;;  %v406_v21 = vmul.f32 0.01, %v342_v17  ;;  %vm374_vm15 = vcmp.ge.f32.partialorder %v342_v17, 0.0  ;;  %4048 = vmatpush3.msra.mxu0 %v1617_v39  ;;  %v1195_v45 = vld [vmem:[#allocation2 + $0x7] sm:$0xff]  ;;  %v1196_v50 = vld [vmem:[#allocation2 + $0xf] sm:$0xff] }
  0x25   : > { %3952 = vmatmul.mubr.msk.f32.gmra.mxu0 %vm452_vm2, %v421_v37  ;;  %v436_v20 = vsel %vm372_vm13, %v340_v11, %v404_v15  ;;  %v437_v24 = vsel %vm373_vm14, %v341_v16, %v405_v19  ;;  %v407_v25 = vmul.f32 0.01, %v343_v22  ;;  %vm375_vm0 = vcmp.ge.f32.partialorder %v343_v22, 0.0  ;;  %v4465_v55 = vld [vmem:[%s5741_s3] ss:$0 sm:$0xff] }
  0x26   : > { %3954 = vmatprep.mubr.msk.f32.mxu0 %vm452_vm2, %v422_v40  ;;  %v438_v26 = vsel %vm374_vm15, %v342_v17, %v406_v21  ;;  %v408_v27 = vmul.f32 0.01, %v344_v23  ;;  %vm376_vm3 = vcmp.ge.f32.partialorder %v344_v23, 0.0  ;;  %v409_v31 = vmul.f32 0.01, %v345_v28  ;;  %v1616_v40 = vld [vmem:[%s5742_s4 + $0x20] sm:$0xff] }
  0x27   : > { %v439_v30 = vsel %vm375_vm0, %v343_v22, %v407_v25  ;;  %vm377_vm4 = vcmp.ge.f32.partialorder %v345_v28, 0.0  ;;  %v410_v33 = vmul.f32 0.01, %v346_v29  ;;  %vm378_vm5 = vcmp.ge.f32.partialorder %v346_v29, 0.0  ;;  %4049 = vmatprep.subr.mxu0 %v1616_v40 }
  0x28   : > { %v440_v32 = vsel %vm376_vm3, %v344_v23, %v408_v27  ;;  %v441_v35 = vsel %vm377_vm4, %v345_v28, %v409_v31  ;;  %v411_v36 = vmul.f32 0.01, %v347_v34  ;;  %vm379_vm6 = vcmp.ge.f32.partialorder %v347_v34, 0.0  ;;  %4050 = vmatpush3.msra.mxu0 %v1616_v40 }
  0x29   : > { %3955 = vmatmul.mubr.msk.f32.gmra.mxu0 %vm452_vm2, %v423_v44  ;;  %v442_v37 = vsel %vm378_vm5, %v346_v29, %v410_v33  ;;  %4051 = vmatprep.subr.mxu0 %v1615_v41  ;;  %v1612_v44 = vld [vmem:[%s5742_s4] sm:$0xff]  ;;  %vm2041_vm7 = vcmask 392192   ;;  %vm283_vm8 = vcmask 122880  }
  0x2a   : > { %3957 = vmatprep.mubr.msk.f32.mxu0 %vm452_vm2, %v424_v47  ;;  %v443_v38 = vsel %vm379_vm6, %v347_v34, %v411_v36  ;;  %4052 = vmatpush3.msra.mxu0 %v1615_v41  ;;  %300 = vst.msk [vmem:[#allocation2 + $0x38] sm:$0x1] %vm283_vm8, %v4232_v1  ;;  %284 = vst.msk [vmem:[#allocation2 + $0x27] sm:$0x1] %vm283_vm8, %v4232_v1 }
  0x2b   : > { %4053 = vmatprep.subr.mxu0 %v1614_v42  ;;  %285 = vst.msk [vmem:[#allocation2 + $0x47] sm:$0x1] %vm283_vm8, %v4232_v1  ;;  %286 = vst.msk [vmem:[#allocation2 + $0x67] sm:$0x1] %vm283_vm8, %v4232_v1 }
  0x2c   : > { %4054 = vmatpush3.msra.mxu0 %v1614_v42  ;;  %287 = vst.msk [vmem:[#allocation2 + $0x87] sm:$0x1] %vm283_vm8, %v4232_v1  ;;  %288 = vst.msk [vmem:[#allocation2 + $0xa7] sm:$0x1] %vm283_vm8, %v4232_v1 }
  0x2d   : > { %3958 = vmatmul.mubr.msk.f32.gmra.mxu0 %vm452_vm2, %v425_v51  ;;  %4055 = vmatprep.subr.mxu0 %v1613_v43  ;;  %289 = vst.msk [vmem:[#allocation2 + $0xc7] sm:$0x1] %vm283_vm8, %v4232_v1  ;;  %290 = vst.msk [vmem:[#allocation2 + $0xe7] sm:$0x1] %vm283_vm8, %v4232_v1 }
  0x2e   : > { %3960 = vmatprep.mubr.msk.f32.mxu0 %vm452_vm2, %v426_v53  ;;  %4056 = vmatpush3.msra.mxu0 %v1613_v43  ;;  %291 = vst.msk [vmem:[#allocation2 + $0x107] sm:$0x1] %vm283_vm8, %v4232_v1  ;;  %292 = vst.msk [vmem:[#allocation2 + $0x127] sm:$0x1] %vm283_vm8, %v4232_v1 }
  0x2f   : > { %4057 = vmatprep.subr.mxu0 %v1612_v44  ;;  %293 = vst.msk [vmem:[#allocation2 + $0x147] sm:$0x1] %vm283_vm8, %v4232_v1  ;;  %294 = vst.msk [vmem:[#allocation2 + $0x167] sm:$0x1] %vm283_vm8, %v4232_v1 }
  0x30   : > { %4058 = vmatpush3.msra.mxu0 %v1612_v44  ;;  %295 = vst.msk [vmem:[#allocation2 + $0x187] sm:$0x1] %vm283_vm8, %v4232_v1  ;;  %296 = vst.msk [vmem:[#allocation2 + $0x1a7] sm:$0x1] %vm283_vm8, %v4232_v1 }
  0x31   : > { %3961 = vmatmul.mubr.msk.f32.gmra.mxu0 %vm452_vm2, %v427_v57  ;;  %297 = vst.msk [vmem:[#allocation2 + $0x1c7] sm:$0x1] %vm283_vm8, %v4232_v1  ;;  %298 = vst.msk [vmem:[#allocation2 + $0x1e7] sm:$0x1] %vm283_vm8, %v4232_v1 }
  0x32   : > { %3963 = vmatprep.mubr.msk.f32.mxu0 %vm452_vm2, %v428_v59  ;;  %299 = vst.msk [vmem:[#allocation2 + $0x207] sm:$0x1] %vm283_vm8, %v4232_v1  ;;  %301 = vst.msk [vmem:[#allocation2 + $0x58] sm:$0x1] %vm283_vm8, %v4232_v1 }
  0x33   : > { %302 = vst.msk [vmem:[#allocation2 + $0x78] sm:$0x1] %vm283_vm8, %v4232_v1  ;;  %303 = vst.msk [vmem:[#allocation2 + $0x98] sm:$0x1] %vm283_vm8, %v4232_v1 }
  0x34   : > { %304 = vst.msk [vmem:[#allocation2 + $0xb8] sm:$0x1] %vm283_vm8, %v4232_v1  ;;  %305 = vst.msk [vmem:[#allocation2 + $0xd8] sm:$0x1] %vm283_vm8, %v4232_v1 }
  0x35   : > { %3964 = vmatmul.mubr.msk.f32.gmra.mxu0 %vm452_vm2, %v429_v63  ;;  %306 = vst.msk [vmem:[#allocation2 + $0xf8] sm:$0x1] %vm283_vm8, %v4232_v1  ;;  %307 = vst.msk [vmem:[#allocation2 + $0x118] sm:$0x1] %vm283_vm8, %v4232_v1 }
  0x36   : > { %3966 = vmatprep.mubr.msk.f32.mxu0 %vm452_vm2, %v430_v2  ;;  %308 = vst.msk [vmem:[#allocation2 + $0x138] sm:$0x1] %vm283_vm8, %v4232_v1  ;;  %309 = vst.msk [vmem:[#allocation2 + $0x158] sm:$0x1] %vm283_vm8, %v4232_v1 }
  0x37   : > { %310 = vst.msk [vmem:[#allocation2 + $0x178] sm:$0x1] %vm283_vm8, %v4232_v1  ;;  %311 = vst.msk [vmem:[#allocation2 + $0x198] sm:$0x1] %vm283_vm8, %v4232_v1 }
  0x38   : > { %312 = vst.msk [vmem:[#allocation2 + $0x1b8] sm:$0x1] %vm283_vm8, %v4232_v1  ;;  %313 = vst.msk [vmem:[#allocation2 + $0x1d8] sm:$0x1] %vm283_vm8, %v4232_v1 }
  0x39   : > { %3967 = vmatmul.mubr.msk.f32.gmra.mxu0 %vm452_vm2, %v431_v6  ;;  %314 = vst.msk [vmem:[#allocation2 + $0x1f8] sm:$0x1] %vm283_vm8, %v4232_v1  ;;  %315 = vst.msk [vmem:[#allocation2 + $0x218] sm:$0x1] %vm283_vm8, %v4232_v1 }
  0x3a   : > { %3969 = vmatprep.mubr.msk.f32.mxu0 %vm452_vm2, %v432_v8 }
  0x3d   : > { %3970 = vmatmul.mubr.msk.f32.gmra.mxu0 %vm452_vm2, %v433_v12 }
  0x3e   : > { %3972 = vmatprep.mubr.msk.f32.mxu0 %vm452_vm2, %v434_v14 }
  0x41   : > { %3973 = vmatmul.mubr.msk.f32.gmra.mxu0 %vm452_vm2, %v435_v18 }
  0x42   : > { %3975 = vmatprep.mubr.msk.f32.mxu0 %vm452_vm2, %v436_v20 }
  0x45   : > { %3976 = vmatmul.mubr.msk.f32.gmra.mxu0 %vm452_vm2, %v437_v24 }
  0x46   : > { %3978 = vmatprep.mubr.msk.f32.mxu0 %vm452_vm2, %v438_v26 }
  0x49   : > { %3979 = vmatmul.mubr.msk.f32.gmra.mxu0 %vm452_vm2, %v439_v30 }
  0x4a   : > { %3981 = vmatprep.mubr.msk.f32.mxu0 %vm452_vm2, %v440_v32 }
  0x4d   : > { %3982 = vmatmul.mubr.msk.f32.gmra.mxu0 %vm452_vm2, %v441_v35 }
  0x4e   : > { %3984 = vmatprep.mubr.msk.f32.mxu0 %vm452_vm2, %v442_v37 }
  0x51   : > { %3985 = vmatmul.mubr.msk.f32.gmra.mxu0 %vm452_vm2, %v443_v38  ;;  %vm1579_vm2 = vcmask 261120  }
  0x89   : > { %v1324_v46 = vpop.permute.xlu0 %1323 }
  0x8a   : > { %v1547_v47 = vsel %vm272_vm1, %v1195_v45, %v1324_v46  ;;  %v1452_v48 = vpop.permute.xlu1 %1451 }
  0x8b   : > { %v1580_v49 = vsel %vm1579_vm2, %v1547_v47, %v1452_v48 }
  0x8c   : > { %4059 = vmatprep.mubr.msk.f32.mxu0 %vm2041_vm7, %v1580_v49 }
  0x8d   : > { %v1326_v51 = vpop.permute.xlu0 %1325 }
  0x8e   : > { %v1548_v52 = vsel %vm272_vm1, %v1196_v50, %v1326_v51 }
  0x91   : > { %v1454_v53 = vpop.permute.xlu0 %1453 }
  0x92   : > { %v1581_v54 = vsel %vm1579_vm2, %v1548_v52, %v1454_v53 }
  0x93   : > { %4060 = vmatmul.mubr.msk.f32.vlgmr.msra.gmra.mxu0 %vm2041_vm7, %v1581_v54 }
  0xd5   : > { %v3941_v56 = vpop.f32.mrf.mxu0 }
  0xd6   : > { %v625_v57 = vadd.f32 %v3941_v56, %v4465_v55 }
  0xd7   : > { %v619_v58 = vpop.f32.mrf.mxu0 }
  0xd8   : > { %v939_v59 = vmul.f32 0.01, %v625_v57  ;;  %v620_v60 = vadd.f32 %v4465_v55, %v619_v58  ;;  %vm907_vm9 = vcmp.ge.f32.partialorder %v625_v57, 0.0 }
  0xd9   : > { %v3944_v61 = vpop.f32.mrf.mxu0 }
  0xda   : > { %v938_v62 = vmul.f32 0.01, %v620_v60  ;;  %v971_v63 = vsel %vm907_vm9, %v625_v57, %v939_v59  ;;  %v635_v0 = vadd.f32 %v3944_v61, %v4465_v55  ;;  %vm906_vm10 = vcmp.ge.f32.partialorder %v620_v60, 0.0 }
  0xdb   : > { %1036 = vrot.lane.b32.xlu0 %v971_v63, %s4235_s22  ;;  %v629_v1 = vpop.f32.mrf.mxu0 }
  0xdc   : > { %v941_v2 = vmul.f32 0.01, %v635_v0  ;;  %v630_v3 = vadd.f32 %v4465_v55, %v629_v1  ;;  %vm909_vm11 = vcmp.ge.f32.partialorder %v635_v0, 0.0  ;;  %v970_v4 = vsel %vm906_vm10, %v620_v60, %v938_v62 }
  0xdd   : > { %v3947_v5 = vpop.f32.mrf.mxu0 }
  0xde   : > { %v940_v6 = vmul.f32 0.01, %v630_v3  ;;  %v973_v7 = vsel %vm909_vm11, %v635_v0, %v941_v2  ;;  %vm908_vm12 = vcmp.ge.f32.partialorder %v630_v3, 0.0  ;;  %v645_v8 = vadd.f32 %v3947_v5, %v4465_v55 }
  0xdf   : > { %1034 = vrot.lane.b32.xlu0 %v970_v4, %s4235_s22  ;;  %1040 = vrot.lane.b32.xlu1 %v973_v7, %s4235_s22  ;;  %v639_v9 = vpop.f32.mrf.mxu0 }
  0xe0   : > { %v972_v10 = vsel %vm908_vm12, %v630_v3, %v940_v6  ;;  %v943_v11 = vmul.f32 0.01, %v645_v8  ;;  %v640_v12 = vadd.f32 %v4465_v55, %v639_v9  ;;  %vm911_vm13 = vcmp.ge.f32.partialorder %v645_v8, 0.0 }
  0xe1   : > { %v3950_v13 = vpop.f32.mrf.mxu0 }
  0xe2   : > { %v942_v14 = vmul.f32 0.01, %v640_v12  ;;  %vm910_vm14 = vcmp.ge.f32.partialorder %v640_v12, 0.0  ;;  %v655_v15 = vadd.f32 %v3950_v13, %v4465_v55  ;;  %v975_v17 = vsel %vm911_vm13, %v645_v8, %v943_v11 }
  0xe3   : > { %1038 = vrot.lane.b32.xlu1 %v972_v10, %s4235_s22  ;;  %v649_v16 = vpop.f32.mrf.mxu0 }
  0xe4   : > { %v974_v18 = vsel %vm910_vm14, %v640_v12, %v942_v14  ;;  %v945_v19 = vmul.f32 0.01, %v655_v15  ;;  %v650_v20 = vadd.f32 %v4465_v55, %v649_v16  ;;  %vm913_vm15 = vcmp.ge.f32.partialorder %v655_v15, 0.0 }
  0xe5   : > { %1042 = vrot.lane.b32.xlu0 %v974_v18, %s4235_s22  ;;  %v3953_v21 = vpop.f32.mrf.mxu0 }
  0xe6   : > { %v944_v22 = vmul.f32 0.01, %v650_v20  ;;  %vm912_vm0 = vcmp.ge.f32.partialorder %v650_v20, 0.0  ;;  %v665_v23 = vadd.f32 %v3953_v21, %v4465_v55  ;;  %v977_v25 = vsel %vm913_vm15, %v655_v15, %v945_v19 }
  0xe7   : > { %1044 = vrot.lane.b32.xlu1 %v975_v17, %s4235_s22  ;;  %v659_v24 = vpop.f32.mrf.mxu0 }
  0xe8   : > { %v976_v26 = vsel %vm912_vm0, %v650_v20, %v944_v22  ;;  %v947_v27 = vmul.f32 0.01, %v665_v23  ;;  %v660_v28 = vadd.f32 %v4465_v55, %v659_v24  ;;  %vm915_vm3 = vcmp.ge.f32.partialorder %v665_v23, 0.0 }
  0xe9   : > { %1046 = vrot.lane.b32.xlu0 %v976_v26, %s4235_s22  ;;  %v3956_v29 = vpop.f32.mrf.mxu0 }
  0xea   : > { %v946_v30 = vmul.f32 0.01, %v660_v28  ;;  %v675_v31 = vadd.f32 %v3956_v29, %v4465_v55  ;;  %vm914_vm4 = vcmp.ge.f32.partialorder %v660_v28, 0.0  ;;  %v979_v35 = vsel %vm915_vm3, %v665_v23, %v947_v27 }
  0xeb   : > { %1048 = vrot.lane.b32.xlu1 %v977_v25, %s4235_s22  ;;  %v669_v32 = vpop.f32.mrf.mxu0 }
  0xec   : > { %v949_v33 = vmul.f32 0.01, %v675_v31  ;;  %v670_v34 = vadd.f32 %v4465_v55, %v669_v32  ;;  %v978_v36 = vsel %vm914_vm4, %v660_v28, %v946_v30  ;;  %vm917_vm5 = vcmp.ge.f32.partialorder %v675_v31, 0.0 }
  0xed   : > { %1050 = vrot.lane.b32.xlu0 %v978_v36, %s4235_s22  ;;  %v3959_v37 = vpop.f32.mrf.mxu0 }
  0xee   : > { %v948_v38 = vmul.f32 0.01, %v670_v34  ;;  %v685_v39 = vadd.f32 %v3959_v37, %v4465_v55  ;;  %vm916_vm6 = vcmp.ge.f32.partialorder %v670_v34, 0.0  ;;  %v981_v44 = vsel %vm917_vm5, %v675_v31, %v949_v33 }
  0xef   : > { %1052 = vrot.lane.b32.xlu1 %v979_v35, %s4235_s22  ;;  %v679_v40 = vpop.f32.mrf.mxu0 }
  0xf0   : > { %v951_v41 = vmul.f32 0.01, %v685_v39  ;;  %v680_v42 = vadd.f32 %v4465_v55, %v679_v40  ;;  %v980_v43 = vsel %vm916_vm6, %v670_v34, %v948_v38  ;;  %vm919_vm8 = vcmp.ge.f32.partialorder %v685_v39, 0.0 }
  0xf1   : > { %v3962_v45 = vpop.f32.mrf.mxu0  ;;  %1054 = vrot.lane.b32.xlu0 %v980_v43, %s4235_s22 }
  0xf2   : > { %v950_v46 = vmul.f32 0.01, %v680_v42  ;;  %v695_v47 = vadd.f32 %v3962_v45, %v4465_v55  ;;  %vm918_vm9 = vcmp.ge.f32.partialorder %v680_v42, 0.0  ;;  %v983_v52 = vsel %vm919_vm8, %v685_v39, %v951_v41 }
  0xf3   : > { %v689_v48 = vpop.f32.mrf.mxu0  ;;  %1056 = vrot.lane.b32.xlu1 %v981_v44, %s4235_s22 }
  0xf4   : > { %v953_v49 = vmul.f32 0.01, %v695_v47  ;;  %v690_v50 = vadd.f32 %v4465_v55, %v689_v48  ;;  %v982_v51 = vsel %vm918_vm9, %v680_v42, %v950_v46  ;;  %vm921_vm10 = vcmp.ge.f32.partialorder %v695_v47, 0.0 }
  0xf5   : > { %v3965_v53 = vpop.f32.mrf.mxu0  ;;  %1058 = vrot.lane.b32.xlu0 %v982_v51, %s4235_s22 }
  0xf6   : > { %v952_v54 = vmul.f32 0.01, %v690_v50  ;;  %v705_v56 = vadd.f32 %v3965_v53, %v4465_v55  ;;  %vm920_vm11 = vcmp.ge.f32.partialorder %v690_v50, 0.0  ;;  %v985_v61 = vsel %vm921_vm10, %v695_v47, %v953_v49 }
  0xf7   : > { %v699_v57 = vpop.f32.mrf.mxu0  ;;  %1060 = vrot.lane.b32.xlu1 %v983_v52, %s4235_s22 }
  0xf8   : > { %v955_v58 = vmul.f32 0.01, %v705_v56  ;;  %v700_v59 = vadd.f32 %v4465_v55, %v699_v57  ;;  %v984_v60 = vsel %vm920_vm11, %v690_v50, %v952_v54  ;;  %vm923_vm12 = vcmp.ge.f32.partialorder %v705_v56, 0.0 }
  0xf9   : > { %v3968_v62 = vpop.f32.mrf.mxu0  ;;  %1062 = vrot.lane.b32.xlu0 %v984_v60, %s4235_s22  ;;  %v778_v60 = vld [vmem:[%s4535_s26] sm:$0xff] }
  0xfa   : > { %v954_v63 = vmul.f32 0.01, %v700_v59  ;;  %v715_v0 = vadd.f32 %v3968_v62, %v4465_v55  ;;  %vm922_vm13 = vcmp.ge.f32.partialorder %v700_v59, 0.0  ;;  %v987_v5 = vsel %vm923_vm12, %v705_v56, %v955_v58  ;;  %v3680_v62 = vld [vmem:[%s5742_s4 + $0x50] sm:$0xff] }
  0xfb   : > { %v709_v1 = vpop.f32.mrf.mxu0  ;;  %1064 = vrot.lane.b32.xlu1 %v985_v61, %s4235_s22  ;;  %v781_v61 = vld [vmem:[%s4535_s26 + $0x18] sm:$0xff] }
  0xfc   : > { %v957_v2 = vmul.f32 0.01, %v715_v0  ;;  %v710_v3 = vadd.f32 %v4465_v55, %v709_v1  ;;  %v986_v4 = vsel %vm922_vm13, %v700_v59, %v954_v63  ;;  %vm925_vm14 = vcmp.ge.f32.partialorder %v715_v0, 0.0  ;;  %v3681_v59 = vld [vmem:[%s5742_s4 + $0x58] sm:$0xff] }
  0xfd   : > { %v3971_v6 = vpop.f32.mrf.mxu0  ;;  %1066 = vrot.lane.b32.xlu0 %v986_v4, %s4235_s22  ;;  %3987 = vmatprep.subr.mxu1 %v3681_v59  ;;  %v845_v1 = vmul.f32 0.01, %v781_v61 }
  0xfe   : > { %v956_v7 = vmul.f32 0.01, %v710_v3  ;;  %v725_v8 = vadd.f32 %v3971_v6, %v4465_v55  ;;  %vm924_vm15 = vcmp.ge.f32.partialorder %v710_v3, 0.0  ;;  %v989_v13 = vsel %vm925_vm14, %v715_v0, %v957_v2  ;;  %3988 = vmatpush3.msra.mxu1 %v3681_v59  ;;  %v3679_v2 = vld [vmem:[%s5742_s4 + $0x48] sm:$0xff]  ;;  %v782_v6 = vld [vmem:[%s4535_s26 + $0x20] sm:$0xff] }
  0xff   : > { %v719_v9 = vpop.f32.mrf.mxu0  ;;  %1068 = vrot.lane.b32.xlu1 %v987_v5, %s4235_s22  ;;  %v842_v0 = vmul.f32 0.01, %v778_v60  ;;  %3989 = vmatprep.subr.mxu1 %v3680_v62 }
 0x100   : > { %v959_v10 = vmul.f32 0.01, %v725_v8  ;;  %v720_v11 = vadd.f32 %v4465_v55, %v719_v9  ;;  %v988_v12 = vsel %vm924_vm15, %v710_v3, %v956_v7  ;;  %vm927_vm0 = vcmp.ge.f32.partialorder %v725_v8, 0.0  ;;  %v780_v3 = vld [vmem:[%s4535_s26 + $0x10] sm:$0xff]  ;;  %3990 = vmatpush3.msra.mxu1 %v3680_v62  ;;  %v3678_v7 = vld [vmem:[%s5742_s4 + $0x40] sm:$0xff] }
 0x101   : > { %v3974_v14 = vpop.f32.mrf.mxu0  ;;  %1070 = vrot.lane.b32.xlu0 %v988_v12, %s4235_s22  ;;  %3991 = vmatprep.subr.mxu1 %v3679_v2  ;;  %v783_v12 = vld [vmem:[%s4535_s26 + $0x28] sm:$0xff] }
 0x102   : > { %v958_v15 = vmul.f32 0.01, %v720_v11  ;;  %v735_v16 = vadd.f32 %v3974_v14, %v4465_v55  ;;  %vm926_vm3 = vcmp.ge.f32.partialorder %v720_v11, 0.0  ;;  %v991_v21 = vsel %vm927_vm0, %v725_v8, %v959_v10  ;;  %3992 = vmatpush3.msra.mxu1 %v3679_v2  ;;  %v793_v2 = vld [vmem:[%s4535_s26 + $0x78] sm:$0xff] }
 0x103   : > { %v729_v17 = vpop.f32.mrf.mxu0  ;;  %1072 = vrot.lane.b32.xlu1 %v989_v13, %s4235_s22  ;;  %vm1130_vm0 = vcmask 64512   ;;  %v844_v10 = vmul.f32 0.01, %v780_v3  ;;  %3993 = vmatprep.subr.mxu1 %v3678_v7 }
 0x104   : > { %v961_v18 = vmul.f32 0.01, %v735_v16  ;;  %v730_v19 = vadd.f32 %v4465_v55, %v729_v17  ;;  %v990_v20 = vsel %vm926_vm3, %v720_v11, %v958_v15  ;;  %vm929_vm4 = vcmp.ge.f32.partialorder %v735_v16, 0.0  ;;  %v3677_v11 = vld [vmem:[%s5742_s4 + $0x38] sm:$0xff]  ;;  %3994 = vmatpush3.msra.mxu1 %v3678_v7 }
 0x105   : > { %v3977_v22 = vpop.f32.mrf.mxu0  ;;  %1074 = vrot.lane.b32.xlu0 %v990_v20, %s4235_s22  ;;  %vm810_vm3 = vcmp.ge.f32.partialorder %v778_v60, 0.0  ;;  %v846_v15 = vmul.f32 0.01, %v782_v6  ;;  %3995 = vmatprep.subr.mxu1 %v3677_v11 }
 0x106   : > { %v960_v23 = vmul.f32 0.01, %v730_v19  ;;  %v745_v24 = vadd.f32 %v3977_v22, %v4465_v55  ;;  %vm928_vm5 = vcmp.ge.f32.partialorder %v730_v19, 0.0  ;;  %v993_v29 = vsel %vm929_vm4, %v735_v16, %v961_v18  ;;  %v784_v18 = vld [vmem:[%s4535_s26 + $0x30] sm:$0xff]  ;;  %3996 = vmatpush3.msra.mxu1 %v3677_v11  ;;  %v785_v22 = vld [vmem:[%s4535_s26 + $0x38] sm:$0xff] }
 0x107   : > { %v739_v25 = vpop.f32.mrf.mxu0  ;;  %1076 = vrot.lane.b32.xlu1 %v991_v21, %s4235_s22  ;;  %vm813_vm4 = vcmp.ge.f32.partialorder %v781_v61, 0.0  ;;  %v874_v8 = vsel %vm810_vm3, %v778_v60, %v842_v0  ;;  %v847_v21 = vmul.f32 0.01, %v783_v12  ;;  %v857_v11 = vmul.f32 0.01, %v793_v2 }
 0x108   : > { %v963_v26 = vmul.f32 0.01, %v745_v24  ;;  %v740_v27 = vadd.f32 %v4465_v55, %v739_v25  ;;  %v992_v28 = vsel %vm928_vm5, %v730_v19, %v960_v23  ;;  %vm931_vm6 = vcmp.ge.f32.partialorder %v745_v24, 0.0  ;;  %v3676_v19 = vld [vmem:[%s5742_s4 + $0x30] sm:$0xff] }
 0x109   : > { %v3980_v30 = vpop.f32.mrf.mxu0  ;;  %1078 = vrot.lane.b32.xlu0 %v992_v28, %s4235_s22  ;;  %v877_v9 = vsel %vm813_vm4, %v781_v61, %v845_v1  ;;  %vm812_vm5 = vcmp.ge.f32.partialorder %v780_v3, 0.0  ;;  %3997 = vmatprep.subr.mxu1 %v3676_v19  ;;  %v848_v25 = vmul.f32 0.01, %v784_v18  ;;  %v786_v28 = vld [vmem:[%s4535_s26 + $0x40] sm:$0xff]  ;;  %v792_v61 = vld [vmem:[%s4535_s26 + $0x70] sm:$0xff] }
 0x10a   : > { %v962_v31 = vmul.f32 0.01, %v740_v27  ;;  %v755_v32 = vadd.f32 %v3980_v30, %v4465_v55  ;;  %vm930_vm8 = vcmp.ge.f32.partialorder %v740_v27, 0.0  ;;  %v995_v37 = vsel %vm931_vm6, %v745_v24, %v963_v26  ;;  %3998 = vmatpush3.msra.mxu1 %v3676_v19 }
 0x10b   : > { %v749_v33 = vpop.f32.mrf.mxu0  ;;  %1080 = vrot.lane.b32.xlu1 %v993_v29, %s4235_s22  ;;  %vm814_vm6 = vcmp.ge.f32.partialorder %v782_v6, 0.0  ;;  %v876_v20 = vsel %vm812_vm5, %v780_v3, %v844_v10  ;;  %vm824_vm4 = vcmp.ge.f32.partialorder %v792_v61, 0.0  ;;  %vm825_vm5 = vcmp.ge.f32.partialorder %v793_v2, 0.0 }
 0x10c   : > { %v965_v34 = vmul.f32 0.01, %v755_v32  ;;  %v750_v35 = vadd.f32 %v4465_v55, %v749_v33  ;;  %v994_v36 = vsel %vm930_vm8, %v740_v27, %v962_v31  ;;  %vm933_vm9 = vcmp.ge.f32.partialorder %v755_v32, 0.0  ;;  %v787_v33 = vld [vmem:[%s4535_s26 + $0x48] sm:$0xff] }
 0x10d   : > { %v3983_v38 = vpop.f32.mrf.mxu0  ;;  %1082 = vrot.lane.b32.xlu0 %v994_v36, %s4235_s22  ;;  %vm815_vm8 = vcmp.ge.f32.partialorder %v783_v12, 0.0  ;;  %v878_v24 = vsel %vm814_vm6, %v782_v6, %v846_v15  ;;  %v849_v31 = vmul.f32 0.01, %v785_v22  ;;  %v850_v36 = vmul.f32 0.01, %v786_v28 }
 0x10e   : > { %v964_v39 = vmul.f32 0.01, %v750_v35  ;;  %v765_v40 = vadd.f32 %v3983_v38, %v4465_v55  ;;  %vm932_vm10 = vcmp.ge.f32.partialorder %v750_v35, 0.0  ;;  %v997_v45 = vsel %vm933_vm9, %v755_v32, %v965_v34 }
 0x10f   : > { %v759_v41 = vpop.f32.mrf.mxu0  ;;  %1084 = vrot.lane.b32.xlu1 %v995_v37, %s4235_s22  ;;  %vm816_vm9 = vcmp.ge.f32.partialorder %v784_v18, 0.0  ;;  %v879_v29 = vsel %vm815_vm8, %v783_v12, %v847_v21 }
 0x110   : > { %v967_v42 = vmul.f32 0.01, %v765_v40  ;;  %v760_v43 = vadd.f32 %v4465_v55, %v759_v41  ;;  %v996_v44 = vsel %vm932_vm10, %v750_v35, %v964_v39  ;;  %vm935_vm11 = vcmp.ge.f32.partialorder %v765_v40, 0.0 }
 0x111   : > { %v3986_v46 = vpop.f32.mrf.mxu0  ;;  %1086 = vrot.lane.b32.xlu0 %v996_v44, %s4235_s22  ;;  %vm817_vm10 = vcmp.ge.f32.partialorder %v785_v22, 0.0  ;;  %v880_v35 = vsel %vm816_vm9, %v784_v18, %v848_v25  ;;  %v797_v25 = vld [vmem:[%s4535_s26 + $0x98] sm:$0xff] }
 0x112   : > { %v966_v47 = vmul.f32 0.01, %v760_v43  ;;  %v775_v48 = vadd.f32 %v3986_v46, %v4465_v55  ;;  %vm934_vm12 = vcmp.ge.f32.partialorder %v760_v43, 0.0  ;;  %v999_v53 = vsel %vm935_vm11, %v765_v40, %v967_v42  ;;  %v788_v40 = vld [vmem:[%s4535_s26 + $0x50] sm:$0xff] }
 0x113   : > { %v769_v49 = vpop.f32.mrf.mxu0  ;;  %1088 = vrot.lane.b32.xlu1 %v997_v45, %s4235_s22  ;;  %vm818_vm11 = vcmp.ge.f32.partialorder %v786_v28, 0.0  ;;  %v881_v41 = vsel %vm817_vm10, %v785_v22, %v849_v31  ;;  %v789_v45 = vld [vmem:[%s4535_s26 + $0x58] sm:$0xff]  ;;  %v889_v22 = vsel %vm825_vm5, %v793_v2, %v857_v11  ;;  %v798_v31 = vld [vmem:[%s4535_s26 + $0xa0] sm:$0xff]  ;;  %vm829_vm10 = vcmp.ge.f32.partialorder %v797_v25, 0.0 }
 0x114   : > { %v969_v50 = vmul.f32 0.01, %v775_v48  ;;  %v770_v51 = vadd.f32 %v4465_v55, %v769_v49  ;;  %v998_v52 = vsel %vm934_vm12, %v760_v43, %v966_v47  ;;  %vm937_vm13 = vcmp.ge.f32.partialorder %v775_v48, 0.0  ;;  %v779_v55 = vld [vmem:[%s4535_s26 + $0x8] sm:$0xff] }
 0x115   : > { %1090 = vrot.lane.b32.xlu0 %v998_v52, %s4235_s22  ;;  %v843_v58 = vmul.f32 0.01, %v779_v55  ;;  %vm811_vm15 = vcmp.ge.f32.partialorder %v779_v55, 0.0  ;;  %v851_v43 = vmul.f32 0.01, %v787_v33  ;;  %vm819_vm12 = vcmp.ge.f32.partialorder %v787_v33, 0.0 }
 0x116   : > { %v968_v54 = vmul.f32 0.01, %v770_v51  ;;  %vm936_vm14 = vcmp.ge.f32.partialorder %v770_v51, 0.0  ;;  %v1001_v57 = vsel %vm937_vm13, %v775_v48, %v969_v50  ;;  %v882_v47 = vsel %vm818_vm11, %v786_v28, %v850_v36  ;;  %v799_v36 = vld [vmem:[%s4535_s26 + $0xa8] sm:$0xff] }
 0x117   : > { %1092 = vrot.lane.b32.xlu1 %v999_v53, %s4235_s22  ;;  %v875_v63 = vsel %vm811_vm15, %v779_v55, %v843_v58  ;;  %v852_v48 = vmul.f32 0.01, %v788_v40  ;;  %vm820_vm13 = vcmp.ge.f32.partialorder %v788_v40, 0.0  ;;  %v883_v52 = vsel %vm819_vm12, %v787_v33, %v851_v43 }
 0x118   : > { %v1000_v56 = vsel %vm936_vm14, %v770_v51, %v968_v54  ;;  %v790_v51 = vld [vmem:[%s4535_s26 + $0x60] sm:$0xff]  ;;  %v853_v54 = vmul.f32 0.01, %v789_v45  ;;  %vm821_vm14 = vcmp.ge.f32.partialorder %v789_v45, 0.0  ;;  %vm830_vm11 = vcmp.ge.f32.partialorder %v798_v31, 0.0 }
 0x119   : > { %1094 = vrot.lane.b32.xlu0 %v1000_v56, %s4235_s22  ;;  %v884_v58 = vsel %vm820_vm13, %v788_v40, %v852_v48  ;;  %v854_v59 = vmul.f32 0.01, %v790_v51  ;;  %vm822_vm15 = vcmp.ge.f32.partialorder %v790_v51, 0.0  ;;  %vm831_vm12 = vcmp.ge.f32.partialorder %v799_v36, 0.0 }
 0x11b   : > { %1096 = vrot.lane.b32.xlu1 %v1001_v57, %s4235_s22  ;;  %v791_v57 = vld [vmem:[%s4535_s26 + $0x68] sm:$0xff] }
 0x11c   : > { %v855_v0 = vmul.f32 0.01, %v791_v57  ;;  %vm823_vm3 = vcmp.ge.f32.partialorder %v791_v57, 0.0 }
 0x11e   : > { %v887_v10 = vsel %vm823_vm3, %v791_v57, %v855_v0  ;;  %v804_v0 = vld [vmem:[%s4535_s26 + $0xd0] sm:$0xff] }
 0x14d   : > { %v1037_v4 = vpop.permute.xlu0 %1036 }
 0x14e   : > { %v1132_v5 = vsel %vm1130_vm0, %v875_v63, %v1037_v4  ;;  %v885_v63 = vsel %vm821_vm14, %v789_v45, %v853_v54  ;;  %v886_v4 = vsel %vm822_vm15, %v790_v51, %v854_v59  ;;  %v863_v45 = vmul.f32 0.01, %v799_v36 }
 0x14f   : > { %1164 = vst.msk [vmem:[#allocation2 + $0x30] sm:$0xff] %vm272_vm1, %v1132_v5  ;;  %v856_v5 = vmul.f32 0.01, %v792_v61 }
 0x151   : > { %v1035_v13 = vpop.permute.xlu0 %1034  ;;  %v1041_v14 = vpop.permute.xlu1 %1040  ;;  %v888_v15 = vsel %vm824_vm4, %v792_v61, %v856_v5  ;;  %v805_v5 = vld [vmem:[%s4535_s26 + $0xd8] sm:$0xff]  ;;  %vm836_vm4 = vcmp.ge.f32.partialorder %v804_v0, 0.0 }
 0x152   : > { %v1131_v16 = vsel %vm1130_vm0, %v874_v8, %v1035_v13  ;;  %v1134_v17 = vsel %vm1130_vm0, %v877_v9, %v1041_v14  ;;  %v794_v8 = vld [vmem:[%s4535_s26 + $0x80] sm:$0xff]  ;;  %v795_v13 = vld [vmem:[%s4535_s26 + $0x88] sm:$0xff]  ;;  %vm837_vm5 = vcmp.ge.f32.partialorder %v805_v5, 0.0 }
 0x153   : > { %1163 = vst.msk [vmem:[#allocation2 + $0x28] sm:$0xff] %vm272_vm1, %v1131_v16  ;;  %1166 = vst.msk [vmem:[#allocation2 + $0x50] sm:$0xff] %vm272_vm1, %v1134_v17  ;;  %v858_v16 = vmul.f32 0.01, %v794_v8  ;;  %vm826_vm6 = vcmp.ge.f32.partialorder %v794_v8, 0.0  ;;  %vm827_vm8 = vcmp.ge.f32.partialorder %v795_v13, 0.0 }
 0x155   : > { %v1039_v23 = vpop.permute.xlu1 %1038 }
 0x156   : > { %v1133_v26 = vsel %vm1130_vm0, %v876_v20, %v1039_v23  ;;  %v1651_v27 = vld [vmem:[#allocation2 + $0x30] sm:$0xff]  ;;  %v859_v23 = vmul.f32 0.01, %v795_v13 }
 0x157   : > { %1165 = vst.msk [vmem:[#allocation2 + $0x48] sm:$0xff] %vm272_vm1, %v1133_v26  ;;  %1748 = vrot.lane.b32.xlu0 %v1651_v27, %s4233_s29  ;;  %v1043_v30 = vpop.permute.xlu0 %1042  ;;  %v1683_v37 = vld [vmem:[#allocation2 + $0x31] sm:$0xff] }
 0x158   : > { %v1135_v32 = vsel %vm1130_vm0, %v878_v24, %v1043_v30  ;;  %v796_v20 = vld [vmem:[%s4535_s26 + $0x90] sm:$0xff]  ;;  %v891_v33 = vsel %vm827_vm8, %v795_v13, %v859_v23 }
 0x159   : > { %v1045_v34 = vpop.permute.xlu1 %1044  ;;  %1167 = vst.msk [vmem:[#allocation2 + $0x68] sm:$0xff] %vm272_vm1, %v1135_v32  ;;  %v860_v28 = vmul.f32 0.01, %v796_v20  ;;  %vm828_vm9 = vcmp.ge.f32.partialorder %v796_v20, 0.0 }
 0x15a   : > { %v1650_v38 = vld [vmem:[#allocation2 + $0x28] sm:$0xff]  ;;  %v1136_v39 = vsel %vm1130_vm0, %v879_v29, %v1045_v34  ;;  %v1653_v18 = vld [vmem:[#allocation2 + $0x50] sm:$0xff]  ;;  %v861_v34 = vmul.f32 0.01, %v797_v25 }
 0x15b   : > { %1876 = vrot.lane.b32.xlu0 %v1683_v37, %s4234_s30  ;;  %1746 = vrot.lane.b32.xlu1 %v1650_v38, %s4233_s29  ;;  %1168 = vst.msk [vmem:[#allocation2 + $0x70] sm:$0xff] %vm272_vm1, %v1136_v39  ;;  %v1047_v42 = vpop.permute.xlu0 %1046  ;;  %v1682_v49 = vld [vmem:[#allocation2 + $0x29] sm:$0xff]  ;;  %v1685_v29 = vld [vmem:[#allocation2 + $0x51] sm:$0xff]  ;;  %v862_v39 = vmul.f32 0.01, %v798_v31 }
 0x15c   : > { %v1137_v44 = vsel %vm1130_vm0, %v880_v35, %v1047_v42  ;;  %v800_v42 = vld [vmem:[%s4535_s26 + $0xb0] sm:$0xff] }
 0x15d   : > { %v1049_v46 = vpop.permute.xlu1 %1048  ;;  %1169 = vst.msk [vmem:[#allocation2 + $0x88] sm:$0xff] %vm272_vm1, %v1137_v44  ;;  %v893_v44 = vsel %vm829_vm10, %v797_v25, %v861_v34  ;;  %vm832_vm13 = vcmp.ge.f32.partialorder %v800_v42, 0.0 }
 0x15e   : > { %v1138_v50 = vsel %vm1130_vm0, %v881_v41, %v1049_v46  ;;  %v4600_v6 = vld [vmem:[#allocation2 + $0x48] sm:$0xff] }
 0x15f   : > { %1329 = vrot.lane.b32.xlu0 %v1651_v27, %s4233_s29  ;;  %1874 = vrot.lane.b32.xlu1 %v1682_v49, %s4234_s30  ;;  %1170 = vst.msk [vmem:[#allocation2 + $0x90] sm:$0xff] %vm272_vm1, %v1138_v50  ;;  %v1051_v53 = vpop.permute.xlu0 %1050  ;;  %v1684_v17 = vld [vmem:[#allocation2 + $0x49] sm:$0xff]  ;;  %v890_v27 = vsel %vm826_vm6, %v794_v8, %v858_v16  ;;  %v864_v50 = vmul.f32 0.01, %v800_v42 }
 0x160   : > { %v1139_v56 = vsel %vm1130_vm0, %v882_v47, %v1051_v53  ;;  %v801_v47 = vld [vmem:[%s4535_s26 + $0xb8] sm:$0xff]  ;;  %v4638_v51 = vld [vmem:[#allocation2 + $0x68] sm:$0xff]  ;;  %v802_v53 = vld [vmem:[%s4535_s26 + $0xc0] sm:$0xff] }
 0x161   : > { %v1053_v55 = vpop.permute.xlu1 %1052  ;;  %1171 = vst.msk [vmem:[#allocation2 + $0xa8] sm:$0xff] %vm272_vm1, %v1139_v56  ;;  %v895_v56 = vsel %vm831_vm12, %v799_v36, %v863_v45  ;;  %v865_v57 = vmul.f32 0.01, %v801_v47  ;;  %vm833_vm14 = vcmp.ge.f32.partialorder %v801_v47, 0.0  ;;  %v866_v61 = vmul.f32 0.01, %v802_v53 }
 0x162   : > { %v1140_v60 = vsel %vm1130_vm0, %v883_v52, %v1053_v55  ;;  %v4627_v40 = vld [vmem:[#allocation2 + $0x71] sm:$0xff]  ;;  %vm834_vm15 = vcmp.ge.f32.partialorder %v802_v53, 0.0  ;;  %v807_v16 = vld [vmem:[%s4535_s26 + $0xe8] sm:$0xff] }
 0x163   : > { %1457 = vrot.lane.b32.xlu0 %v1683_v37, %s4234_s30  ;;  %1455 = vrot.lane.b32.xlu1 %v1682_v49, %s4234_s30  ;;  %1172 = vst.msk [vmem:[#allocation2 + $0xb0] sm:$0xff] %vm272_vm1, %v1140_v60  ;;  %v1055_v62 = vpop.permute.xlu0 %1054  ;;  %v894_v49 = vsel %vm830_vm11, %v798_v31, %v862_v39  ;;  %v896_v60 = vsel %vm832_vm13, %v800_v42, %v864_v50  ;;  %vm839_vm8 = vcmp.ge.f32.partialorder %v807_v16, 0.0 }
 0x164   : > { %v1141_v1 = vsel %vm1130_vm0, %v884_v58, %v1055_v62  ;;  %v803_v58 = vld [vmem:[%s4535_s26 + $0xc8] sm:$0xff]  ;;  %v897_v2 = vsel %vm833_vm14, %v801_v47, %v865_v57  ;;  %v898_v8 = vsel %vm834_vm15, %v802_v53, %v866_v61 }
 0x165   : > { %1173 = vst.msk [vmem:[#allocation2 + $0xc8] sm:$0xff] %vm272_vm1, %v1141_v1  ;;  %v1057_v3 = vpop.permute.xlu1 %1056  ;;  %v1686_v62 = vld [vmem:[#allocation2 + $0x69] sm:$0xff]  ;;  %vm835_vm3 = vcmp.ge.f32.partialorder %v803_v58, 0.0 }
 0x166   : > { %v1142_v7 = vsel %vm1130_vm0, %v885_v63, %v1057_v3  ;;  %v867_v3 = vmul.f32 0.01, %v803_v58  ;;  %v1657_v47 = vld [vmem:[#allocation2 + $0x90] sm:$0xff] }
 0x167   : > { %1750 = vrot.lane.b32.xlu1 %v4600_v6, %s4233_s29  ;;  %1327 = vrot.lane.b32.xlu0 %v1650_v38, %s4233_s29  ;;  %1174 = vst.msk [vmem:[#allocation2 + $0xd0] sm:$0xff] %vm272_vm1, %v1142_v7  ;;  %v1059_v9 = vpop.permute.xlu0 %1058  ;;  %v892_v38 = vsel %vm828_vm9, %v796_v20, %v860_v28 }
 0x168   : > { %v1143_v12 = vsel %vm1130_vm0, %v886_v4, %v1059_v9  ;;  %v868_v9 = vmul.f32 0.01, %v804_v0  ;;  %v899_v13 = vsel %vm835_vm3, %v803_v58, %v867_v3  ;;  %v1618_v58 = vld [vmem:[#allocation2 + $0x27] sm:$0xff] }
 0x169   : > { %1175 = vst.msk [vmem:[#allocation2 + $0xe8] sm:$0xff] %vm272_vm1, %v1143_v12  ;;  %v1061_v14 = vpop.permute.xlu1 %1060 }
 0x16a   : > { %v1144_v19 = vsel %vm1130_vm0, %v887_v10, %v1061_v14  ;;  %v1655_v10 = vld [vmem:[#allocation2 + $0x70] sm:$0xff]  ;;  %v869_v14 = vmul.f32 0.01, %v805_v5 }
 0x16b   : > { %1878 = vrot.lane.b32.xlu1 %v1684_v17, %s4234_s30  ;;  %1752 = vrot.lane.b32.xlu0 %v1653_v18, %s4233_s29  ;;  %1176 = vst.msk [vmem:[#allocation2 + $0xf0] sm:$0xff] %vm272_vm1, %v1144_v19  ;;  %v1063_v21 = vpop.permute.xlu0 %1062  ;;  %v1659_v50 = vld [vmem:[#allocation2 + $0xb0] sm:$0xff] }
 0x16c   : > { %v1145_v24 = vsel %vm1130_vm0, %v888_v15, %v1063_v21  ;;  %v808_v21 = vld [vmem:[%s4535_s26 + $0xf0] sm:$0xff]  ;;  %v901_v23 = vsel %vm837_vm5, %v805_v5, %v869_v14 }
 0x16d   : > { %1177 = vst.msk [vmem:[#allocation2 + $0x108] sm:$0xff] %vm272_vm1, %v1145_v24  ;;  %v1065_v26 = vpop.permute.xlu1 %1064  ;;  %v871_v24 = vmul.f32 0.01, %v807_v16  ;;  %vm840_vm9 = vcmp.ge.f32.partialorder %v808_v21, 0.0 }
 0x16e   : > { %v1146_v30 = vsel %vm1130_vm0, %v889_v22, %v1065_v26  ;;  %v809_v26 = vld [vmem:[%s4535_s26 + $0xf8] sm:$0xff]  ;;  %v1692_v53 = vld [vmem:[#allocation2 + $0xc9] sm:$0xff] }
 0x16f   : > { %1459 = vrot.lane.b32.xlu1 %v1684_v17, %s4234_s30  ;;  %1880 = vrot.lane.b32.xlu0 %v1685_v29, %s4234_s30  ;;  %1178 = vst.msk [vmem:[#allocation2 + $0x110] sm:$0xff] %vm272_vm1, %v1146_v30  ;;  %v1067_v32 = vpop.permute.xlu0 %1066  ;;  %vm841_vm10 = vcmp.ge.f32.partialorder %v809_v26, 0.0 }
 0x170   : > { %v1147_v35 = vsel %vm1130_vm0, %v890_v27, %v1067_v32  ;;  %v903_v32 = vsel %vm839_vm8, %v807_v16, %v871_v24  ;;  %v1662_v5 = vld [vmem:[#allocation2 + $0xe8] sm:$0xff] }
 0x171   : > { %1179 = vst.msk [vmem:[#allocation2 + $0x128] sm:$0xff] %vm272_vm1, %v1147_v35  ;;  %v1069_v37 = vpop.permute.xlu1 %1068 }
 0x172   : > { %v1148_v41 = vsel %vm1130_vm0, %v891_v33, %v1069_v37  ;;  %v873_v33 = vmul.f32 0.01, %v809_v26  ;;  %v2754_v37 = vld [vmem:[#allocation2 + $0x91] sm:$0xff] }
 0x173   : > { %2947 = vrot.lane.b32.xlu1 %v4627_v40, %s4234_s30  ;;  %1333 = vrot.lane.b32.xlu0 %v1653_v18, %s4233_s29  ;;  %1180 = vst.msk [vmem:[#allocation2 + $0x130] sm:$0xff] %vm272_vm1, %v1148_v41  ;;  %v1071_v43 = vpop.permute.xlu0 %1070  ;;  %v900_v18 = vsel %vm836_vm4, %v804_v0, %v868_v9 }
 0x174   : > { %v1149_v46 = vsel %vm1130_vm0, %v892_v38, %v1071_v43  ;;  %v905_v41 = vsel %vm841_vm10, %v809_v26, %v873_v33 }
 0x175   : > { %1181 = vst.msk [vmem:[#allocation2 + $0x148] sm:$0xff] %vm272_vm1, %v1149_v46  ;;  %v1073_v48 = vpop.permute.xlu1 %1072  ;;  %v1688_v46 = vld [vmem:[#allocation2 + $0x89] sm:$0xff] }
 0x176   : > { %v1150_v52 = vsel %vm1130_vm0, %v893_v44, %v1073_v48  ;;  %v1656_v44 = vld [vmem:[#allocation2 + $0x88] sm:$0xff] }
 0x177   : > { %1754 = vrot.lane.b32.xlu1 %v4638_v51, %s4233_s29  ;;  %1461 = vrot.lane.b32.xlu0 %v1685_v29, %s4234_s30  ;;  %1182 = vst.msk [vmem:[#allocation2 + $0x150] sm:$0xff] %vm272_vm1, %v1150_v52  ;;  %v1075_v54 = vpop.permute.xlu0 %1074  ;;  %v872_v29 = vmul.f32 0.01, %v808_v21  ;;  %v1658_v48 = vld [vmem:[#allocation2 + $0xa8] sm:$0xff] }
 0x178   : > { %v1151_v55 = vsel %vm1130_vm0, %v894_v49, %v1075_v54  ;;  %v1690_v49 = vld [vmem:[#allocation2 + $0xa9] sm:$0xff] }
 0x179   : > { %1183 = vst.msk [vmem:[#allocation2 + $0x168] sm:$0xff] %vm272_vm1, %v1151_v55  ;;  %v1077_v59 = vpop.permute.xlu1 %1076  ;;  %v904_v36 = vsel %vm840_vm9, %v808_v21, %v872_v29  ;;  %v1660_v52 = vld [vmem:[#allocation2 + $0xc8] sm:$0xff]  ;;  %v1661_v54 = vld [vmem:[#allocation2 + $0xd0] sm:$0xff] }
 0x17a   : > { %v1152_v63 = vsel %vm1130_vm0, %v895_v56, %v1077_v59  ;;  %v1619_v59 = vld [vmem:[#allocation2 + $0x2f] sm:$0xff]  ;;  %v1622_v29 = vld [vmem:[#allocation2 + $0x67] sm:$0xff] }
 0x17b   : > { %1882 = vrot.lane.b32.xlu1 %v1686_v62, %s4234_s30  ;;  %1331 = vrot.lane.b32.xlu0 %v4600_v6, %s4233_s29  ;;  %1184 = vst.msk [vmem:[#allocation2 + $0x170] sm:$0xff] %vm272_vm1, %v1152_v63  ;;  %v1079_v1 = vpop.permute.xlu0 %1078  ;;  %v806_v6 = vld [vmem:[%s4535_s26 + $0xe0] sm:$0xff] }
 0x17c   : > { %v1153_v4 = vsel %vm1130_vm0, %v896_v60, %v1079_v1  ;;  %v870_v19 = vmul.f32 0.01, %v806_v6  ;;  %vm838_vm6 = vcmp.ge.f32.partialorder %v806_v6, 0.0  ;;  %v2760_v1 = vld [vmem:[#allocation2 + $0xf1] sm:$0xff] }
 0x17d   : > { %1185 = vst.msk [vmem:[#allocation2 + $0x188] sm:$0xff] %vm272_vm1, %v1153_v4  ;;  %v1081_v7 = vpop.permute.xlu1 %1080 }
 0x17e   : > { %v1154_v11 = vsel %vm1130_vm0, %v897_v2, %v1081_v7  ;;  %v902_v28 = vsel %vm838_vm6, %v806_v6, %v870_v19  ;;  %v1621_v19 = vld [vmem:[#allocation2 + $0x4f] sm:$0xff] }
 0x17f   : > { %2817 = vrot.lane.b32.xlu1 %v4638_v51, %s4233_s29  ;;  %1756 = vrot.lane.b32.xlu0 %v1655_v10, %s4233_s29  ;;  %1186 = vst.msk [vmem:[#allocation2 + $0x190] sm:$0xff] %vm272_vm1, %v1154_v11  ;;  %v1083_v12 = vpop.permute.xlu0 %1082 }
 0x180   : > { %v1155_v15 = vsel %vm1130_vm0, %v898_v8, %v1083_v12 }
 0x181   : > { %1187 = vst.msk [vmem:[#allocation2 + $0x1a8] sm:$0xff] %vm272_vm1, %v1155_v15  ;;  %v1085_v17 = vpop.permute.xlu1 %1084 }
 0x182   : > { %v1156_v20 = vsel %vm1130_vm0, %v899_v13, %v1085_v17  ;;  %v1620_v13 = vld [vmem:[#allocation2 + $0x47] sm:$0xff] }
 0x183   : > { %2945 = vrot.lane.b32.xlu1 %v1686_v62, %s4234_s30  ;;  %1884 = vrot.lane.b32.xlu0 %v4627_v40, %s4234_s30  ;;  %1188 = vst.msk [vmem:[#allocation2 + $0x1b0] sm:$0xff] %vm272_vm1, %v1156_v20  ;;  %v1087_v22 = vpop.permute.xlu0 %1086 }
 0x184   : > { %v1157_v25 = vsel %vm1130_vm0, %v900_v18, %v1087_v22  ;;  %v1663_v18 = vld [vmem:[#allocation2 + $0xf0] sm:$0xff] }
 0x185   : > { %1189 = vst.msk [vmem:[#allocation2 + $0x1c8] sm:$0xff] %vm272_vm1, %v1157_v25  ;;  %v1089_v27 = vpop.permute.xlu1 %1088 }
 0x186   : > { %v1158_v30 = vsel %vm1130_vm0, %v901_v23, %v1089_v27 }
 0x187   : > { %1463 = vrot.lane.b32.xlu1 %v1686_v62, %s4234_s30  ;;  %2819 = vrot.lane.b32.xlu0 %v1655_v10, %s4233_s29  ;;  %1190 = vst.msk [vmem:[#allocation2 + $0x1d0] sm:$0xff] %vm272_vm1, %v1158_v30  ;;  %v1091_v31 = vpop.permute.xlu0 %1090 }
 0x188   : > { %v1159_v34 = vsel %vm1130_vm0, %v902_v28, %v1091_v31  ;;  %v2762_v28 = vld [vmem:[#allocation2 + $0x111] sm:$0xff] }
 0x189   : > { %1191 = vst.msk [vmem:[#allocation2 + $0x1e8] sm:$0xff] %vm272_vm1, %v1159_v34  ;;  %v1093_v35 = vpop.permute.xlu1 %1092 }
 0x18a   : > { %v1160_v38 = vsel %vm1130_vm0, %v903_v32, %v1093_v35  ;;  %v1664_v35 = vld [vmem:[#allocation2 + $0x108] sm:$0xff] }
 0x18b   : > { %2951 = vrot.lane.b32.xlu1 %v2754_v37, %s4234_s30  ;;  %1337 = vrot.lane.b32.xlu0 %v1655_v10, %s4233_s29  ;;  %1192 = vst.msk [vmem:[#allocation2 + $0x1f0] sm:$0xff] %vm272_vm1, %v1160_v38  ;;  %v1095_v39 = vpop.permute.xlu0 %1094  ;;  %v1694_v10 = vld [vmem:[#allocation2 + $0xe9] sm:$0xff] }
 0x18c   : > { %v1161_v42 = vsel %vm1130_vm0, %v904_v36, %v1095_v39 }
 0x18d   : > { %1193 = vst.msk [vmem:[#allocation2 + $0x208] sm:$0xff] %vm272_vm1, %v1161_v42  ;;  %v1097_v43 = vpop.permute.xlu1 %1096  ;;  %v1696_v42 = vld [vmem:[#allocation2 + $0x109] sm:$0xff] }
 0x18e   : > { %v1162_v45 = vsel %vm1130_vm0, %v905_v41, %v1097_v43  ;;  %v4774_v43 = vld [vmem:[#allocation2 + $0x6f] sm:$0xff] }
 0x18f   : > { %1758 = vrot.lane.b32.xlu1 %v1656_v44, %s4233_s29  ;;  %1465 = vrot.lane.b32.xlu0 %v4627_v40, %s4234_s30  ;;  %1194 = vst.msk [vmem:[#allocation2 + $0x210] sm:$0xff] %vm272_vm1, %v1162_v45  ;;  %v2756_v40 = vld [vmem:[#allocation2 + $0xb1] sm:$0xff] }
 0x193   : > { %1886 = vrot.lane.b32.xlu1 %v1688_v46, %s4234_s30  ;;  %1335 = vrot.lane.b32.xlu0 %v4638_v51, %s4233_s29  ;;  %v2758_v51 = vld [vmem:[#allocation2 + $0xd1] sm:$0xff] }
 0x197   : > { %2821 = vrot.lane.b32.xlu1 %v1656_v44, %s4233_s29  ;;  %1760 = vrot.lane.b32.xlu0 %v1657_v47, %s4233_s29 }
 0x19b   : > { %2949 = vrot.lane.b32.xlu1 %v1688_v46, %s4234_s30  ;;  %1888 = vrot.lane.b32.xlu0 %v2754_v37, %s4234_s30 }
 0x19f   : > { %1467 = vrot.lane.b32.xlu1 %v1688_v46, %s4234_s30  ;;  %2823 = vrot.lane.b32.xlu0 %v1657_v47, %s4233_s29 }
 0x1a3   : > { %2955 = vrot.lane.b32.xlu1 %v2756_v40, %s4234_s30  ;;  %1341 = vrot.lane.b32.xlu0 %v1657_v47, %s4233_s29 }
 0x1a7   : > { %1762 = vrot.lane.b32.xlu1 %v1658_v48, %s4233_s29  ;;  %1469 = vrot.lane.b32.xlu0 %v2754_v37, %s4234_s30 }
 0x1ab   : > { %1890 = vrot.lane.b32.xlu1 %v1690_v49, %s4234_s30  ;;  %1339 = vrot.lane.b32.xlu0 %v1656_v44, %s4233_s29 }
 0x1af   : > { %2825 = vrot.lane.b32.xlu1 %v1658_v48, %s4233_s29  ;;  %1764 = vrot.lane.b32.xlu0 %v1659_v50, %s4233_s29 }
 0x1b3   : > { %2953 = vrot.lane.b32.xlu1 %v1690_v49, %s4234_s30  ;;  %1892 = vrot.lane.b32.xlu0 %v2756_v40, %s4234_s30 }
 0x1b7   : > { %1471 = vrot.lane.b32.xlu1 %v1690_v49, %s4234_s30  ;;  %2827 = vrot.lane.b32.xlu0 %v1659_v50, %s4233_s29 }
 0x1bb   : > { %2959 = vrot.lane.b32.xlu1 %v2758_v51, %s4234_s30  ;;  %1345 = vrot.lane.b32.xlu0 %v1659_v50, %s4233_s29 }
 0x1bf   : > { %1766 = vrot.lane.b32.xlu1 %v1660_v52, %s4233_s29  ;;  %1473 = vrot.lane.b32.xlu0 %v2756_v40, %s4234_s30  ;;  %v1665_v40 = vld [vmem:[#allocation2 + $0x110] sm:$0xff] }
 0x1c3   : > { %1894 = vrot.lane.b32.xlu1 %v1692_v53, %s4234_s30  ;;  %1343 = vrot.lane.b32.xlu0 %v1658_v48, %s4233_s29 }
 0x1c7   : > { %2829 = vrot.lane.b32.xlu1 %v1660_v52, %s4233_s29  ;;  %1768 = vrot.lane.b32.xlu0 %v1661_v54, %s4233_s29 }
 0x1c9   : > { %v1749_v56 = vpop.permute.xlu0 %1748 }
 0x1ca   : > { %v1971_v63 = vsel %vm272_vm1, %v1619_v59, %v1749_v56  ;;  %v4794_v56 = vld [vmem:[#allocation2 + $0x87] sm:$0xff] }
 0x1cb   : > { %2957 = vrot.lane.b32.xlu1 %v1692_v53, %s4234_s30  ;;  %1896 = vrot.lane.b32.xlu0 %v2758_v51, %s4234_s30 }
 0x1cd   : > { %v1877_v57 = vpop.permute.xlu0 %1876  ;;  %v1747_v55 = vpop.permute.xlu1 %1746 }
 0x1ce   : > { %v1970_v60 = vsel %vm272_vm1, %v1618_v58, %v1747_v55  ;;  %v2003_v2 = vsel %vm1579_vm2, %v1971_v63, %v1877_v57 }
 0x1cf   : > { %1475 = vrot.lane.b32.xlu1 %v1692_v53, %s4234_s30  ;;  %2831 = vrot.lane.b32.xlu0 %v1661_v54, %s4233_s29 }
 0x1d1   : > { %v1330_v61 = vpop.permute.xlu0 %1329  ;;  %v1875_v62 = vpop.permute.xlu1 %1874 }
 0x1d2   : > { %v2002_v0 = vsel %vm1579_vm2, %v1970_v60, %v1875_v62  ;;  %v1550_v11 = vsel %vm272_vm1, %v1619_v59, %v1330_v61  ;;  %v1666_v61 = vld [vmem:[#allocation2 + $0x128] sm:$0xff] }
 0x1d3   : > { %3999 = vmatprep.mubr.msk.f32.mxu1 %vm2041_vm7, %v2002_v0  ;;  %2963 = vrot.lane.b32.xlu1 %v2760_v1, %s4234_s30 }
 0x1d4   : > { %1349 = vrot.lane.b32.xlu0 %v1661_v54, %s4233_s29  ;;  %4000 = vmatmul.mubr.msk.f32.vlgmr.msra.gmra.mxu1 %vm2041_vm7, %v2003_v2  ;;  %v2764_v54 = vld [vmem:[#allocation2 + $0x131] sm:$0xff] }
 0x1d5   : > { %v1458_v3 = vpop.permute.xlu0 %1457  ;;  %v1456_v4 = vpop.permute.xlu1 %1455 }
 0x1d6   : > { %v1583_v12 = vsel %vm1579_vm2, %v1550_v11, %v1458_v3  ;;  %v1698_v3 = vld [vmem:[#allocation2 + $0x129] sm:$0xff] }
 0x1d7   : > { %1770 = vrot.lane.b32.xlu1 %v1662_v5, %s4233_s29 }
 0x1d8   : > { %1477 = vrot.lane.b32.xlu0 %v2758_v51, %s4234_s30 }
 0x1d9   : > { %v1751_v7 = vpop.permute.xlu1 %1750  ;;  %v1328_v8 = vpop.permute.xlu0 %1327 }
 0x1da   : > { %v1549_v9 = vsel %vm272_vm1, %v1618_v58, %v1328_v8  ;;  %v1972_v14 = vsel %vm272_vm1, %v1620_v13, %v1751_v7 }
 0x1db   : > { %1898 = vrot.lane.b32.xlu1 %v1694_v10, %s4234_s30  ;;  %v1582_v6 = vsel %vm1579_vm2, %v1549_v9, %v1456_v4  ;;  %v4813_v4 = vld [vmem:[#allocation2 + $0x8f] sm:$0xff] }
 0x1dc   : > { %1347 = vrot.lane.b32.xlu0 %v1660_v52, %s4233_s29  ;;  %4062 = vmatprep.mubr.msk.f32.mxu0 %vm2041_vm7, %v1582_v6 }
 0x1dd   : > { %v1879_v15 = vpop.permute.xlu1 %1878  ;;  %v1753_v16 = vpop.permute.xlu0 %1752  ;;  %4063 = vmatmul.mubr.msk.f32.gmra.mxu0 %vm2041_vm7, %v1583_v12 }
 0x1de   : > { %v2004_v17 = vsel %vm1579_vm2, %v1972_v14, %v1879_v15  ;;  %v1973_v20 = vsel %vm272_vm1, %v1621_v19, %v1753_v16  ;;  %v2766_v16 = vld [vmem:[#allocation2 + $0x151] sm:$0xff] }
 0x1df   : > { %2833 = vrot.lane.b32.xlu1 %v1662_v5, %s4233_s29  ;;  %4002 = vmatprep.mubr.msk.f32.mxu1 %vm2041_vm7, %v2004_v17  ;;  %v4833_v17 = vld [vmem:[#allocation2 + $0xa7] sm:$0xff] }
 0x1e0   : > { %1772 = vrot.lane.b32.xlu0 %v1663_v18, %s4233_s29 }
 0x1e1   : > { %v1460_v21 = vpop.permute.xlu1 %1459  ;;  %v1881_v22 = vpop.permute.xlu0 %1880 }
 0x1e2   : > { %v2005_v23 = vsel %vm1579_vm2, %v1973_v20, %v1881_v22 }
 0x1e3   : > { %2961 = vrot.lane.b32.xlu1 %v1694_v10, %s4234_s30  ;;  %4003 = vmatmul.mubr.msk.f32.gmra.mxu1 %vm2041_vm7, %v2005_v23  ;;  %v1668_v23 = vld [vmem:[#allocation2 + $0x148] sm:$0xff] }
 0x1e4   : > { %1900 = vrot.lane.b32.xlu0 %v2760_v1, %s4234_s30 }
 0x1e5   : > { %v4754_v24 = vpop.permute.xlu1 %2947  ;;  %v1334_v25 = vpop.permute.xlu0 %1333 }
 0x1e6   : > { %v1552_v36 = vsel %vm272_vm1, %v1621_v19, %v1334_v25 }
 0x1e7   : > { %1479 = vrot.lane.b32.xlu1 %v1694_v10, %s4234_s30  ;;  %v1667_v10 = vld [vmem:[#allocation2 + $0x130] sm:$0xff] }
 0x1e8   : > { %2835 = vrot.lane.b32.xlu0 %v1663_v18, %s4233_s29 }
 0x1e9   : > { %v1755_v26 = vpop.permute.xlu1 %1754  ;;  %v1462_v27 = vpop.permute.xlu0 %1461 }
 0x1ea   : > { %v1974_v30 = vsel %vm272_vm1, %v1622_v29, %v1755_v26  ;;  %v1585_v38 = vsel %vm1579_vm2, %v1552_v36, %v1462_v27  ;;  %v1669_v36 = vld [vmem:[#allocation2 + $0x150] sm:$0xff] }
 0x1eb   : > { %2967 = vrot.lane.b32.xlu1 %v2762_v28, %s4234_s30 }
 0x1ec   : > { %1353 = vrot.lane.b32.xlu0 %v1663_v18, %s4233_s29 }
 0x1ed   : > { %v1883_v31 = vpop.permute.xlu1 %1882  ;;  %v1332_v32 = vpop.permute.xlu0 %1331 }
 0x1ee   : > { %v2006_v33 = vsel %vm1579_vm2, %v1974_v30, %v1883_v31  ;;  %v1551_v34 = vsel %vm272_vm1, %v1620_v13, %v1332_v32  ;;  %v1700_v30 = vld [vmem:[#allocation2 + $0x149] sm:$0xff] }
 0x1ef   : > { %1774 = vrot.lane.b32.xlu1 %v1664_v35, %s4233_s29  ;;  %4005 = vmatprep.mubr.msk.f32.mxu1 %vm2041_vm7, %v2006_v33  ;;  %v1584_v37 = vsel %vm1579_vm2, %v1551_v34, %v1460_v21  ;;  %v4853_v31 = vld [vmem:[#allocation2 + $0xaf] sm:$0xff] }
 0x1f0   : > { %1481 = vrot.lane.b32.xlu0 %v2760_v1, %s4234_s30  ;;  %4065 = vmatprep.mubr.msk.f32.mxu0 %vm2041_vm7, %v1584_v37 }
 0x1f1   : > { %v4770_v39 = vpop.permute.xlu1 %2817  ;;  %v1757_v41 = vpop.permute.xlu0 %1756  ;;  %4066 = vmatmul.mubr.msk.f32.gmra.mxu0 %vm2041_vm7, %v1585_v38 }
 0x1f2   : > { %v1975_v44 = vsel %vm272_vm1, %v4774_v43, %v1757_v41 }
 0x1f3   : > { %1902 = vrot.lane.b32.xlu1 %v1696_v42, %s4234_s30 }
 0x1f4   : > { %1351 = vrot.lane.b32.xlu0 %v1662_v5, %s4233_s29 }
 0x1f5   : > { %v4779_v45 = vpop.permute.xlu1 %2945  ;;  %v1885_v46 = vpop.permute.xlu0 %1884 }
 0x1f6   : > { %v2007_v47 = vsel %vm1579_vm2, %v1975_v44, %v1885_v46 }
 0x1f7   : > { %2837 = vrot.lane.b32.xlu1 %v1664_v35, %s4233_s29  ;;  %4006 = vmatmul.mubr.msk.f32.gmra.mxu1 %vm2041_vm7, %v2007_v47  ;;  %v2768_v47 = vld [vmem:[#allocation2 + $0x171] sm:$0xff] }
 0x1f8   : > { %1776 = vrot.lane.b32.xlu0 %v1665_v40, %s4233_s29 }
 0x1f9   : > { %v1464_v48 = vpop.permute.xlu1 %1463  ;;  %v4785_v49 = vpop.permute.xlu0 %2819 }
 0x1fb   : > { %2965 = vrot.lane.b32.xlu1 %v1696_v42, %s4234_s30 }
 0x1fc   : > { %1904 = vrot.lane.b32.xlu0 %v2762_v28, %s4234_s30 }
 0x1fd   : > { %v4789_v50 = vpop.permute.xlu1 %2951  ;;  %v1338_v51 = vpop.permute.xlu0 %1337 }
 0x1fe   : > { %v1554_v62 = vsel %vm272_vm1, %v4774_v43, %v1338_v51 }
 0x1ff   : > { %1483 = vrot.lane.b32.xlu1 %v1696_v42, %s4234_s30 }
 0x200   : > { %2839 = vrot.lane.b32.xlu0 %v1665_v40, %s4233_s29 }
 0x201   : > { %v1759_v52 = vpop.permute.xlu1 %1758  ;;  %v1466_v53 = vpop.permute.xlu0 %1465 }
 0x202   : > { %v1976_v57 = vsel %vm272_vm1, %v4794_v56, %v1759_v52  ;;  %v1587_v0 = vsel %vm1579_vm2, %v1554_v62, %v1466_v53  ;;  %v1702_v62 = vld [vmem:[#allocation2 + $0x169] sm:$0xff] }
 0x203   : > { %2971 = vrot.lane.b32.xlu1 %v2764_v54, %s4234_s30 }
 0x204   : > { %1357 = vrot.lane.b32.xlu0 %v1665_v40, %s4233_s29  ;;  %v4873_v40 = vld [vmem:[#allocation2 + $0xc7] sm:$0xff] }
 0x205   : > { %v1887_v55 = vpop.permute.xlu1 %1886  ;;  %v1336_v58 = vpop.permute.xlu0 %1335 }
 0x206   : > { %v2008_v59 = vsel %vm1579_vm2, %v1976_v57, %v1887_v55  ;;  %v1553_v60 = vsel %vm272_vm1, %v1622_v29, %v1336_v58  ;;  %v1670_v57 = vld [vmem:[#allocation2 + $0x168] sm:$0xff] }
 0x207   : > { %1778 = vrot.lane.b32.xlu1 %v1666_v61, %s4233_s29  ;;  %4008 = vmatprep.mubr.msk.f32.mxu1 %vm2041_vm7, %v2008_v59  ;;  %v1586_v63 = vsel %vm1579_vm2, %v1553_v60, %v1464_v48 }
 0x208   : > { %1485 = vrot.lane.b32.xlu0 %v2762_v28, %s4234_s30  ;;  %4068 = vmatprep.mubr.msk.f32.mxu0 %vm2041_vm7, %v1586_v63  ;;  %v4893_v63 = vld [vmem:[#allocation2 + $0xcf] sm:$0xff] }
 0x209   : > { %v4809_v1 = vpop.permute.xlu1 %2821  ;;  %v1761_v2 = vpop.permute.xlu0 %1760  ;;  %4069 = vmatmul.mubr.msk.f32.gmra.mxu0 %vm2041_vm7, %v1587_v0 }
 0x20a   : > { %v1977_v5 = vsel %vm272_vm1, %v4813_v4, %v1761_v2 }
 0x20b   : > { %1906 = vrot.lane.b32.xlu1 %v1698_v3, %s4234_s30 }
 0x20c   : > { %1355 = vrot.lane.b32.xlu0 %v1664_v35, %s4233_s29 }
 0x20d   : > { %v4818_v7 = vpop.permute.xlu1 %2949  ;;  %v1889_v8 = vpop.permute.xlu0 %1888 }
 0x20e   : > { %v2009_v9 = vsel %vm1579_vm2, %v1977_v5, %v1889_v8  ;;  %v1671_v8 = vld [vmem:[#allocation2 + $0x170] sm:$0xff] }
 0x20f   : > { %2841 = vrot.lane.b32.xlu1 %v1666_v61, %s4233_s29  ;;  %4009 = vmatmul.mubr.msk.f32.gmra.mxu1 %vm2041_vm7, %v2009_v9 }
 0x210   : > { %1780 = vrot.lane.b32.xlu0 %v1667_v10, %s4233_s29 }
 0x211   : > { %v1468_v11 = vpop.permute.xlu1 %1467  ;;  %v4824_v6 = vpop.permute.xlu0 %2823 }
 0x213   : > { %2969 = vrot.lane.b32.xlu1 %v1698_v3, %s4234_s30 }
 0x214   : > { %1908 = vrot.lane.b32.xlu0 %v2764_v54, %s4234_s30 }
 0x215   : > { %v4828_v12 = vpop.permute.xlu1 %2955  ;;  %v1342_v13 = vpop.permute.xlu0 %1341 }
 0x216   : > { %v1556_v25 = vsel %vm272_vm1, %v4813_v4, %v1342_v13 }
 0x217   : > { %1487 = vrot.lane.b32.xlu1 %v1698_v3, %s4234_s30 }
 0x218   : > { %2843 = vrot.lane.b32.xlu0 %v1667_v10, %s4233_s29 }
 0x219   : > { %v1763_v14 = vpop.permute.xlu1 %1762  ;;  %v1470_v15 = vpop.permute.xlu0 %1469 }
 0x21a   : > { %v1978_v18 = vsel %vm272_vm1, %v4833_v17, %v1763_v14  ;;  %v1589_v27 = vsel %vm1579_vm2, %v1556_v25, %v1470_v15 }
 0x21b   : > { %2975 = vrot.lane.b32.xlu1 %v2766_v16, %s4234_s30 }
 0x21c   : > { %1361 = vrot.lane.b32.xlu0 %v1667_v10, %s4233_s29 }
 0x21d   : > { %v1891_v19 = vpop.permute.xlu1 %1890  ;;  %v1340_v20 = vpop.permute.xlu0 %1339 }
 0x21e   : > { %v2010_v21 = vsel %vm1579_vm2, %v1978_v18, %v1891_v19  ;;  %v1555_v22 = vsel %vm272_vm1, %v4794_v56, %v1340_v20  ;;  %v4916_v18 = vld [vmem:[#allocation2 + $0xe7] sm:$0xff] }
 0x21f   : > { %1782 = vrot.lane.b32.xlu1 %v1668_v23, %s4233_s29  ;;  %4011 = vmatprep.mubr.msk.f32.mxu1 %vm2041_vm7, %v2010_v21  ;;  %v1588_v26 = vsel %vm1579_vm2, %v1555_v22, %v1468_v11 }
 0x220   : > { %1489 = vrot.lane.b32.xlu0 %v2764_v54, %s4234_s30  ;;  %4071 = vmatprep.mubr.msk.f32.mxu0 %vm2041_vm7, %v1588_v26  ;;  %v3751_v26 = vld [vmem:[%s5742_s4 + $0x88] sm:$0xff] }
 0x221   : > { %v4849_v28 = vpop.permute.xlu1 %2825  ;;  %v1765_v29 = vpop.permute.xlu0 %1764  ;;  %4072 = vmatmul.mubr.msk.f32.gmra.mxu0 %vm2041_vm7, %v1589_v27  ;;  %4167 = vmatprep.subr.mxu1 %v3751_v26 }
 0x222   : > { %v1979_v32 = vsel %vm272_vm1, %v4853_v31, %v1765_v29  ;;  %4173 = vmatpush3.msra.mxu1 %v3751_v26  ;;  %4107 = vmatprep.subr.mxu0 %v3751_v26 }
 0x223   : > { %1910 = vrot.lane.b32.xlu1 %v1700_v30, %s4234_s30  ;;  %4108 = vmatpush3.msra.mxu0 %v3751_v26 }
 0x224   : > { %1359 = vrot.lane.b32.xlu0 %v1666_v61, %s4233_s29 }
 0x225   : > { %v4858_v33 = vpop.permute.xlu1 %2953  ;;  %v1893_v34 = vpop.permute.xlu0 %1892 }
 0x226   : > { %v2011_v35 = vsel %vm1579_vm2, %v1979_v32, %v1893_v34 }
 0x227   : > { %2845 = vrot.lane.b32.xlu1 %v1668_v23, %s4233_s29  ;;  %4012 = vmatmul.mubr.msk.f32.gmra.mxu1 %vm2041_vm7, %v2011_v35  ;;  %v1704_v35 = vld [vmem:[#allocation2 + $0x189] sm:$0xff] }
 0x228   : > { %1784 = vrot.lane.b32.xlu0 %v1669_v36, %s4233_s29 }
 0x229   : > { %v1472_v37 = vpop.permute.xlu1 %1471  ;;  %v4864_v38 = vpop.permute.xlu0 %2827 }
 0x22b   : > { %2973 = vrot.lane.b32.xlu1 %v1700_v30, %s4234_s30 }
 0x22c   : > { %1912 = vrot.lane.b32.xlu0 %v2766_v16, %s4234_s30 }
 0x22d   : > { %v4868_v41 = vpop.permute.xlu1 %2959  ;;  %v1346_v42 = vpop.permute.xlu0 %1345 }
 0x22e   : > { %v1558_v55 = vsel %vm272_vm1, %v4853_v31, %v1346_v42 }
 0x22f   : > { %1491 = vrot.lane.b32.xlu1 %v1700_v30, %s4234_s30 }
 0x230   : > { %2847 = vrot.lane.b32.xlu0 %v1669_v36, %s4233_s29 }
 0x231   : > { %v1767_v44 = vpop.permute.xlu1 %1766  ;;  %v1474_v46 = vpop.permute.xlu0 %1473 }
 0x232   : > { %v1980_v48 = vsel %vm272_vm1, %v4873_v40, %v1767_v44  ;;  %v1591_v59 = vsel %vm1579_vm2, %v1558_v55, %v1474_v46 }
 0x233   : > { %2979 = vrot.lane.b32.xlu1 %v2768_v47, %s4234_s30 }
 0x234   : > { %1365 = vrot.lane.b32.xlu0 %v1669_v36, %s4233_s29  ;;  %v4943_v36 = vld [vmem:[#allocation2 + $0xef] sm:$0xff] }
 0x235   : > { %v1895_v51 = vpop.permute.xlu1 %1894  ;;  %v1344_v52 = vpop.permute.xlu0 %1343 }
 0x236   : > { %v2012_v53 = vsel %vm1579_vm2, %v1980_v48, %v1895_v51  ;;  %v1557_v54 = vsel %vm272_vm1, %v4833_v17, %v1344_v52  ;;  %v3750_v48 = vld [vmem:[%s5742_s4 + $0x80] sm:$0xff] }
 0x237   : > { %1786 = vrot.lane.b32.xlu1 %v1670_v57, %s4233_s29  ;;  %4014 = vmatprep.mubr.msk.f32.mxu1 %vm2041_vm7, %v2012_v53  ;;  %v1590_v58 = vsel %vm1579_vm2, %v1557_v54, %v1472_v37 }
 0x238   : > { %1493 = vrot.lane.b32.xlu0 %v2766_v16, %s4234_s30  ;;  %4074 = vmatprep.mubr.msk.f32.mxu0 %vm2041_vm7, %v1590_v58  ;;  %v4912_v16 = vld [vmem:[#allocation2 + $0x191] sm:$0xff] }
 0x239   : > { %v4889_v60 = vpop.permute.xlu1 %2829  ;;  %v1769_v61 = vpop.permute.xlu0 %1768  ;;  %4075 = vmatmul.mubr.msk.f32.gmra.mxu0 %vm2041_vm7, %v1591_v59  ;;  %4168 = vmatprep.subr.mxu1 %v3750_v48  ;;  %v4966_v58 = vld [vmem:[#allocation2 + $0x1b1] sm:$0xff] }
 0x23a   : > { %v1981_v0 = vsel %vm272_vm1, %v4893_v63, %v1769_v61  ;;  %4109 = vmatprep.subr.mxu0 %v3750_v48  ;;  %4174 = vmatpush3.msra.mxu1 %v3750_v48  ;;  %v3749_v59 = vld [vmem:[%s5742_s4 + $0x78] sm:$0xff]  ;;  %v4973_v61 = vld [vmem:[#allocation2 + $0x107] sm:$0xff] }
 0x23b   : > { %1914 = vrot.lane.b32.xlu1 %v1702_v62, %s4234_s30  ;;  %4110 = vmatpush3.msra.mxu0 %v3750_v48 }
 0x23c   : > { %1363 = vrot.lane.b32.xlu0 %v1668_v23, %s4233_s29  ;;  %v4922_v23 = vld [vmem:[#allocation2 + $0x188] sm:$0xff]  ;;  %4169 = vmatprep.subr.mxu1 %v3749_v59 }
 0x23d   : > { %v4898_v2 = vpop.permute.xlu1 %2957  ;;  %v1897_v3 = vpop.permute.xlu0 %1896  ;;  %4175 = vmatpush3.msra.mxu1 %v3749_v59  ;;  %4111 = vmatprep.subr.mxu0 %v3749_v59 }
 0x23e   : > { %v2013_v5 = vsel %vm1579_vm2, %v1981_v0, %v1897_v3  ;;  %4112 = vmatpush3.msra.mxu0 %v3749_v59 }
 0x23f   : > { %2849 = vrot.lane.b32.xlu1 %v1670_v57, %s4233_s29  ;;  %4015 = vmatmul.mubr.msk.f32.gmra.mxu1 %vm2041_vm7, %v2013_v5 }
 0x240   : > { %1788 = vrot.lane.b32.xlu0 %v1671_v8, %s4233_s29 }
 0x241   : > { %v1476_v9 = vpop.permute.xlu1 %1475  ;;  %v4904_v10 = vpop.permute.xlu0 %2831 }
 0x243   : > { %2977 = vrot.lane.b32.xlu1 %v1702_v62, %s4234_s30 }
 0x244   : > { %1916 = vrot.lane.b32.xlu0 %v2768_v47, %s4234_s30 }
 0x245   : > { %v4908_v11 = vpop.permute.xlu1 %2963 }
 0x246   : > { %v1350_v13 = vpop.permute.xlu0 %1349 }
 0x247   : > { %1495 = vrot.lane.b32.xlu1 %v1702_v62, %s4234_s30  ;;  %v1560_v27 = vsel %vm272_vm1, %v4893_v63, %v1350_v13 }
 0x248   : > { %2851 = vrot.lane.b32.xlu0 %v1671_v8, %s4233_s29 }
 0x249   : > { %v1771_v14 = vpop.permute.xlu1 %1770 }
 0x24a   : > { %v1478_v15 = vpop.permute.xlu0 %1477  ;;  %v1982_v19 = vsel %vm272_vm1, %v4916_v18, %v1771_v14 }
 0x24b   : > { %2983 = vrot.lane.b32.xlu1 %v4912_v16, %s4234_s30  ;;  %v1593_v30 = vsel %vm1579_vm2, %v1560_v27, %v1478_v15 }
 0x24c   : > { %1369 = vrot.lane.b32.xlu0 %v1671_v8, %s4233_s29  ;;  %v4979_v8 = vld [vmem:[#allocation2 + $0x1a8] sm:$0xff] }
 0x24d   : > { %v1899_v20 = vpop.permute.xlu1 %1898 }
 0x24e   : > { %v2014_v21 = vsel %vm1579_vm2, %v1982_v19, %v1899_v20  ;;  %v1348_v22 = vpop.permute.xlu0 %1347 }
 0x24f   : > { %v1559_v25 = vsel %vm272_vm1, %v4873_v40, %v1348_v22  ;;  %1790 = vrot.lane.b32.xlu1 %v4922_v23, %s4233_s29  ;;  %4017 = vmatprep.mubr.msk.f32.mxu1 %vm2041_vm7, %v2014_v21  ;;  %v4996_v21 = vld [vmem:[#allocation2 + $0x1a9] sm:$0xff] }
 0x250   : > { %1497 = vrot.lane.b32.xlu0 %v2768_v47, %s4234_s30  ;;  %v1592_v29 = vsel %vm1579_vm2, %v1559_v25, %v1476_v9  ;;  %v1673_v47 = vld [vmem:[#allocation2 + $0x190] sm:$0xff] }
 0x251   : > { %4077 = vmatprep.mubr.msk.f32.mxu0 %vm2041_vm7, %v1592_v29  ;;  %v4938_v32 = vpop.permute.xlu1 %2833  ;;  %v5011_v29 = vld [vmem:[#allocation2 + $0x1b0] sm:$0xff] }
 0x252   : > { %v1773_v34 = vpop.permute.xlu0 %1772  ;;  %4078 = vmatmul.mubr.msk.f32.gmra.mxu0 %vm2041_vm7, %v1593_v30  ;;  %v3748_v30 = vld [vmem:[%s5742_s4 + $0x70] sm:$0xff] }
 0x253   : > { %1918 = vrot.lane.b32.xlu1 %v1704_v35, %s4234_s30  ;;  %v1983_v42 = vsel %vm272_vm1, %v4943_v36, %v1773_v34  ;;  %4170 = vmatprep.subr.mxu1 %v3748_v30 }
 0x254   : > { %1367 = vrot.lane.b32.xlu0 %v1670_v57, %s4233_s29  ;;  %4113 = vmatprep.subr.mxu0 %v3748_v30 }
 0x255   : > { %v4945_v37 = vpop.permute.xlu1 %2961  ;;  %4176 = vmatpush3.msra.mxu1 %v3748_v30  ;;  %4114 = vmatpush3.msra.mxu0 %v3748_v30  ;;  %v3746_v30 = vld [vmem:[%s5742_s4 + $0x60] sm:$0xff] }
 0x256   : > { %v1901_v44 = vpop.permute.xlu0 %1900 }
 0x257   : > { %v2015_v46 = vsel %vm1579_vm2, %v1983_v42, %v1901_v44  ;;  %2853 = vrot.lane.b32.xlu1 %v4922_v23, %s4233_s29  ;;  %v5027_v44 = vld [vmem:[#allocation2 + $0x1c8] sm:$0xff] }
 0x258   : > { %1792 = vrot.lane.b32.xlu0 %v1673_v47, %s4233_s29  ;;  %4018 = vmatmul.mubr.msk.f32.gmra.mxu1 %vm2041_vm7, %v2015_v46  ;;  %v3747_v46 = vld [vmem:[%s5742_s4 + $0x68] sm:$0xff] }
 0x259   : > { %v1480_v51 = vpop.permute.xlu1 %1479  ;;  %4171 = vmatprep.subr.mxu1 %v3747_v46  ;;  %4115 = vmatprep.subr.mxu0 %v3747_v46 }
 0x25a   : > { %v4957_v52 = vpop.permute.xlu0 %2835  ;;  %4177 = vmatpush3.msra.mxu1 %v3747_v46  ;;  %4116 = vmatpush3.msra.mxu0 %v3747_v46 }
 0x25b   : > { %2981 = vrot.lane.b32.xlu1 %v1704_v35, %s4234_s30  ;;  %4172 = vmatprep.subr.mxu1 %v3746_v30 }
 0x25c   : > { %1920 = vrot.lane.b32.xlu0 %v4912_v16, %s4234_s30  ;;  %4178 = vmatpush3.msra.mxu1 %v3746_v30 }
 0x25d   : > { %v4962_v53 = vpop.permute.xlu1 %2967  ;;  %4117 = vmatprep.subr.mxu0 %v3746_v30 }
 0x25e   : > { %v1354_v54 = vpop.permute.xlu0 %1353  ;;  %4118 = vmatpush3.msra.mxu0 %v3746_v30  ;;  %v5098_v30 = vld [vmem:[#allocation2 + $0x208] sm:$0xff] }
 0x25f   : > { %1499 = vrot.lane.b32.xlu1 %v1704_v35, %s4234_s30  ;;  %v1562_v13 = vsel %vm272_vm1, %v4943_v36, %v1354_v54  ;;  %v5040_v54 = vld [vmem:[#allocation2 + $0x1d0] sm:$0xff] }
 0x260   : > { %2855 = vrot.lane.b32.xlu0 %v1673_v47, %s4233_s29 }
 0x261   : > { %v1775_v57 = vpop.permute.xlu1 %1774 }
 0x262   : > { %v1482_v55 = vpop.permute.xlu0 %1481  ;;  %v1984_v62 = vsel %vm272_vm1, %v4973_v61, %v1775_v57  ;;  %v1634_v57 = vld [vmem:[#allocation2 + $0x127] sm:$0xff] }
 0x263   : > { %2987 = vrot.lane.b32.xlu1 %v4966_v58, %s4234_s30  ;;  %v1595_v15 = vsel %vm1579_vm2, %v1562_v13, %v1482_v55 }
 0x264   : > { %1373 = vrot.lane.b32.xlu0 %v1673_v47, %s4233_s29 }
 0x265   : > { %v1903_v0 = vpop.permute.xlu1 %1902 }
 0x266   : > { %v2016_v3 = vsel %vm1579_vm2, %v1984_v62, %v1903_v0  ;;  %v1352_v5 = vpop.permute.xlu0 %1351 }
 0x267   : > { %v1561_v9 = vsel %vm272_vm1, %v4916_v18, %v1352_v5  ;;  %1794 = vrot.lane.b32.xlu1 %v4979_v8, %s4233_s29  ;;  %4020 = vmatprep.mubr.msk.f32.mxu1 %vm2041_vm7, %v2016_v3  ;;  %v5046_v3 = vld [vmem:[#allocation2 + $0x1f1] sm:$0xff] }
 0x268   : > { %1501 = vrot.lane.b32.xlu0 %v4912_v16, %s4234_s30  ;;  %v1594_v14 = vsel %vm1579_vm2, %v1561_v9, %v1480_v51  ;;  %v5002_v16 = vld [vmem:[#allocation2 + $0x10f] sm:$0xff] }
 0x269   : > { %4080 = vmatprep.mubr.msk.f32.mxu0 %vm2041_vm7, %v1594_v14  ;;  %v4993_v19 = vpop.permute.xlu1 %2837  ;;  %v5036_v51 = vld [vmem:[#allocation2 + $0x1c9] sm:$0xff]  ;;  %v5052_v9 = vld [vmem:[#allocation2 + $0x1d1] sm:$0xff] }
 0x26a   : > { %v1777_v20 = vpop.permute.xlu0 %1776  ;;  %4081 = vmatmul.mubr.msk.f32.gmra.mxu0 %vm2041_vm7, %v1595_v15 }
 0x26b   : > { %1922 = vrot.lane.b32.xlu1 %v4996_v21, %s4234_s30  ;;  %v1985_v25 = vsel %vm272_vm1, %v5002_v16, %v1777_v20 }
 0x26c   : > { %1371 = vrot.lane.b32.xlu0 %v4922_v23, %s4233_s29 }
 0x26d   : > { %v5004_v22 = vpop.permute.xlu1 %2965 }
 0x26e   : > { %v1905_v26 = vpop.permute.xlu0 %1904 }
 0x26f   : > { %v2017_v27 = vsel %vm1579_vm2, %v1985_v25, %v1905_v26  ;;  %2857 = vrot.lane.b32.xlu1 %v4979_v8, %s4233_s29  ;;  %v5063_v26 = vld [vmem:[#allocation2 + $0x1e8] sm:$0xff] }
 0x270   : > { %1796 = vrot.lane.b32.xlu0 %v5011_v29, %s4233_s29  ;;  %4021 = vmatmul.mubr.msk.f32.gmra.mxu1 %vm2041_vm7, %v2017_v27  ;;  %v5067_v27 = vld [vmem:[#allocation2 + $0x1f0] sm:$0xff] }
 0x271   : > { %v1484_v23 = vpop.permute.xlu1 %1483 }
 0x272   : > { %v5019_v34 = vpop.permute.xlu0 %2839 }
 0x273   : > { %2985 = vrot.lane.b32.xlu1 %v4996_v21, %s4234_s30 }
 0x274   : > { %1924 = vrot.lane.b32.xlu0 %v4966_v58, %s4234_s30 }
 0x275   : > { %v5025_v35 = vpop.permute.xlu1 %2971 }
 0x276   : > { %5745 = vst [vmem:[#allocation3_spill] sm:$0xff] %v5025_v35  ;;  %v1358_v42 = vpop.permute.xlu0 %1357 }
 0x277   : > { %1798 = vrot.lane.b32.xlu1 %v5027_v44, %s4233_s29  ;;  %v1564_v13 = vsel %vm272_vm1, %v5002_v16, %v1358_v42  ;;  %v1635_v42 = vld [vmem:[#allocation2 + $0x12f] sm:$0xff] }
 0x278   : > { %2859 = vrot.lane.b32.xlu0 %v5011_v29, %s4233_s29 }
 0x279   : > { %v1779_v47 = vpop.permute.xlu1 %1778 }
 0x27a   : > { %v1486_v48 = vpop.permute.xlu0 %1485  ;;  %v1986_v55 = vsel %vm272_vm1, %v1634_v57, %v1779_v47 }
 0x27b   : > { %1926 = vrot.lane.b32.xlu1 %v5036_v51, %s4234_s30  ;;  %v1597_v15 = vsel %vm1579_vm2, %v1564_v13, %v1486_v48 }
 0x27c   : > { %1800 = vrot.lane.b32.xlu0 %v5040_v54, %s4233_s29 }
 0x27d   : > { %v1907_v59 = vpop.permute.xlu1 %1906 }
 0x27e   : > { %v2018_v62 = vsel %vm1579_vm2, %v1986_v55, %v1907_v59  ;;  %v1356_v0 = vpop.permute.xlu0 %1355  ;;  %v5079_v59 = vld [vmem:[#allocation2 + $0x1e9] sm:$0xff] }
 0x27f   : > { %v1563_v5 = vsel %vm272_vm1, %v4973_v61, %v1356_v0  ;;  %1932 = vrot.lane.b32.xlu1 %v5046_v3, %s4234_s30  ;;  %4023 = vmatprep.mubr.msk.f32.mxu1 %vm2041_vm7, %v2018_v62  ;;  %v5084_v0 = vld [vmem:[#allocation2 + $0x210] sm:$0xff] }
 0x280   : > { %1928 = vrot.lane.b32.xlu0 %v5052_v9, %s4234_s30  ;;  %v1596_v14 = vsel %vm1579_vm2, %v1563_v5, %v1484_v23 }
 0x281   : > { %4083 = vmatprep.mubr.msk.f32.mxu0 %vm2041_vm7, %v1596_v14  ;;  %v2842_v20 = vpop.permute.xlu1 %2841  ;;  %v5089_v14 = vld [vmem:[#allocation2 + $0x211] sm:$0xff] }
 0x282   : > { %v1781_v25 = vpop.permute.xlu0 %1780  ;;  %4084 = vmatmul.mubr.msk.f32.gmra.mxu0 %vm2041_vm7, %v1597_v15  ;;  %v3051_v23 = vsel %vm272_vm1, %v1634_v57, %v2842_v20 }
 0x283   : > { %1802 = vrot.lane.b32.xlu1 %v5063_v26, %s4233_s29  ;;  %v1987_v47 = vsel %vm272_vm1, %v1635_v42, %v1781_v25 }
 0x284   : > { %1804 = vrot.lane.b32.xlu0 %v5067_v27, %s4233_s29 }
 0x285   : > { %v2970_v46 = vpop.permute.xlu1 %2969 }
 0x286   : > { %v5077_v48 = vsel %vm1579_vm2, %v3051_v23, %v2970_v46  ;;  %v1909_v55 = vpop.permute.xlu0 %1908 }
 0x287   : > { %5746 = vst [vmem:[#allocation4_spill] sm:$0xff] %v5077_v48  ;;  %v2019_v62 = vsel %vm1579_vm2, %v1987_v47, %v1909_v55  ;;  %1930 = vrot.lane.b32.xlu1 %v5079_v59, %s4234_s30  ;;  %v5104_v47 = vld [vmem:[#allocation2 + $0x209] sm:$0xff] }
 0x288   : > { %1808 = vrot.lane.b32.xlu0 %v5084_v0, %s4233_s29  ;;  %4024 = vmatmul.mubr.msk.f32.gmra.mxu1 %vm2041_vm7, %v2019_v62  ;;  %v1636_v55 = vld [vmem:[#allocation2 + $0x147] sm:$0xff] }
 0x289   : > { %v1488_v5 = vpop.permute.xlu1 %1487 }
 0x28a   : > { %v2844_v13 = vpop.permute.xlu0 %2843 }
 0x28b   : > { %v5092_v15 = vsel %vm272_vm1, %v1635_v42, %v2844_v13  ;;  %1936 = vrot.lane.b32.xlu1 %v5089_v14, %s4234_s30 }
 0x28c   : > { %5747 = vst [vmem:[#allocation5_spill] sm:$0xff] %v5092_v15  ;;  %1375 = vrot.lane.b32.xlu0 %v4979_v8, %s4233_s29 }
 0x28d   : > { %v2976_v20 = vpop.permute.xlu1 %2975 }
 0x28e   : > { %v1362_v25 = vpop.permute.xlu0 %1361 }
 0x28f   : > { %1806 = vrot.lane.b32.xlu1 %v5098_v30, %s4233_s29 }
 0x290   : > { %1377 = vrot.lane.b32.xlu0 %v5011_v29, %s4233_s29  ;;  %v1566_v29 = vsel %vm272_vm1, %v1635_v42, %v1362_v25  ;;  %v1637_v42 = vld [vmem:[#allocation2 + $0x14f] sm:$0xff] }
 0x291   : > { %v1783_v23 = vpop.permute.xlu1 %1782 }
 0x292   : > { %v1490_v46 = vpop.permute.xlu0 %1489  ;;  %v1988_v8 = vsel %vm272_vm1, %v1636_v55, %v1783_v23 }
 0x293   : > { %1934 = vrot.lane.b32.xlu1 %v5104_v47, %s4234_s30  ;;  %v1599_v23 = vsel %vm1579_vm2, %v1566_v29, %v1490_v46 }
 0x294   : > { %2863 = vrot.lane.b32.xlu0 %v5040_v54, %s4233_s29 }
 0x295   : > { %v1911_v62 = vpop.permute.xlu1 %1910 }
 0x296   : > { %v2020_v13 = vsel %vm1579_vm2, %v1988_v8, %v1911_v62  ;;  %v1360_v15 = vpop.permute.xlu0 %1359 }
 0x297   : > { %v1565_v35 = vsel %vm272_vm1, %v1634_v57, %v1360_v15  ;;  %2861 = vrot.lane.b32.xlu1 %v5027_v44, %s4233_s29  ;;  %4026 = vmatprep.mubr.msk.f32.mxu1 %vm2041_vm7, %v2020_v13 }
 0x298   : > { %1505 = vrot.lane.b32.xlu0 %v4966_v58, %s4234_s30  ;;  %v1598_v48 = vsel %vm1579_vm2, %v1565_v35, %v1488_v5 }
 0x299   : > { %4086 = vmatprep.mubr.msk.f32.mxu0 %vm2041_vm7, %v1598_v48  ;;  %v2846_v8 = vpop.permute.xlu1 %2845 }
 0x29a   : > { %v3053_v62 = vsel %vm272_vm1, %v1636_v55, %v2846_v8  ;;  %v1785_v57 = vpop.permute.xlu0 %1784  ;;  %4087 = vmatmul.mubr.msk.f32.gmra.mxu0 %vm2041_vm7, %v1599_v23  ;;  %v1638_v8 = vld [vmem:[#allocation2 + $0x167] sm:$0xff] }
 0x29b   : > { %1503 = vrot.lane.b32.xlu1 %v4996_v21, %s4234_s30  ;;  %v1989_v35 = vsel %vm272_vm1, %v1637_v42, %v1785_v57 }
 0x29c   : > { %1379 = vrot.lane.b32.xlu0 %v5027_v44, %s4233_s29 }
 0x29d   : > { %v2974_v58 = vpop.permute.xlu1 %2973 }
 0x29e   : > { %v5130_v5 = vsel %vm1579_vm2, %v3053_v62, %v2974_v58  ;;  %v1913_v48 = vpop.permute.xlu0 %1912 }
 0x29f   : > { %v2021_v15 = vsel %vm1579_vm2, %v1989_v35, %v1913_v48  ;;  %2989 = vrot.lane.b32.xlu1 %v5036_v51, %s4234_s30 }
 0x2a0   : > { %1381 = vrot.lane.b32.xlu0 %v5040_v54, %s4233_s29  ;;  %4027 = vmatmul.mubr.msk.f32.gmra.mxu1 %vm2041_vm7, %v2021_v15 }
 0x2a1   : > { %v1492_v21 = vpop.permute.xlu1 %1491 }
 0x2a2   : > { %v2848_v44 = vpop.permute.xlu0 %2847 }
 0x2a3   : > { %v3054_v25 = vsel %vm272_vm1, %v1637_v42, %v2848_v44  ;;  %2991 = vrot.lane.b32.xlu1 %v5052_v9, %s4234_s30 }
 0x2a4   : > { %2867 = vrot.lane.b32.xlu0 %v5067_v27, %s4233_s29  ;;  %v5144_v46 = vsel %vm1579_vm2, %v3054_v25, %v2976_v20 }
 0x2a5   : > { %v2980_v13 = vpop.permute.xlu1 %2979 }
 0x2a6   : > { %v1366_v29 = vpop.permute.xlu0 %1365 }
 0x2a7   : > { %2865 = vrot.lane.b32.xlu1 %v5063_v26, %s4233_s29 }
 0x2a8   : > { %1509 = vrot.lane.b32.xlu0 %v5052_v9, %s4234_s30  ;;  %v1568_v9 = vsel %vm272_vm1, %v1637_v42, %v1366_v29  ;;  %v1639_v42 = vld [vmem:[#allocation2 + $0x16f] sm:$0xff] }
 0x2a9   : > { %v1787_v54 = vpop.permute.xlu1 %1786 }
 0x2aa   : > { %v1494_v23 = vpop.permute.xlu0 %1493  ;;  %v1990_v20 = vsel %vm272_vm1, %v1638_v8, %v1787_v54 }
 0x2ab   : > { %1507 = vrot.lane.b32.xlu1 %v5036_v51, %s4234_s30 }
 0x2ac   : > { %1383 = vrot.lane.b32.xlu0 %v5063_v26, %s4233_s29  ;;  %v1601_v26 = vsel %vm1579_vm2, %v1568_v9, %v1494_v23  ;;  %v1640_v9 = vld [vmem:[#allocation2 + $0x187] sm:$0xff] }
 0x2ad   : > { %v1915_v62 = vpop.permute.xlu1 %1914 }
 0x2ae   : > { %v2022_v57 = vsel %vm1579_vm2, %v1990_v20, %v1915_v62  ;;  %v1364_v58 = vpop.permute.xlu0 %1363  ;;  %v2717_v20 = vld [vmem:[#allocation2 + $0x48] sm:$0xff] }
 0x2af   : > { %v1567_v35 = vsel %vm272_vm1, %v1636_v55, %v1364_v58  ;;  %2993 = vrot.lane.b32.xlu1 %v5079_v59, %s4234_s30  ;;  %4029 = vmatprep.mubr.msk.f32.mxu1 %vm2041_vm7, %v2022_v57 }
 0x2b0   : > { %1385 = vrot.lane.b32.xlu0 %v5067_v27, %s4233_s29  ;;  %v1600_v51 = vsel %vm1579_vm2, %v1567_v35, %v1492_v21 }
 0x2b1   : > { %4089 = vmatprep.mubr.msk.f32.mxu0 %vm2041_vm7, %v1600_v51  ;;  %v2850_v48 = vpop.permute.xlu1 %2849  ;;  %v2747_v51 = vld [vmem:[#allocation2 + $0x228] sm:$0xff] }
 0x2b2   : > { %v3055_v15 = vsel %vm272_vm1, %v1638_v8, %v2850_v48  ;;  %v1789_v55 = vpop.permute.xlu0 %1788  ;;  %4090 = vmatmul.mubr.msk.f32.gmra.mxu0 %vm2041_vm7, %v1601_v26 }
 0x2b3   : > { %2995 = vrot.lane.b32.xlu1 %v5046_v3, %s4234_s30  ;;  %v1991_v21 = vsel %vm272_vm1, %v1639_v42, %v1789_v55  ;;  %v2750_v55 = vld [vmem:[#allocation2 + $0x51] sm:$0xff] }
 0x2b4   : > { %2871 = vrot.lane.b32.xlu0 %v5084_v0, %s4233_s29 }
 0x2b5   : > { %v2978_v27 = vpop.permute.xlu1 %2977 }
 0x2b6   : > { %v5174_v44 = vsel %vm1579_vm2, %v3055_v15, %v2978_v27  ;;  %v1917_v25 = vpop.permute.xlu0 %1916 }
 0x2b7   : > { %v2023_v29 = vsel %vm1579_vm2, %v1991_v21, %v1917_v25  ;;  %2869 = vrot.lane.b32.xlu1 %v5098_v30, %s4233_s29  ;;  %v2748_v21 = vld [vmem:[#allocation2 + $0x230] sm:$0xff] }
 0x2b8   : > { %1513 = vrot.lane.b32.xlu0 %v5046_v3, %s4234_s30  ;;  %4030 = vmatmul.mubr.msk.f32.gmra.mxu1 %vm2041_vm7, %v2023_v29  ;;  %v2718_v3 = vld [vmem:[#allocation2 + $0x50] sm:$0xff] }
 0x2b9   : > { %v1496_v54 = vpop.permute.xlu1 %1495 }
 0x2ba   : > { %v2852_v0 = vpop.permute.xlu0 %2851 }
 0x2bb   : > { %v3056_v23 = vsel %vm272_vm1, %v1639_v42, %v2852_v0  ;;  %1511 = vrot.lane.b32.xlu1 %v5079_v59, %s4234_s30  ;;  %v2749_v59 = vld [vmem:[#allocation2 + $0x49] sm:$0xff] }
 0x2bc   : > { %2813 = vrot.lane.b32.xlu0 %v2717_v20, %s4233_s29  ;;  %v5187_v62 = vsel %vm1579_vm2, %v3056_v23, %v2980_v13  ;;  %v2779_v23 = vld [vmem:[#allocation2 + $0x229] sm:$0xff] }
 0x2bd   : > { %v2984_v57 = vpop.permute.xlu1 %2983  ;;  %v1641_v20 = vld [vmem:[#allocation2 + $0x18f] sm:$0xff] }
 0x2be   : > { %v1370_v30 = vpop.permute.xlu0 %1369 }
 0x2bf   : > { %2997 = vrot.lane.b32.xlu1 %v5104_v47, %s4234_s30 }
 0x2c0   : > { %2815 = vrot.lane.b32.xlu0 %v2718_v3, %s4233_s29 }
 0x2c1   : > { %v1791_v58 = vpop.permute.xlu1 %1790 }
 0x2c2   : > { %v1498_v35 = vpop.permute.xlu0 %1497  ;;  %v1992_v13 = vsel %vm272_vm1, %v1640_v9, %v1791_v58 }
 0x2c3   : > { %2999 = vrot.lane.b32.xlu1 %v5089_v14, %s4234_s30  ;;  %v1570_v14 = vsel %vm272_vm1, %v1639_v42, %v1370_v30 }
 0x2c4   : > { %2941 = vrot.lane.b32.xlu0 %v2749_v59, %s4234_s30  ;;  %v1603_v25 = vsel %vm1579_vm2, %v1570_v14, %v1498_v35  ;;  %v2780_v35 = vld [vmem:[#allocation2 + $0x231] sm:$0xff]  ;;  %v5220_v14 = vld [vmem:[#allocation2 + $0x1a7] sm:$0xff] }
 0x2c5   : > { %v1919_v26 = vpop.permute.xlu1 %1918 }
 0x2c6   : > { %v2024_v48 = vsel %vm1579_vm2, %v1992_v13, %v1919_v26  ;;  %v1368_v15 = vpop.permute.xlu0 %1367 }
 0x2c7   : > { %v1569_v47 = vsel %vm272_vm1, %v1638_v8, %v1368_v15  ;;  %2873 = vrot.lane.b32.xlu1 %v2747_v51, %s4233_s29  ;;  %4032 = vmatprep.mubr.msk.f32.mxu1 %vm2041_vm7, %v2024_v48 }
 0x2c8   : > { %2943 = vrot.lane.b32.xlu0 %v2750_v55, %s4234_s30  ;;  %v1602_v27 = vsel %vm1579_vm2, %v1569_v47, %v1496_v54 }
 0x2c9   : > { %4092 = vmatprep.mubr.msk.f32.mxu0 %vm2041_vm7, %v1602_v27  ;;  %v2854_v29 = vpop.permute.xlu1 %2853 }
 0x2ca   : > { %v3057_v0 = vsel %vm272_vm1, %v1640_v9, %v2854_v29  ;;  %v1793_v8 = vpop.permute.xlu0 %1792  ;;  %4093 = vmatmul.mubr.msk.f32.gmra.mxu0 %vm2041_vm7, %v1603_v25 }
 0x2cb   : > { %2875 = vrot.lane.b32.xlu1 %v2748_v21, %s4233_s29  ;;  %v1993_v30 = vsel %vm272_vm1, %v1641_v20, %v1793_v8 }
 0x2cd   : > { %v2982_v42 = vpop.permute.xlu1 %2981 }
 0x2ce   : > { %v5210_v54 = vsel %vm1579_vm2, %v3057_v0, %v2982_v42  ;;  %v1921_v3 = vpop.permute.xlu0 %1920 }
 0x2cf   : > { %v2025_v58 = vsel %vm1579_vm2, %v1993_v30, %v1921_v3  ;;  %3001 = vrot.lane.b32.xlu1 %v2779_v23, %s4234_s30 }
 0x2d0   : > { %4033 = vmatmul.mubr.msk.f32.gmra.mxu1 %vm2041_vm7, %v2025_v58  ;;  %v5234_v58 = vld [vmem:[#allocation2 + $0x1af] sm:$0xff] }
 0x2d1   : > { %v1500_v59 = vpop.permute.xlu1 %1499 }
 0x2d2   : > { %v2856_v51 = vpop.permute.xlu0 %2855 }
 0x2d3   : > { %v3058_v13 = vsel %vm272_vm1, %v1641_v20, %v2856_v51  ;;  %3003 = vrot.lane.b32.xlu1 %v2780_v35, %s4234_s30 }
 0x2d4   : > { %v5218_v26 = vsel %vm1579_vm2, %v3058_v13, %v2984_v57 }
 0x2d5   : > { %v2988_v48 = vpop.permute.xlu1 %2987 }
 0x2d6   : > { %v1374_v15 = vpop.permute.xlu0 %1373 }
 0x2d7   : > { %v1572_v57 = vsel %vm272_vm1, %v1641_v20, %v1374_v15 }
 0x2d9   : > { %v1795_v47 = vpop.permute.xlu1 %1794 }
 0x2da   : > { %v1502_v55 = vpop.permute.xlu0 %1501  ;;  %v1994_v27 = vsel %vm272_vm1, %v5220_v14, %v1795_v47 }
 0x2db   : > { %v1605_v23 = vsel %vm1579_vm2, %v1572_v57, %v1502_v55  ;;  %v5245_v55 = vld [vmem:[#allocation2 + $0x1c7] sm:$0xff]  ;;  %v5254_v57 = vld [vmem:[#allocation2 + $0x1cf] sm:$0xff] }
 0x2dd   : > { %v1923_v21 = vpop.permute.xlu1 %1922 }
 0x2de   : > { %v2026_v25 = vsel %vm1579_vm2, %v1994_v27, %v1923_v21  ;;  %v1372_v29 = vpop.permute.xlu0 %1371 }
 0x2df   : > { %v1571_v0 = vsel %vm272_vm1, %v1640_v9, %v1372_v29  ;;  %4035 = vmatprep.mubr.msk.f32.mxu1 %vm2041_vm7, %v2026_v25 }
 0x2e0   : > { %v1604_v8 = vsel %vm1579_vm2, %v1571_v0, %v1500_v59 }
 0x2e1   : > { %4095 = vmatprep.mubr.msk.f32.mxu0 %vm2041_vm7, %v1604_v8  ;;  %v2858_v42 = vpop.permute.xlu1 %2857 }
 0x2e2   : > { %v3059_v30 = vsel %vm272_vm1, %v5220_v14, %v2858_v42  ;;  %v1797_v3 = vpop.permute.xlu0 %1796  ;;  %4096 = vmatmul.mubr.msk.f32.gmra.mxu0 %vm2041_vm7, %v1605_v23 }
 0x2e3   : > { %v1995_v35 = vsel %vm272_vm1, %v5234_v58, %v1797_v3 }
 0x2e5   : > { %v2986_v9 = vpop.permute.xlu1 %2985 }
 0x2e6   : > { %v5239_v20 = vsel %vm1579_vm2, %v3059_v30, %v2986_v9  ;;  %v1925_v59 = vpop.permute.xlu0 %1924  ;;  %v5260_v9 = vld [vmem:[#allocation2 + $0x1ef] sm:$0xff] }
 0x2e7   : > { %v2027_v51 = vsel %vm1579_vm2, %v1995_v35, %v1925_v59  ;;  %v5262_v35 = vld [vmem:[#allocation2 + $0x1e7] sm:$0xff] }
 0x2e8   : > { %4036 = vmatmul.mubr.msk.f32.gmra.mxu1 %vm2041_vm7, %v2027_v51 }
 0x2e9   : > { %v1799_v13 = vpop.permute.xlu1 %1798 }
 0x2ea   : > { %v2860_v15 = vpop.permute.xlu0 %2859  ;;  %v1996_v21 = vsel %vm272_vm1, %v5245_v55, %v1799_v13 }
 0x2eb   : > { %v3060_v47 = vsel %vm272_vm1, %v5234_v58, %v2860_v15 }
 0x2ec   : > { %v5248_v27 = vsel %vm1579_vm2, %v3060_v47, %v2988_v48 }
 0x2ed   : > { %5748 = vst [vmem:[#allocation6_spill] sm:$0xff] %v5248_v27  ;;  %v1927_v25 = vpop.permute.xlu1 %1926 }
 0x2ee   : > { %v2028_v29 = vsel %vm1579_vm2, %v1996_v21, %v1927_v25  ;;  %v1801_v0 = vpop.permute.xlu0 %1800 }
 0x2ef   : > { %4038 = vmatprep.mubr.msk.f32.mxu1 %vm2041_vm7, %v2028_v29  ;;  %v1997_v23 = vsel %vm272_vm1, %v5254_v57, %v1801_v0 }
 0x2f1   : > { %v1933_v8 = vpop.permute.xlu1 %1932 }
 0x2f2   : > { %v1929_v42 = vpop.permute.xlu0 %1928 }
 0x2f3   : > { %v2029_v30 = vsel %vm1579_vm2, %v1997_v23, %v1929_v42  ;;  %v5272_v42 = vld [vmem:[#allocation2 + $0x207] sm:$0xff] }
 0x2f4   : > { %4039 = vmatmul.mubr.msk.f32.gmra.mxu1 %vm2041_vm7, %v2029_v30  ;;  %v5274_v30 = vld [vmem:[#allocation2 + $0x20f] sm:$0xff] }
 0x2f5   : > { %v1803_v48 = vpop.permute.xlu1 %1802 }
 0x2f6   : > { %v1805_v3 = vpop.permute.xlu0 %1804  ;;  %v1998_v51 = vsel %vm272_vm1, %v5262_v35, %v1803_v48 }
 0x2f7   : > { %v1999_v59 = vsel %vm272_vm1, %v5260_v9, %v1805_v3 }
 0x2f8   : > { %v2031_v21 = vsel %vm1579_vm2, %v1999_v59, %v1933_v8  ;;  %v4191_v59 = vld [vmem:[#allocation2 + $0x67] sm:$0xff] }
 0x2f9   : > { %v1931_v13 = vpop.permute.xlu1 %1930 }
 0x2fa   : > { %v2030_v15 = vsel %vm1579_vm2, %v1998_v51, %v1931_v13  ;;  %v1809_v47 = vpop.permute.xlu0 %1808 }
 0x2fb   : > { %4041 = vmatprep.mubr.msk.f32.mxu1 %vm2041_vm7, %v2030_v15  ;;  %v2001_v51 = vsel %vm272_vm1, %v5274_v30, %v1809_v47  ;;  %v3039_v15 = vsel %vm272_vm1, %v4191_v59, %v4770_v39  ;;  %v5751_v59 = vld [vmem:[#allocation5_spill] sm:$0xff] }
 0x2fc   : > { %4042 = vmatmul.mubr.msk.f32.gmra.mxu1 %vm2041_vm7, %v2031_v21  ;;  %v3071_v27 = vsel %vm1579_vm2, %v3039_v15, %v4779_v45 }
 0x2fd   : > { %v1937_v25 = vpop.permute.xlu1 %1936 }
 0x2fe   : > { %v1376_v29 = vpop.permute.xlu0 %1375  ;;  %v2033_v21 = vsel %vm1579_vm2, %v2001_v51, %v1937_v25  ;;  %v3041_v25 = vsel %vm272_vm1, %v4794_v56, %v4809_v1 }
 0x2ff   : > { %v3073_v45 = vsel %vm1579_vm2, %v3041_v25, %v4818_v7  ;;  %v3043_v7 = vsel %vm272_vm1, %v4833_v17, %v4849_v28 }
 0x301   : > { %v1807_v0 = vpop.permute.xlu1 %1806 }
 0x302   : > { %v1378_v23 = vpop.permute.xlu0 %1377  ;;  %v2000_v48 = vsel %vm272_vm1, %v5272_v42, %v1807_v0  ;;  %v3040_v0 = vsel %vm272_vm1, %v4774_v43, %v4785_v49  ;;  %v3042_v43 = vsel %vm272_vm1, %v4813_v4, %v4824_v6  ;;  %v1573_v49 = vsel %vm272_vm1, %v5220_v14, %v1376_v29 }
 0x303   : > { %v3072_v39 = vsel %vm1579_vm2, %v3040_v0, %v4754_v24  ;;  %v1574_v24 = vsel %vm272_vm1, %v5234_v58, %v1378_v23  ;;  %v3074_v6 = vsel %vm1579_vm2, %v3042_v43, %v4789_v50  ;;  %v3075_v14 = vsel %vm1579_vm2, %v3043_v7, %v4858_v33 }
 0x304   : > { %v3044_v58 = vsel %vm272_vm1, %v4853_v31, %v4864_v38  ;;  %v3045_v50 = vsel %vm272_vm1, %v4873_v40, %v4889_v60  ;;  %v3046_v31 = vsel %vm272_vm1, %v4893_v63, %v4904_v10  ;;  %v3047_v40 = vsel %vm272_vm1, %v4916_v18, %v4938_v32 }
 0x305   : > { %v1935_v3 = vpop.permute.xlu1 %1934  ;;  %v3076_v28 = vsel %vm1579_vm2, %v3044_v58, %v4828_v12  ;;  %v3077_v33 = vsel %vm1579_vm2, %v3045_v50, %v4898_v2  ;;  %v3078_v12 = vsel %vm1579_vm2, %v3046_v31, %v4868_v41  ;;  %v3079_v60 = vsel %vm1579_vm2, %v3047_v40, %v4945_v37 }
 0x306   : > { %v2032_v13 = vsel %vm1579_vm2, %v2000_v48, %v1935_v3  ;;  %v5281_v8 = vpop.permute.xlu0 %2863  ;;  %v3048_v63 = vsel %vm272_vm1, %v4943_v36, %v4957_v52  ;;  %v3049_v18 = vsel %vm272_vm1, %v4973_v61, %v4993_v19  ;;  %v3050_v36 = vsel %vm272_vm1, %v5002_v16, %v5019_v34  ;;  %v5749_v3 = vld [vmem:[#allocation4_spill] sm:$0xff] }
 0x307   : > { %4044 = vmatprep.mubr.msk.f32.mxu1 %vm2041_vm7, %v2032_v13  ;;  %v3080_v41 = vsel %vm1579_vm2, %v3048_v63, %v4908_v11  ;;  %v3081_v32 = vsel %vm1579_vm2, %v3049_v18, %v5004_v22  ;;  %v3082_v16 = vsel %vm1579_vm2, %v3050_v36, %v4962_v53  ;;  %v5750_v13 = vld [vmem:[#allocation3_spill] sm:$0xff] }
 0x308   : > { %4045 = vmatmul.mubr.msk.f32.gmra.mxu1 %vm2041_vm7, %v2033_v21  ;;  %v3084_v15 = vsel %vm1579_vm2, %v5751_v59, %v5750_v13 }
 0x309   : > { %v5293_v47 = vpop.permute.xlu1 %2861  ;;  %4122 = vmatprep.mubr.msk.f32.mxu1 %vm2041_vm7, %v3071_v27 }
 0x30a   : > { %v1506_v48 = vpop.permute.xlu0 %1505 }
 0x30b   : > { %v1607_v4 = vsel %vm1579_vm2, %v1574_v24, %v1506_v48  ;;  %v2685_v24 = vld [vmem:[#allocation2 + $0x47] sm:$0xff] }
 0x30c   : > { %4123 = vmatmul.mubr.msk.f32.vlgmr.msra.gmra.mxu1 %vm2041_vm7, %v3072_v39 }
 0x30d   : > { %v1504_v27 = vpop.permute.xlu1 %1503  ;;  %4125 = vmatprep.mubr.msk.f32.mxu1 %vm2041_vm7, %v3073_v45 }
 0x30e   : > { %v1606_v56 = vsel %vm1579_vm2, %v1573_v49, %v1504_v27  ;;  %v1380_v1 = vpop.permute.xlu0 %1379  ;;  %v5752_v27 = vld [vmem:[#allocation6_spill] sm:$0xff] }
 0x30f   : > { %4098 = vmatprep.mubr.msk.f32.mxu0 %vm2041_vm7, %v1606_v56  ;;  %v1575_v37 = vsel %vm272_vm1, %v5245_v55, %v1380_v1 }
 0x310   : > { %4099 = vmatmul.mubr.msk.f32.gmra.mxu0 %vm2041_vm7, %v1607_v4  ;;  %4126 = vmatmul.mubr.msk.f32.gmra.mxu1 %vm2041_vm7, %v3074_v6  ;;  %v2686_v6 = vld [vmem:[#allocation2 + $0x4f] sm:$0xff] }
 0x311   : > { %v5327_v29 = vpop.permute.xlu1 %2989  ;;  %4128 = vmatprep.mubr.msk.f32.mxu1 %vm2041_vm7, %v3075_v14 }
 0x312   : > { %v1382_v17 = vpop.permute.xlu0 %1381 }
 0x313   : > { %v1576_v61 = vsel %vm272_vm1, %v5254_v57, %v1382_v17 }
 0x314   : > { %4129 = vmatmul.mubr.msk.f32.gmra.mxu1 %vm2041_vm7, %v3076_v28 }
 0x315   : > { %v5341_v38 = vpop.permute.xlu1 %2991  ;;  %4131 = vmatprep.mubr.msk.f32.mxu1 %vm2041_vm7, %v3077_v33  ;;  %v2715_v33 = vld [vmem:[#allocation2 + $0x227] sm:$0xff] }
 0x316   : > { %v5344_v23 = vpop.permute.xlu0 %2867 }
 0x318   : > { %4132 = vmatmul.mubr.msk.f32.gmra.mxu1 %vm2041_vm7, %v3078_v12 }
 0x319   : > { %v2866_v2 = vpop.permute.xlu1 %2865  ;;  %4134 = vmatprep.mubr.msk.f32.mxu1 %vm2041_vm7, %v3079_v60 }
 0x31a   : > { %v1510_v10 = vpop.permute.xlu0 %1509 }
 0x31b   : > { %v1609_v22 = vsel %vm1579_vm2, %v1576_v61, %v1510_v10 }
 0x31c   : > { %4135 = vmatmul.mubr.msk.f32.gmra.mxu1 %vm2041_vm7, %v3080_v41 }
 0x31d   : > { %v1508_v52 = vpop.permute.xlu1 %1507  ;;  %4137 = vmatprep.mubr.msk.f32.mxu1 %vm2041_vm7, %v3081_v32 }
 0x31e   : > { %v1608_v11 = vsel %vm1579_vm2, %v1575_v37, %v1508_v52  ;;  %v1384_v19 = vpop.permute.xlu0 %1383 }
 0x31f   : > { %4101 = vmatprep.mubr.msk.f32.mxu0 %vm2041_vm7, %v1608_v11  ;;  %v1577_v39 = vsel %vm272_vm1, %v5262_v35, %v1384_v19 }
 0x320   : > { %4102 = vmatmul.mubr.msk.f32.gmra.mxu0 %vm2041_vm7, %v1609_v22  ;;  %4138 = vmatmul.mubr.msk.f32.gmra.mxu1 %vm2041_vm7, %v3082_v16 }
 0x321   : > { %v2994_v34 = vpop.permute.xlu1 %2993  ;;  %4140 = vmatprep.mubr.msk.f32.mxu1 %vm2041_vm7, %v5749_v3  ;;  %v5472_v3 = vpop.f32.mrf.mxu0 }
 0x322   : > { %v1386_v51 = vpop.permute.xlu0 %1385 }
 0x323   : > { %v5478_v59 = vpop.f32.mrf.mxu0 }
 0x324   : > { %4141 = vmatmul.mubr.msk.f32.gmra.mxu1 %vm2041_vm7, %v3084_v15 }
 0x325   : > { %v2996_v21 = vpop.permute.xlu1 %2995  ;;  %4143 = vmatprep.mubr.msk.f32.mxu1 %vm2041_vm7, %v5130_v5  ;;  %v1578_v5 = vsel %vm272_vm1, %v5260_v9, %v1386_v51  ;;  %v4064_v15 = vpop.f32.mrf.mxu0 }
 0x326   : > { %v2872_v53 = vpop.permute.xlu0 %2871 }
 0x328   : > { %4144 = vmatmul.mubr.msk.f32.gmra.mxu1 %vm2041_vm7, %v5144_v46 }
 0x329   : > { %v2870_v0 = vpop.permute.xlu1 %2869  ;;  %4146 = vmatprep.mubr.msk.f32.mxu1 %vm2041_vm7, %v5174_v44 }
 0x32a   : > { %v1514_v48 = vpop.permute.xlu0 %1513 }
 0x32b   : > { %v1611_v43 = vsel %vm1579_vm2, %v1578_v5, %v1514_v48 }
 0x32c   : > { %4147 = vmatmul.mubr.msk.f32.gmra.mxu1 %vm2041_vm7, %v5187_v62 }
 0x32d   : > { %v1512_v25 = vpop.permute.xlu1 %1511  ;;  %4149 = vmatprep.mubr.msk.f32.mxu1 %vm2041_vm7, %v5210_v54  ;;  %v3061_v54 = vsel %vm272_vm1, %v5245_v55, %v5293_v47  ;;  %v3063_v47 = vsel %vm272_vm1, %v5262_v35, %v2866_v2 }
 0x32e   : > { %v1610_v46 = vsel %vm1579_vm2, %v1577_v39, %v1512_v25  ;;  %v2814_v45 = vpop.permute.xlu0 %2813  ;;  %v3093_v49 = vsel %vm1579_vm2, %v3061_v54, %v5327_v29  ;;  %v3095_v4 = vsel %vm1579_vm2, %v3063_v47, %v2994_v34  ;;  %v3065_v29 = vsel %vm272_vm1, %v5272_v42, %v2870_v0  ;;  %v2535_v0 = vpop.f32.mrf.mxu0 }
 0x32f   : > { %4104 = vmatprep.mubr.msk.f32.mxu0 %vm2041_vm7, %v1610_v46 }
 0x330   : > { %4105 = vmatmul.mubr.msk.f32.gmra.mxu0 %vm2041_vm7, %v1611_v43  ;;  %4150 = vmatmul.mubr.msk.f32.gmra.mxu1 %vm2041_vm7, %v5218_v26  ;;  %v3062_v26 = vsel %vm272_vm1, %v5254_v57, %v5281_v8  ;;  %v3064_v57 = vsel %vm272_vm1, %v5260_v9, %v5344_v23  ;;  %v3066_v9 = vsel %vm272_vm1, %v5274_v30, %v2872_v53  ;;  %v2716_v23 = vld [vmem:[#allocation2 + $0x22f] sm:$0xff]  ;;  %v5452_v30 = vpop.f32.mrf.mxu1  ;;  %v4067_v48 = vpop.f32.mrf.mxu0 }
 0x331   : > { %v2998_v44 = vpop.permute.xlu1 %2997  ;;  %4152 = vmatprep.mubr.msk.f32.mxu1 %vm2041_vm7, %v5239_v20  ;;  %v3037_v20 = vsel %vm272_vm1, %v2685_v24, %v2814_v45  ;;  %v3094_v55 = vsel %vm1579_vm2, %v3062_v26, %v5341_v38  ;;  %v3096_v35 = vsel %vm1579_vm2, %v3064_v57, %v2996_v21 }
 0x332   : > { %v2816_v62 = vpop.permute.xlu0 %2815  ;;  %v3097_v50 = vsel %vm1579_vm2, %v3065_v29, %v2998_v44  ;;  %v5454_v2 = vpop.f32.mrf.mxu1 }
 0x333   : > { %v3038_v8 = vsel %vm272_vm1, %v2686_v6, %v2816_v62  ;;  %v2545_v5 = vpop.f32.mrf.mxu0 }
 0x334   : > { %4153 = vmatmul.mubr.msk.f32.gmra.mxu1 %vm2041_vm7, %v5752_v27  ;;  %v4004_v10 = vpop.f32.mrf.mxu1 }
 0x335   : > { %v3000_v56 = vpop.permute.xlu1 %2999  ;;  %4155 = vmatprep.mubr.msk.f32.mxu1 %vm2041_vm7, %v3093_v49  ;;  %v4070_v46 = vpop.f32.mrf.mxu0 }
 0x336   : > { %v2942_v1 = vpop.permute.xlu0 %2941  ;;  %v3098_v31 = vsel %vm1579_vm2, %v3066_v9, %v3000_v56  ;;  %v2214_v18 = vpop.f32.mrf.mxu1 }
 0x337   : > { %v3069_v7 = vsel %vm1579_vm2, %v3037_v20, %v2942_v1  ;;  %v2555_v44 = vpop.f32.mrf.mxu0 }
 0x338   : > { %4119 = vmatprep.mubr.msk.f32.mxu0 %vm2041_vm7, %v3069_v7  ;;  %4156 = vmatmul.mubr.msk.f32.gmra.mxu1 %vm2041_vm7, %v3094_v55  ;;  %v4007_v41 = vpop.f32.mrf.mxu1 }
 0x339   : > { %v2874_v14 = vpop.permute.xlu1 %2873  ;;  %4158 = vmatprep.mubr.msk.f32.mxu1 %vm2041_vm7, %v3095_v4  ;;  %v4073_v62 = vpop.f32.mrf.mxu0 }
 0x33a   : > { %v2944_v58 = vpop.permute.xlu0 %2943  ;;  %v3067_v42 = vsel %vm272_vm1, %v2715_v33, %v2874_v14  ;;  %v2224_v32 = vpop.f32.mrf.mxu1  ;;  %v2551_v33 = vadd.f32 %v4067_v48, %v4007_v41 }
 0x33b   : > { %v3070_v17 = vsel %vm1579_vm2, %v3038_v8, %v2944_v58  ;;  %v2565_v27 = vpop.f32.mrf.mxu0  ;;  %v2541_v58 = vadd.f32 %v4064_v15, %v4004_v10 }
 0x33c   : > { %4120 = vmatmul.mubr.msk.f32.vlgmr.msra.gmra.mxu0 %vm2041_vm7, %v3070_v17  ;;  %4159 = vmatmul.mubr.msk.f32.gmra.mxu1 %vm2041_vm7, %v3096_v35  ;;  %v4010_v36 = vpop.f32.mrf.mxu1  ;;  %v5527_v17 = vld [vmem:[%s5743_s5] ss:$0 sm:$0xff] }
 0x33d   : > { %v2876_v28 = vpop.permute.xlu1 %2875  ;;  %4161 = vmatprep.mubr.msk.f32.mxu1 %vm2041_vm7, %v3097_v50  ;;  %v5496_v24 = vpop.f32.mrf.mxu0  ;;  %v2536_v50 = vadd.f32 %v2535_v0, %v2214_v18  ;;  %v2561_v15 = vadd.f32 %v4070_v46, %v4010_v36  ;;  %v4193_v0 = vld [vmem:[%s4535_s26 + $0x10] sm:$0xff] }
 0x33e   : > { %v3068_v12 = vsel %vm272_vm1, %v2716_v23, %v2876_v28  ;;  %v5456_v37 = vpop.f32.mrf.mxu1 }
 0x33f   : > { %v5502_v20 = vpop.f32.mrf.mxu0 }
 0x340   : > { %4162 = vmatmul.mubr.msk.f32.gmra.mxu1 %vm2041_vm7, %v3098_v31  ;;  %v5458_v52 = vpop.f32.mrf.mxu1 }
 0x341   : > { %v3002_v38 = vpop.permute.xlu1 %3001  ;;  %v5504_v1 = vpop.f32.mrf.mxu0 }
 0x342   : > { %v3099_v40 = vsel %vm1579_vm2, %v3067_v42, %v3002_v38  ;;  %v5460_v61 = vpop.f32.mrf.mxu1 }
 0x343   : > { %4164 = vmatprep.mubr.msk.f32.mxu1 %vm2041_vm7, %v3099_v40  ;;  %v5510_v7 = vpop.f32.mrf.mxu0  ;;  %v2546_v40 = vadd.f32 %v2545_v5, %v2224_v32  ;;  %v2556_v5 = vadd.f32 %v2555_v44, %v5456_v37 }
 0x344   : > { %v5462_v11 = vpop.f32.mrf.mxu1 }
 0x345   : > { %v3004_v60 = vpop.permute.xlu1 %3003  ;;  %v5512_v4 = vpop.f32.mrf.mxu0 }
 0x346   : > { %v3100_v63 = vsel %vm1579_vm2, %v3068_v12, %v3004_v60  ;;  %v5464_v19 = vpop.f32.mrf.mxu1  ;;  %v4192_v12 = vld [vmem:[%s4535_s26 + $0x18] sm:$0xff] }
 0x347   : > { %4165 = vmatmul.mubr.msk.f32.gmra.mxu1 %vm2041_vm7, %v3100_v63  ;;  %v5518_v57 = vpop.f32.mrf.mxu0 }
 0x348   : > { %v5466_v22 = vpop.f32.mrf.mxu1 }
 0x349   : > { %v5522_v35 = vpop.f32.mrf.mxu0 }
 0x34a   : > { %v5468_v16 = vpop.f32.mrf.mxu1 }
 0x34b   : > { %v5536_v38 = vpop.f32.mrf.mxu0 }
 0x34c   : > { %v5470_v34 = vpop.f32.mrf.mxu1 }
 0x34e   : > { %v5474_v51 = vpop.f32.mrf.mxu1 }
 0x350   : > { %v5476_v13 = vpop.f32.mrf.mxu1 }
 0x352   : > { %v5480_v21 = vpop.f32.mrf.mxu1 }
 0x35a   : > { %v5540_v18 = vpop.f32.mrf.mxu0 }
 0x360   : > { %v5482_v53 = vpop.f32.mrf.mxu1 }
 0x362   : > { %v5484_v39 = vpop.f32.mrf.mxu1 }
 0x378   : > { %v5486_v25 = vpop.f32.mrf.mxu1 }
 0x37a   : > { %v5488_v45 = vpop.f32.mrf.mxu1 }
 0x390   : > { %v5490_v43 = vpop.f32.mrf.mxu1 }
 0x392   : > { %v5492_v54 = vpop.f32.mrf.mxu1 }
 0x3a8   : > { %v5494_v49 = vpop.f32.mrf.mxu1 }
 0x3aa   : > { %v5498_v56 = vpop.f32.mrf.mxu1 }
 0x3b4   : > { %v5500_v26 = vpop.f32.mrf.mxu1 }
 0x3b6   : > { %v5506_v55 = vpop.f32.mrf.mxu1 }
 0x3bc   : > { %v5508_v47 = vpop.f32.mrf.mxu1 }
 0x3be   : > { %v5514_v6 = vpop.f32.mrf.mxu1 }
 0x3c8   : > { %v5516_v14 = vpop.f32.mrf.mxu1 }
 0x3ca   : > { %v5520_v8 = vpop.f32.mrf.mxu1 }
 0x3cc   : > { %v4124_v29 = vpop.f32.mrf.mxu1 }
 0x3cd   : > { %v3432_v28 = vadd.f32 %v4124_v29, %v2541_v58 }
 0x3ce   : > { %v3280_v9 = vpop.f32.mrf.mxu1 }
 0x3cf   : > { %v3471_v31 = vadd.f32 %v5527_v17, %v3432_v28  ;;  %v3431_v42 = vadd.f32 %v3280_v9, %v2536_v50  ;;  %v4194_v50 = vld [vmem:[%s4535_s26 + $0x28] sm:$0xff]  ;;  %v5551_v9 = vpop.f32.mrf.mxu0 }
 0x3d0   : > { %v4127_v23 = vpop.f32.mrf.mxu1 }
 0x3d1   : > { %v3503_v60 = vadd.f32 %v4192_v12, %v3471_v31  ;;  %v3470_v63 = vadd.f32 %v5527_v17, %v3431_v42  ;;  %v3434_v10 = vadd.f32 %v4127_v23, %v2551_v33  ;;  %v2571_v31 = vadd.f32 %v4073_v62, %v5458_v52  ;;  %v4195_v42 = vld [vmem:[%s4535_s26 + $0x20] sm:$0xff] }
 0x3d2   : > { %v3290_v41 = vpop.f32.mrf.mxu1 }
 0x3d3   : > { %3535 = vst.msk [vmem:[%s5534_s12 + $0x18] sm:$0xff] %vm1130_vm0, %v3503_v60  ;;  %v3502_v48 = vadd.f32 %v4193_v0, %v3470_v63  ;;  %v3473_v58 = vadd.f32 %v5527_v17, %v3434_v10  ;;  %v3433_v29 = vadd.f32 %v3290_v41, %v2546_v40  ;;  %v5558_v40 = vpop.f32.mrf.mxu0  ;;  %v2566_v60 = vadd.f32 %v2565_v27, %v5460_v61  ;;  %v4196_v63 = vld [vmem:[%s4535_s26 + $0x38] sm:$0xff]  ;;  %v4197_v0 = vld [vmem:[%s4535_s26 + $0x30] sm:$0xff] }
 0x3d4   : > { %v4130_v32 = vpop.f32.mrf.mxu1 }
 0x3d5   : > { %3534 = vst.msk [vmem:[%s5534_s12 + $0x10] sm:$0xff] %vm1130_vm0, %v3502_v48  ;;  %v3505_v28 = vadd.f32 %v4194_v50, %v3473_v58  ;;  %v3472_v36 = vadd.f32 %v5527_v17, %v3433_v29  ;;  %v3436_v46 = vadd.f32 %v4130_v32, %v2561_v15  ;;  %v2581_v15 = vadd.f32 %v5496_v24, %v5462_v11  ;;  %v5571_v58 = vpop.f32.mrf.mxu0  ;;  %v4198_v11 = vld [vmem:[%s4535_s26 + $0x48] sm:$0xff] }
 0x3d6   : > { %v3300_v33 = vpop.f32.mrf.mxu1  ;;  %v2576_v32 = vadd.f32 %v5502_v20, %v5464_v19  ;;  %v4199_v19 = vld [vmem:[%s4535_s26 + $0x40] sm:$0xff] }
 0x3d7   : > { %3537 = vst.msk [vmem:[%s5534_s12 + $0x28] sm:$0xff] %vm1130_vm0, %v3505_v28  ;;  %v3504_v37 = vadd.f32 %v4195_v42, %v3472_v36  ;;  %v3475_v44 = vadd.f32 %v5527_v17, %v3436_v46  ;;  %v3435_v23 = vadd.f32 %v3300_v33, %v2556_v5  ;;  %v5579_v28 = vpop.f32.mrf.mxu0  ;;  %v2591_v46 = vadd.f32 %v5504_v1, %v5466_v22 }
 0x3d8   : > { %v4133_v12 = vpop.f32.mrf.mxu1 }
 0x3d9   : > { %3536 = vst.msk [vmem:[%s5534_s12 + $0x20] sm:$0xff] %vm1130_vm0, %v3504_v37  ;;  %v3507_v52 = vadd.f32 %v4196_v63, %v3475_v44  ;;  %v3474_v62 = vadd.f32 %v5527_v17, %v3435_v23  ;;  %v3438_v10 = vadd.f32 %v4133_v12, %v2571_v31  ;;  %v2586_v37 = vadd.f32 %v5510_v7, %v5468_v16  ;;  %v4200_v44 = vld [vmem:[%s4535_s26 + $0x58] sm:$0xff]  ;;  %v5593_v12 = vpop.f32.mrf.mxu0  ;;  %v4201_v16 = vld [vmem:[%s4535_s26 + $0x50] sm:$0xff] }
 0x3da   : > { %v3310_v41 = vpop.f32.mrf.mxu1  ;;  %v2601_v63 = vadd.f32 %v5512_v4, %v5470_v34  ;;  %v4202_v34 = vld [vmem:[%s4535_s26 + $0x68] sm:$0xff] }
 0x3db   : > { %3539 = vst.msk [vmem:[%s5534_s12 + $0x38] sm:$0xff] %vm1130_vm0, %v3507_v52  ;;  %v3506_v48 = vadd.f32 %v4197_v0, %v3474_v62  ;;  %v3477_v61 = vadd.f32 %v5527_v17, %v3438_v10  ;;  %v3437_v27 = vadd.f32 %v3310_v41, %v2566_v60  ;;  %v5601_v10 = vpop.f32.mrf.mxu0 }
 0x3dc   : > { %v4136_v29 = vpop.f32.mrf.mxu1 }
 0x3dd   : > { %3538 = vst.msk [vmem:[%s5534_s12 + $0x30] sm:$0xff] %vm1130_vm0, %v3506_v48  ;;  %v3509_v24 = vadd.f32 %v4198_v11, %v3477_v61  ;;  %v3476_v5 = vadd.f32 %v5527_v17, %v3437_v27  ;;  %v3440_v50 = vadd.f32 %v4136_v29, %v2581_v15  ;;  %v2596_v15 = vadd.f32 %v5518_v57, %v5474_v51  ;;  %v4203_v29 = vld [vmem:[%s4535_s26 + $0x60] sm:$0xff]  ;;  %v5615_v11 = vpop.f32.mrf.mxu0 }
 0x3de   : > { %v3320_v36 = vpop.f32.mrf.mxu1  ;;  %v2611_v27 = vadd.f32 %v5522_v35, %v5476_v13  ;;  %v4204_v13 = vld [vmem:[%s4535_s26 + $0x78] sm:$0xff] }
 0x3df   : > { %3541 = vst.msk [vmem:[%s5534_s12 + $0x48] sm:$0xff] %vm1130_vm0, %v3509_v24  ;;  %v3508_v20 = vadd.f32 %v4199_v19, %v3476_v5  ;;  %v3479_v33 = vadd.f32 %v5527_v17, %v3440_v50  ;;  %v3439_v31 = vadd.f32 %v3320_v36, %v2576_v32  ;;  %v2606_v5 = vadd.f32 %v5536_v38, %v5480_v21  ;;  %v4205_v21 = vld [vmem:[%s4535_s26 + $0x70] sm:$0xff] }
 0x3e0   : > { %v4139_v42 = vpop.f32.mrf.mxu1 }
 0x3e1   : > { %3540 = vst.msk [vmem:[%s5534_s12 + $0x40] sm:$0xff] %vm1130_vm0, %v3508_v20  ;;  %v3511_v23 = vadd.f32 %v4200_v44, %v3479_v33  ;;  %v3478_v22 = vadd.f32 %v5527_v17, %v3439_v31  ;;  %v3442_v1 = vadd.f32 %v4139_v42, %v2591_v46  ;;  %v5623_v46 = vpop.f32.mrf.mxu0  ;;  %v2621_v20 = vadd.f32 %v5540_v18, %v5482_v53  ;;  %v4206_v44 = vld [vmem:[%s4535_s26 + $0x88] sm:$0xff] }
 0x3e2   : > { %v3330_v60 = vpop.f32.mrf.mxu1 }
 0x3e3   : > { %3543 = vst.msk [vmem:[%s5534_s12 + $0x58] sm:$0xff] %vm1130_vm0, %v3511_v23  ;;  %v3510_v7 = vadd.f32 %v4201_v16, %v3478_v22  ;;  %v3481_v52 = vadd.f32 %v5527_v17, %v3442_v1  ;;  %v3441_v62 = vadd.f32 %v3330_v60, %v2586_v37  ;;  %v2616_v37 = vadd.f32 %v5551_v9, %v5484_v39  ;;  %v5637_v22 = vpop.f32.mrf.mxu0  ;;  %v4207_v39 = vld [vmem:[%s4535_s26 + $0x80] sm:$0xff] }
 0x3e4   : > { %v4142_v41 = vpop.f32.mrf.mxu1  ;;  %v2631_v60 = vadd.f32 %v5558_v40, %v5486_v25 }
 0x3e5   : > { %3542 = vst.msk [vmem:[%s5534_s12 + $0x50] sm:$0xff] %vm1130_vm0, %v3510_v7  ;;  %v3513_v4 = vadd.f32 %v4202_v34, %v3481_v52  ;;  %v3480_v0 = vadd.f32 %v5527_v17, %v3441_v62  ;;  %v3444_v48 = vadd.f32 %v4142_v41, %v2601_v63  ;;  %v4103_v7 = vpop.f32.mrf.mxu0  ;;  %v2626_v62 = vadd.f32 %v5571_v58, %v5488_v45  ;;  %v4208_v41 = vld [vmem:[%s4535_s26 + $0x98] sm:$0xff] }
 0x3e6   : > { %v3340_v61 = vpop.f32.mrf.mxu1 }
 0x3e7   : > { %3545 = vst.msk [vmem:[%s5534_s12 + $0x68] sm:$0xff] %vm1130_vm0, %v3513_v4  ;;  %v3512_v32 = vadd.f32 %v4203_v29, %v3480_v0  ;;  %v3483_v51 = vadd.f32 %v5527_v17, %v3444_v48  ;;  %v3443_v57 = vadd.f32 %v3340_v61, %v2596_v15  ;;  %v2641_v4 = vadd.f32 %v5579_v28, %v5490_v43  ;;  %v4209_v0 = vld [vmem:[%s4535_s26 + $0x90] sm:$0xff]  ;;  %v2665_v61 = vpop.f32.mrf.mxu0 }
 0x3e8   : > { %v4145_v24 = vpop.f32.mrf.mxu1  ;;  %v2636_v29 = vadd.f32 %v5593_v12, %v5492_v54 }
 0x3e9   : > { %3544 = vst.msk [vmem:[%s5534_s12 + $0x60] sm:$0xff] %vm1130_vm0, %v3512_v32  ;;  %v3515_v35 = vadd.f32 %v4204_v13, %v3483_v51  ;;  %v3482_v50 = vadd.f32 %v5527_v17, %v3443_v57  ;;  %v3446_v36 = vadd.f32 %v4145_v24, %v2611_v27  ;;  %v4210_v32 = vld [vmem:[%s4535_s26 + $0xa8] sm:$0xff]  ;;  %v4211_v13 = vld [vmem:[%s4535_s26 + $0xa0] sm:$0xff] }
 0x3ea   : > { %v3350_v19 = vpop.f32.mrf.mxu1 }
 0x3eb   : > { %3547 = vst.msk [vmem:[%s5534_s12 + $0x78] sm:$0xff] %vm1130_vm0, %v3515_v35  ;;  %v3514_v38 = vadd.f32 %v4205_v21, %v3482_v50  ;;  %v3485_v33 = vadd.f32 %v5527_v17, %v3446_v36  ;;  %v3445_v31 = vadd.f32 %v3350_v19, %v2606_v5  ;;  %v2651_v5 = vadd.f32 %v5601_v10, %v5494_v49  ;;  %v4212_v19 = vld [vmem:[%s4535_s26 + $0xb8] sm:$0xff] }
 0x3ec   : > { %v4148_v42 = vpop.f32.mrf.mxu1  ;;  %v2646_v36 = vadd.f32 %v5615_v11, %v5498_v56  ;;  %v2531_v21 = vadd.f32 %v5472_v3, %v5452_v30  ;;  %v4213_v56 = vld [vmem:[%s4535_s26 + $0xb0] sm:$0xff]  ;;  %v4214_v30 = vld [vmem:[%s4535_s26 + $0xc8] sm:$0xff] }
 0x3ed   : > { %3546 = vst.msk [vmem:[%s5534_s12 + $0x70] sm:$0xff] %vm1130_vm0, %v3514_v38  ;;  %v3517_v23 = vadd.f32 %v4206_v44, %v3485_v33  ;;  %v3484_v53 = vadd.f32 %v5527_v17, %v3445_v31  ;;  %v3448_v18 = vadd.f32 %v4148_v42, %v2621_v20  ;;  %v2661_v31 = vadd.f32 %v5623_v46, %v5500_v26 }
 0x3ee   : > { %v3360_v1 = vpop.f32.mrf.mxu1  ;;  %v2526_v44 = vadd.f32 %v5478_v59, %v5454_v2  ;;  %v4215_v59 = vld [vmem:[%s4535_s26 + $0xc0] sm:$0xff] }
 0x3ef   : > { %3549 = vst.msk [vmem:[%s5534_s12 + $0x88] sm:$0xff] %vm1130_vm0, %v3517_v23  ;;  %v3516_v9 = vadd.f32 %v4207_v39, %v3484_v53  ;;  %v3487_v63 = vadd.f32 %v5527_v17, %v3448_v18  ;;  %v3447_v16 = vadd.f32 %v3360_v1, %v2616_v37  ;;  %v2656_v1 = vadd.f32 %v5637_v22, %v5506_v55 }
 0x3f0   : > { %v4151_v52 = vpop.f32.mrf.mxu1  ;;  %v5663_v57 = vpop.f32.mrf.mxu0 }
 0x3f1   : > { %3548 = vst.msk [vmem:[%s5534_s12 + $0x80] sm:$0xff] %vm1130_vm0, %v3516_v9  ;;  %v3519_v25 = vadd.f32 %v4208_v41, %v3487_v63  ;;  %v3486_v40 = vadd.f32 %v5527_v17, %v3447_v16  ;;  %v3450_v15 = vadd.f32 %v4151_v52, %v2631_v60  ;;  %v2671_v60 = vadd.f32 %v4103_v7, %v5508_v47  ;;  %v4216_v47 = vld [vmem:[%s4535_s26 + $0x8] sm:$0xff]  ;;  %v4217_v41 = vld [vmem:[%s4535_s26 + $0xd8] sm:$0xff] }
 0x3f2   : > { %v3370_v34 = vpop.f32.mrf.mxu1  ;;  %v2675_v38 = vpop.f32.mrf.mxu0 }
 0x3f3   : > { %3551 = vst.msk [vmem:[%s5534_s12 + $0x98] sm:$0xff] %vm1130_vm0, %v3519_v25  ;;  %v3518_v48 = vadd.f32 %v4209_v0, %v3486_v40  ;;  %v3489_v45 = vadd.f32 %v5527_v17, %v3450_v15  ;;  %v3449_v58 = vadd.f32 %v3370_v34, %v2626_v62  ;;  %v2666_v62 = vadd.f32 %v2665_v61, %v5514_v6  ;;  %v4218_v6 = vld [vmem:[%s4535_s26] sm:$0xff] }
 0x3f4   : > { %v4154_v27 = vpop.f32.mrf.mxu1 }
 0x3f5   : > { %3550 = vst.msk [vmem:[%s5534_s12 + $0x90] sm:$0xff] %vm1130_vm0, %v3518_v48  ;;  %v3521_v43 = vadd.f32 %v4210_v32, %v3489_v45  ;;  %v3488_v28 = vadd.f32 %v5527_v17, %v3449_v58  ;;  %v3452_v51 = vadd.f32 %v4154_v27, %v2641_v4  ;;  %v4219_v58 = vld [vmem:[%s4535_s26 + $0xd0] sm:$0xff]  ;;  %v4220_v27 = vld [vmem:[%s4535_s26 + $0xe8] sm:$0xff] }
 0x3f6   : > { %v3380_v24 = vpop.f32.mrf.mxu1 }
 0x3f7   : > { %3553 = vst.msk [vmem:[%s5534_s12 + $0xa8] sm:$0xff] %vm1130_vm0, %v3521_v43  ;;  %v3520_v54 = vadd.f32 %v4211_v13, %v3488_v28  ;;  %v3491_v12 = vadd.f32 %v5527_v17, %v3452_v51  ;;  %v3451_v35 = vadd.f32 %v3380_v24, %v2636_v29  ;;  %v2681_v43 = vadd.f32 %v5663_v57, %v5516_v14  ;;  %v4221_v28 = vld [vmem:[%s4535_s26 + $0xe0] sm:$0xff] }
 0x3f8   : > { %v4157_v50 = vpop.f32.mrf.mxu1 }
 0x3f9   : > { %3552 = vst.msk [vmem:[%s5534_s12 + $0xa0] sm:$0xff] %vm1130_vm0, %v3520_v54  ;;  %v3523_v20 = vadd.f32 %v4212_v19, %v3491_v12  ;;  %v3490_v49 = vadd.f32 %v5527_v17, %v3451_v35  ;;  %v3454_v10 = vadd.f32 %v4157_v50, %v2651_v5  ;;  %v2676_v5 = vadd.f32 %v2675_v38, %v5520_v8  ;;  %v4222_v50 = vld [vmem:[%s4535_s26 + $0xf8] sm:$0xff] }
 0x3fa   : > { %v3390_v33 = vpop.f32.mrf.mxu1 }
 0x3fb   : > { %3555 = vst.msk [vmem:[%s5534_s12 + $0xb8] sm:$0xff] %vm1130_vm0, %v3523_v20  ;;  %v3522_v11 = vadd.f32 %v4213_v56, %v3490_v49  ;;  %v3493_v42 = vadd.f32 %v5527_v17, %v3454_v10  ;;  %v3453_v37 = vadd.f32 %v3390_v33, %v2646_v36  ;;  %v4223_v36 = vld [vmem:[%s4535_s26 + $0xf0] sm:$0xff] }
 0x3fc   : > { %v4121_v23 = vpop.f32.mrf.mxu0  ;;  %v4160_v53 = vpop.f32.mrf.mxu1 }
 0x3fd   : > { %3554 = vst.msk [vmem:[%s5534_s12 + $0xb0] sm:$0xff] %vm1130_vm0, %v3522_v11  ;;  %v3525_v3 = vadd.f32 %v4214_v30, %v3493_v42  ;;  %v3492_v26 = vadd.f32 %v5527_v17, %v3453_v37  ;;  %v3430_v46 = vadd.f32 %v4121_v23, %v2531_v21  ;;  %v3456_v18 = vadd.f32 %v4160_v53, %v2661_v31 }
 0x3fe   : > { %v3270_v39 = vpop.f32.mrf.mxu0  ;;  %v3400_v2 = vpop.f32.mrf.mxu1 }
 0x3ff   : > { %3557 = vst.msk [vmem:[%s5534_s12 + $0xc8] sm:$0xff] %vm1130_vm0, %v3525_v3  ;;  %v3524_v9 = vadd.f32 %v4215_v59, %v3492_v26  ;;  %v3469_v63 = vadd.f32 %v5527_v17, %v3430_v46  ;;  %v3495_v16 = vadd.f32 %v5527_v17, %v3456_v18  ;;  %v3429_v52 = vadd.f32 %v3270_v39, %v2526_v44 }
 0x400   : > { %v3455_v55 = vadd.f32 %v3400_v2, %v2656_v1  ;;  %v4163_v22 = vpop.f32.mrf.mxu1 }
 0x401   : > { %3556 = vst.msk [vmem:[%s5534_s12 + $0xc0] sm:$0xff] %vm1130_vm0, %v3524_v9  ;;  %v3501_v7 = vadd.f32 %v4216_v47, %v3469_v63  ;;  %v3527_v25 = vadd.f32 %v4217_v41, %v3495_v16  ;;  %v3468_v40 = vadd.f32 %v5527_v17, %v3429_v52  ;;  %v3458_v15 = vadd.f32 %v4163_v22, %v2671_v60 }
 0x402   : > { %v3494_v34 = vadd.f32 %v5527_v17, %v3455_v55  ;;  %v3410_v4 = vpop.f32.mrf.mxu1 }
 0x403   : > { %3533 = vst.msk [vmem:[%s5534_s12 + $0x8] sm:$0xff] %vm1130_vm0, %v3501_v7  ;;  %3559 = vst.msk [vmem:[%s5534_s12 + $0xd8] sm:$0xff] %vm1130_vm0, %v3527_v25  ;;  %v3500_v0 = vadd.f32 %v4218_v6, %v3468_v40  ;;  %v3497_v48 = vadd.f32 %v5527_v17, %v3458_v15  ;;  %v3457_v45 = vadd.f32 %v3410_v4, %v2666_v62 }
 0x404   : > { %v3526_v61 = vadd.f32 %v4219_v58, %v3494_v34 }
 0x405   : > { %3532 = vst.msk [vmem:[%s5534_s12] sm:$0xff] %vm1130_vm0, %v3500_v0  ;;  %v3529_v29 = vadd.f32 %v4220_v27, %v3497_v48  ;;  %v3496_v32 = vadd.f32 %v5527_v17, %v3457_v45 }
 0x406   : > { %3558 = vst.msk [vmem:[%s5534_s12 + $0xd0] sm:$0xff] %vm1130_vm0, %v3526_v61 }
 0x407   : > { %3561 = vst.msk [vmem:[%s5534_s12 + $0xe8] sm:$0xff] %vm1130_vm0, %v3529_v29  ;;  %v3528_v51 = vadd.f32 %v4221_v28, %v3496_v32  ;;  %v4166_v24 = vpop.f32.mrf.mxu1 }
 0x408   : > { %v3460_v13 = vadd.f32 %v4166_v24, %v2681_v43 }
 0x409   : > { %3560 = vst.msk [vmem:[%s5534_s12 + $0xe0] sm:$0xff] %vm1130_vm0, %v3528_v51  ;;  %v3420_v54 = vpop.f32.mrf.mxu1 }
 0x40a   : > { %v3499_v12 = vadd.f32 %v5527_v17, %v3460_v13  ;;  %v3459_v35 = vadd.f32 %v3420_v54, %v2676_v5 }
 0x40c   : > { %v3531_v14 = vadd.f32 %v4222_v50, %v3499_v12  ;;  %v3498_v57 = vadd.f32 %v5527_v17, %v3459_v35 }
 0x40e   : > { %3563 = vst.msk [vmem:[%s5534_s12 + $0xf8] sm:$0xff] %vm1130_vm0, %v3531_v14  ;;  %v3530_v19 = vadd.f32 %v4223_v36, %v3498_v57 }
 0x410   : > { %3562 = vst.msk [vmem:[%s5534_s12 + $0xf0] sm:$0xff] %vm1130_vm0, %v3530_v19 }
 0x411 PF: > { %s16_s21 = sadd.s32 1, %s4230_s21  }
 0x412   : > { %p13_p4 = scmp.ge.s32.totalorder %s16_s21, 4  }
 0x414   :  { %15 = sbr.rel (!%p13_p4) target bundleno = 1 (0x1), region = 82 }

</bundles_post_ra>
